<compile_context>
chip_gen: v6e
topology: v6e:2x2x1
jax: 0.10.0
libtpu: 0.0.40
codegen_flags: <defaults>
</compile_context>

<pallas_src>
import functools
import math

import jax
import jax.numpy as jnp
from jax import lax
from jax.experimental import pallas as pl
from jax.experimental.pallas import tpu as pltpu


def _round_up(x, m):
    return (x + m - 1) // m * m


def _vmem_limit_bytes(need_bytes):
    """Generation-aware VMEM budget: >=32 MiB, capped at 3/4 of physical VMEM."""
    cap = None
    try:
        cap = getattr(pltpu.get_tpu_info(), "vmem_capacity_bytes", None)
    except Exception:  # pragma: no cover - info query is best-effort
        cap = None
    limit = max(32 * 1024 * 1024, int(need_bytes))
    if cap:
        limit = min(limit, int(cap) * 3 // 4)
    else:
        limit = min(limit, 32 * 1024 * 1024)
    return limit


# --------------------------------------------------------------------------- #
# Kernel A: fused 3x3 stride-1 conv + folded-BN shift (+ residual) (+ ReLU)
#           -> no im2col matrix in HBM; 9 tap matmuls accumulated in-kernel.
# --------------------------------------------------------------------------- #
def _conv3x3_accum(x_ref, w_ref, *, cin):
    """Sum of 9 tap matmuls over the in-VMEM padded image block -> f32 (Ho*Wo, Cout)."""
    _, hp, wp, _ = x_ref.shape
    ho, wo = hp - 2, wp - 2
    cout = w_ref.shape[1]
    # f32 working copy keeps the window slices / reshapes sublane-tile aligned.
    xv = x_ref[0].astype(jnp.float32)                      # (hp, wp, cin)
    acc = jnp.zeros((ho * wo, cout), jnp.float32)
    for t in range(9):
        i, j = t // 3, t % 3
        a_t = xv[i:i + ho, j:j + wo, :].reshape(ho * wo, cin).astype(jnp.bfloat16)
        w_t = w_ref[t * cin:(t + 1) * cin, :]              # (cin, cout) bf16
        acc = acc + jnp.dot(a_t, w_t, preferred_element_type=jnp.float32)
    return acc, ho, wo, cout


def _conv3x3_kernel(x_ref, w_ref, t_ref, o_ref, *, cin, relu):
    acc, ho, wo, cout = _conv3x3_accum(x_ref, w_ref, cin=cin)
    y = acc + t_ref[...]
    if relu:
        y = jnp.maximum(y, 0.0)
    o_ref[...] = y.reshape(1, ho, wo, cout).astype(o_ref.dtype)


def _conv3x3_res_kernel(x_ref, w_ref, t_ref, r_ref, o_ref, *, cin, relu):
    acc, ho, wo, cout = _conv3x3_accum(x_ref, w_ref, cin=cin)
    y = acc + t_ref[...] + r_ref[...].astype(jnp.float32).reshape(ho * wo, cout)
    if relu:
        y = jnp.maximum(y, 0.0)
    o_ref[...] = y.reshape(1, ho, wo, cout).astype(o_ref.dtype)


def conv3x3_fused(x_nhwc, w_mat, shift, residual=None, relu=True,
                  out_dtype=jnp.bfloat16):
    """3x3 / stride-1 / pad-1 conv with BN folded into (w_mat, shift), fused epilogue.

    x_nhwc   : (N, H, W, Cin) bf16 activation
    w_mat    : (>=9*Cin, Cout) bf16 weight, tap-major, BN scale pre-folded
    shift    : (1, Cout) f32 folded BN shift
    residual : optional (N, H, W, Cout), added before the final ReLU
    """
    n, h, w, cin = x_nhwc.shape
    kdim, cout = w_mat.shape
    assert kdim >= 9 * cin, (kdim, cin)
    xp = jnp.pad(x_nhwc.astype(jnp.bfloat16), ((0, 0), (1, 1), (1, 1), (0, 0)))
    hp, wp = h + 2, w + 2

    in_specs = [
        pl.BlockSpec((1, hp, wp, cin), lambda b: (b, 0, 0, 0)),
        pl.BlockSpec((kdim, cout), lambda b: (0, 0)),
        pl.BlockSpec((1, cout), lambda b: (0, 0)),
    ]
    operands = [xp, w_mat, shift]
    if residual is None:
        kernel = functools.partial(_conv3x3_kernel, cin=cin, relu=relu)
    else:
        in_specs.append(pl.BlockSpec((1, h, w, cout), lambda b: (b, 0, 0, 0)))
        operands.append(residual.astype(jnp.bfloat16))
        kernel = functools.partial(_conv3x3_res_kernel, cin=cin, relu=relu)

    blk_bytes = (hp * wp * cin * 2 + kdim * cout * 2 + cout * 4
                 + h * w * cout * 2 * (2 if residual is not None else 1))
    need = 2 * blk_bytes + hp * wp * cin * 4 + h * w * cout * 8 + (4 << 20)

    return pl.pallas_call(
        kernel,
        out_shape=jax.ShapeDtypeStruct((n, h, w, cout), out_dtype),
        grid_spec=pltpu.PrefetchScalarGridSpec(
            num_scalar_prefetch=0,
            grid=(n,),
            in_specs=in_specs,
            out_specs=pl.BlockSpec((1, h, w, cout), lambda b: (b, 0, 0, 0))),
        compiler_params=pltpu.CompilerParams(
            dimension_semantics=("parallel",),
            vmem_limit_bytes=_vmem_limit_bytes(need)),
    )(*operands)


# --------------------------------------------------------------------------- #
# Kernel B: fused GEMM + folded-BN shift (+ ReLU)
#           (stride-2 conv1 via im2col, 1x1 downsample conv)
# --------------------------------------------------------------------------- #
def _gemm_shift_kernel(a_ref, b_ref, t_ref, o_ref, *, relu):
    # Single-K-block variant: no accumulator scratch, direct epilogue store.
    y = jnp.dot(a_ref[...], b_ref[...], preferred_element_type=jnp.float32) + t_ref[...]
    if relu:
        y = jnp.maximum(y, 0.0)
    o_ref[...] = y.astype(o_ref.dtype)


def _gemm_shift_acc_kernel(a_ref, b_ref, t_ref, o_ref, acc_ref, *, relu):
    @pl.when(pl.program_id(1) == 0)
    def _():
        acc_ref[...] = jnp.zeros_like(acc_ref)

    acc_ref[...] += jnp.dot(a_ref[...], b_ref[...], preferred_element_type=jnp.float32)

    @pl.when(pl.program_id(1) == pl.num_programs(1) - 1)
    def _():
        y = acc_ref[...] + t_ref[...]
        if relu:
            y = jnp.maximum(y, 0.0)
        o_ref[...] = y.astype(o_ref.dtype)


def fused_matmul(a, w_mat, shift, relu=False, out_dtype=jnp.bfloat16):
    """act((a @ w_mat) + shift); BN scale already folded into w_mat columns."""
    M, K = a.shape
    kp, cout = w_mat.shape
    assert kp >= K, (kp, K)

    tk = kp if kp <= 2048 else 512              # full-K single block when it fits
    assert kp % tk == 0
    m8 = _round_up(max(M, 1), 8)
    tm = min(512, m8)
    if m8 // tm == 1 and m8 >= 16:
        # Guarantee >=2 blocks along the 'parallel' M axis (v7x has 2 TensorCores).
        tm = _round_up((m8 + 1) // 2, 8)
    mp = _round_up(M, tm)
    gm, gk = mp // tm, kp // tk

    a_bf = a.astype(jnp.bfloat16)
    if mp != M or kp != K:
        a_bf = jnp.pad(a_bf, ((0, mp - M), (0, kp - K)))

    if gk == 1:
        kernel = functools.partial(_gemm_shift_kernel, relu=relu)
        grid = (gm,)
        in_specs = [pl.BlockSpec((tm, tk), lambda i: (i, 0)),
                    pl.BlockSpec((tk, cout), lambda i: (0, 0)),
                    pl.BlockSpec((1, cout), lambda i: (0, 0))]
        out_specs = pl.BlockSpec((tm, cout), lambda i: (i, 0))
        scratch = []
        dims = ("parallel",)
    else:
        kernel = functools.partial(_gemm_shift_acc_kernel, relu=relu)
        grid = (gm, gk)
        in_specs = [pl.BlockSpec((tm, tk), lambda i, k: (i, k)),
                    pl.BlockSpec((tk, cout), lambda i, k: (k, 0)),
                    pl.BlockSpec((1, cout), lambda i, k: (0, 0))]
        out_specs = pl.BlockSpec((tm, cout), lambda i, k: (i, 0))
        scratch = [pltpu.VMEM((tm, cout), jnp.float32)]
        dims = ("parallel", "arbitrary")

    osize = jnp.dtype(out_dtype).itemsize
    need = (2 * (tm * tk * 2 + tk * cout * 2 + cout * 4 + tm * cout * osize)
            + tm * cout * 4 + (4 << 20))

    out = pl.pallas_call(
        kernel,
        out_shape=jax.ShapeDtypeStruct((mp, cout), out_dtype),
        grid_spec=pltpu.PrefetchScalarGridSpec(
            num_scalar_prefetch=0, grid=grid,
            in_specs=in_specs, out_specs=out_specs, scratch_shapes=scratch),
        compiler_params=pltpu.CompilerParams(
            dimension_semantics=dims,
            vmem_limit_bytes=_vmem_limit_bytes(need)),
    )(a_bf, w_mat, shift)
    if mp != M:
        out = out[:M]
    return out


# --------------------------------------------------------------------------- #
# Plain-JAX glue: im2col only for the stride-2 3x3 conv (bf16, small)
# --------------------------------------------------------------------------- #
def _im2col(x, ksize, stride, padding):
    """NHWC -> (N*Ho*Wo, ksize*ksize*C), tap-major then channel (matches weight layout)."""
    n, h, w, c = x.shape
    xp = jnp.pad(x, ((0, 0), (padding, padding), (padding, padding), (0, 0)))
    ho = (h + 2 * padding - ksize) // stride + 1
    wo = (w + 2 * padding - ksize) // stride + 1
    cols = []
    for i in range(ksize):
        for j in range(ksize):
            cols.append(lax.slice(
                xp, (0, i, j, 0),
                (n, i + (ho - 1) * stride + 1, j + (wo - 1) * stride + 1, c),
                (1, stride, stride, 1)))
    a = jnp.concatenate(cols, axis=-1).reshape(n * ho * wo, ksize * ksize * c)
    return a, ho, wo


# --------------------------------------------------------------------------- #
# Deterministic parameters (raw = PyTorch-like, prep = pre-laid-out for Pallas)
# --------------------------------------------------------------------------- #
class ParamGen:
    def __init__(self, seed=0):
        self.key = jax.random.PRNGKey(seed)

    def take(self, shape, std=1.0):
        self.key, sub = jax.random.split(self.key)
        return jax.random.normal(sub, shape, jnp.float32) * std


def _conv_w(pg, cout, cin, k):
    return pg.take((cout, cin, k, k), std=1.0 / math.sqrt(cin * k * k))


def _bn_params(pg, c):
    return {"gamma": 1.0 + 0.01 * pg.take((c,)),
            "beta": 0.01 * pg.take((c,)),
            "mean": 0.01 * pg.take((c,)),
            "var": 1.0 + 0.01 * jnp.abs(pg.take((c,)))}


def _fold_bn(bn, eps=1e-5):
    scale = bn["gamma"] / jnp.sqrt(bn["var"] + eps)
    shift = bn["beta"] - bn["mean"] * scale
    return (scale[None, :].astype(jnp.float32),
            shift[None, :].astype(jnp.float32))


def _prep_weight(w_oihw, scale):
    """(Cout,Cin,KH,KW) -> (Kp,Cout) bf16, tap-major, BN scale folded in, K-padded once."""
    cout, cin, kh, kw = w_oihw.shape
    k = kh * kw * cin
    w = jnp.transpose(w_oihw, (2, 3, 1, 0)).reshape(k, cout) * scale
    kp = k if k <= 2048 else _round_up(k, 512)
    if kp != k:
        w = jnp.pad(w, ((0, kp - k), (0, 0)))
    return w.astype(jnp.bfloat16)


def make_basic_block(pg, inplanes, planes, stride=1):
    use_downsample = (stride != 1 or inplanes != planes)
    raw = {"stride": stride,
           "w1": _conv_w(pg, planes, inplanes, 3), "bn1": _bn_params(pg, planes),
           "w2": _conv_w(pg, planes, planes, 3), "bn2": _bn_params(pg, planes)}
    s1, t1 = _fold_bn(raw["bn1"])
    s2, t2 = _fold_bn(raw["bn2"])
    prep = {"stride": stride,
            "w1": _prep_weight(raw["w1"], s1), "bn1_shift": t1,
            "w2": _prep_weight(raw["w2"], s2), "bn2_shift": t2}
    if use_downsample:
        raw["ds_w"] = _conv_w(pg, planes, inplanes, 1)
        raw["ds_bn"] = _bn_params(pg, planes)
        sd, td = _fold_bn(raw["ds_bn"])
        prep["ds_w"] = _prep_weight(raw["ds_w"], sd)
        prep["ds_shift"] = td
    return raw, prep


# --------------------------------------------------------------------------- #
# BasicBlock forward (fused, bf16 activation chain)
# --------------------------------------------------------------------------- #
def basic_block_forward(x, p):
    """x: NHWC bf16."""
    n, h, w, cin = x.shape
    stride = p["stride"]
    planes = p["bn1_shift"].shape[1]

    if stride == 1:
        # conv1 (3x3) + BN1 + ReLU: fully fused, no im2col matrix in HBM.
        y1 = conv3x3_fused(x, p["w1"], p["bn1_shift"], relu=True)
        ho, wo = h, w
    else:
        # TODO(synk): stride-2 conv1 still builds a small im2col matrix in HBM; a
        # polyphase / halo-DMA stride-2 kernel would remove this last activation copy.
        a1, ho, wo = _im2col(x, 3, stride, 1)
        y1 = fused_matmul(a1, p["w1"], p["bn1_shift"], relu=True)
        y1 = y1.reshape(n, ho, wo, planes)

    if "ds_w" in p:   # downsample = 1x1 stride conv + BN (no im2col blowup), fused GEMM
        a_ds = x[:, ::stride, ::stride, :].reshape(n * ho * wo, cin)
        res = fused_matmul(a_ds, p["ds_w"], p["ds_shift"], relu=False)
        res = res.reshape(n, ho, wo, planes)
    else:
        assert stride == 1 and cin == planes
        res = x

    # conv2 (3x3, stride 1) + BN2 + residual add + ReLU: one fused kernel.
    return conv3x3_fused(y1, p["w2"], p["bn2_shift"], residual=res, relu=True)


def build_model(prep_blocks):
    def fwd(x_nchw):
        x = jnp.transpose(x_nchw, (0, 2, 3, 1)).astype(jnp.bfloat16)   # NCHW -> NHWC bf16
        for p in prep_blocks:
            x = basic_block_forward(x, p)
        return jnp.transpose(x.astype(jnp.float32), (0, 3, 1, 2))       # back to NCHW f32
    return jax.jit(fwd)


# --------------------------------------------------------------------------- #
# Pure-JAX reference (f32) for correctness cross-check
# --------------------------------------------------------------------------- #
def _ref_conv(x, w_oihw, stride, pad):
    return lax.conv_general_dilated(
        x, jnp.transpose(w_oihw, (2, 3, 1, 0)),
        window_strides=(stride, stride),
        padding=((pad, pad), (pad, pad)),
        dimension_numbers=("NHWC", "HWIO", "NHWC"))


def _ref_bn(x, bn, eps=1e-5):
    return (x - bn["mean"]) / jnp.sqrt(bn["var"] + eps) * bn["gamma"] + bn["beta"]


def reference_basic_block(x, raw):
    stride = raw["stride"]
    out = jax.nn.relu(_ref_bn(_ref_conv(x, raw["w1"], stride, 1), raw["bn1"]))
    out = _ref_bn(_ref_conv(out, raw["w2"], 1, 1), raw["bn2"])
    if "ds_w" in raw:
        res = _ref_bn(_ref_conv(x, raw["ds_w"], stride, 0), raw["ds_bn"])
    else:
        res = x
    return jax.nn.relu(out + res)


# --------------------------------------------------------------------------- #
if __name__ == "__main__":
    pg = ParamGen(seed=0)
    # Block 1: identity residual (stride=1, inplanes==planes, downsample=None)
    raw1, prep1 = make_basic_block(pg, 32, 32, stride=1)
    # Block 2: stride-2 + channel change -> downsample (1x1 conv + BN) residual
    raw2, prep2 = make_basic_block(pg, 32, 64, stride=2)

    key = jax.random.PRNGKey(0)
    x_nchw = jax.random.normal(key, (2, 32, 16, 16), jnp.float32)   # NCHW like PyTorch

    fwd = build_model([prep1, prep2])
    out = jax.block_until_ready(fwd(x_nchw))
    assert out.shape == (2, 64, 8, 8), out.shape
    assert bool(jnp.all(jnp.isfinite(out)))

    # Cross-check vs pure-JAX f32 reference (bf16 activation chain -> relaxed tolerance).
    x_nhwc = jnp.transpose(x_nchw, (0, 2, 3, 1))
    ref = reference_basic_block(x_nhwc, raw1)
    ref = reference_basic_block(ref, raw2)
    ref = jnp.transpose(ref, (0, 3, 1, 2))
    rel_err = float(jnp.linalg.norm(out - ref) / jnp.linalg.norm(ref))
    assert rel_err < 5e-2, f"relative error too large: {rel_err}"

    print("KERNEL_OK")
</pallas_src>

<mosaic_0001>
module attributes {stable_mosaic.version = 11 : i64} {
  func.func @_conv3x3_res_kernel(%arg0: i32, %arg1: memref<1x18x18x32xbf16, #tpu.memory_space<vmem>>, %arg2: memref<288x32xbf16, #tpu.memory_space<vmem>>, %arg3: memref<1x32xf32, #tpu.memory_space<vmem>>, %arg4: memref<1x16x16x32xbf16, #tpu.memory_space<vmem>>, %arg5: memref<1x16x16x32xbf16, #tpu.memory_space<vmem>>) attributes {dimension_semantics = [#tpu.dimension_semantics<parallel>], iteration_bounds = array<i64: 2>, scalar_prefetch = 0 : i64, scratch_operands = 0 : i64, tpu.core_type = #tpu.core_type<tc>, window_params = [{transform_indices = @transform_0, window_bounds = array<i64: 1, 18, 18, 32>}, {pipeline_mode = #tpu.pipeline_mode<synchronous>, transform_indices = @transform_1, window_bounds = array<i64: 288, 32>}, {pipeline_mode = #tpu.pipeline_mode<synchronous>, transform_indices = @transform_2, window_bounds = array<i64: 1, 32>}, {transform_indices = @transform_3, window_bounds = array<i64: 1, 16, 16, 32>}, {transform_indices = @transform_4, window_bounds = array<i64: 1, 16, 16, 32>}]} {
    %c0 = arith.constant 0 : index
    %c0_0 = arith.constant 0 : index
    %c0_1 = arith.constant 0 : index
    %c0_2 = arith.constant 0 : index
    %0 = vector.load %arg1[%c0, %c0_0, %c0_1, %c0_2] : memref<1x18x18x32xbf16, #tpu.memory_space<vmem>>, vector<1x18x18x32xbf16>
    %1 = vector.shape_cast %0 : vector<1x18x18x32xbf16> to vector<18x18x32xbf16>
    %2 = arith.extf %1 : vector<18x18x32xbf16> to vector<18x18x32xf32>
    %cst = arith.constant 0.000000e+00 : f32
    %3 = vector.broadcast %cst : f32 to vector<256x32xf32>
    %4 = vector.extract_strided_slice %2 {offsets = [0, 0, 0], sizes = [16, 16, 32], strides = [1, 1, 1]} : vector<18x18x32xf32> to vector<16x16x32xf32>
    %5 = vector.shape_cast %4 : vector<16x16x32xf32> to vector<256x32xf32>
    %6 = arith.truncf %5 : vector<256x32xf32> to vector<256x32xbf16>
    %c0_3 = arith.constant 0 : index
    %c0_4 = arith.constant 0 : index
    %7 = vector.load %arg2[%c0_3, %c0_4] : memref<288x32xbf16, #tpu.memory_space<vmem>>, vector<32x32xbf16>
    %cst_5 = arith.constant dense<0.000000e+00> : vector<256x32xf32>
    %8 = tpu.matmul %6, %7, %cst_5 {dimension_numbers = #tpu.dot_dimension_numbers<[1], [0], [0], [1], [0, 0, 1, 1], [], []>} : vector<256x32xbf16>, vector<32x32xbf16>, vector<256x32xf32> -> vector<256x32xf32>
    %9 = arith.addf %3, %8 : vector<256x32xf32>
    %10 = vector.extract_strided_slice %2 {offsets = [0, 1, 0], sizes = [16, 16, 32], strides = [1, 1, 1]} : vector<18x18x32xf32> to vector<16x16x32xf32>
    %11 = vector.shape_cast %10 : vector<16x16x32xf32> to vector<256x32xf32>
    %12 = arith.truncf %11 : vector<256x32xf32> to vector<256x32xbf16>
    %c32 = arith.constant 32 : index
    %c0_6 = arith.constant 0 : index
    %13 = vector.load %arg2[%c32, %c0_6] : memref<288x32xbf16, #tpu.memory_space<vmem>>, vector<32x32xbf16>
    %cst_7 = arith.constant dense<0.000000e+00> : vector<256x32xf32>
    %14 = tpu.matmul %12, %13, %cst_7 {dimension_numbers = #tpu.dot_dimension_numbers<[1], [0], [0], [1], [0, 0, 1, 1], [], []>} : vector<256x32xbf16>, vector<32x32xbf16>, vector<256x32xf32> -> vector<256x32xf32>
    %15 = arith.addf %9, %14 : vector<256x32xf32>
    %16 = vector.extract_strided_slice %2 {offsets = [0, 2, 0], sizes = [16, 16, 32], strides = [1, 1, 1]} : vector<18x18x32xf32> to vector<16x16x32xf32>
    %17 = vector.shape_cast %16 : vector<16x16x32xf32> to vector<256x32xf32>
    %18 = arith.truncf %17 : vector<256x32xf32> to vector<256x32xbf16>
    %c64 = arith.constant 64 : index
    %c0_8 = arith.constant 0 : index
    %19 = vector.load %arg2[%c64, %c0_8] : memref<288x32xbf16, #tpu.memory_space<vmem>>, vector<32x32xbf16>
    %cst_9 = arith.constant dense<0.000000e+00> : vector<256x32xf32>
    %20 = tpu.matmul %18, %19, %cst_9 {dimension_numbers = #tpu.dot_dimension_numbers<[1], [0], [0], [1], [0, 0, 1, 1], [], []>} : vector<256x32xbf16>, vector<32x32xbf16>, vector<256x32xf32> -> vector<256x32xf32>
    %21 = arith.addf %15, %20 : vector<256x32xf32>
    %22 = vector.extract_strided_slice %2 {offsets = [1, 0, 0], sizes = [16, 16, 32], strides = [1, 1, 1]} : vector<18x18x32xf32> to vector<16x16x32xf32>
    %23 = vector.shape_cast %22 : vector<16x16x32xf32> to vector<256x32xf32>
    %24 = arith.truncf %23 : vector<256x32xf32> to vector<256x32xbf16>
    %c96 = arith.constant 96 : index
    %c0_10 = arith.constant 0 : index
    %25 = vector.load %arg2[%c96, %c0_10] : memref<288x32xbf16, #tpu.memory_space<vmem>>, vector<32x32xbf16>
    %cst_11 = arith.constant dense<0.000000e+00> : vector<256x32xf32>
    %26 = tpu.matmul %24, %25, %cst_11 {dimension_numbers = #tpu.dot_dimension_numbers<[1], [0], [0], [1], [0, 0, 1, 1], [], []>} : vector<256x32xbf16>, vector<32x32xbf16>, vector<256x32xf32> -> vector<256x32xf32>
    %27 = arith.addf %21, %26 : vector<256x32xf32>
    %28 = vector.extract_strided_slice %2 {offsets = [1, 1, 0], sizes = [16, 16, 32], strides = [1, 1, 1]} : vector<18x18x32xf32> to vector<16x16x32xf32>
    %29 = vector.shape_cast %28 : vector<16x16x32xf32> to vector<256x32xf32>
    %30 = arith.truncf %29 : vector<256x32xf32> to vector<256x32xbf16>
    %c128 = arith.constant 128 : index
    %c0_12 = arith.constant 0 : index
    %31 = vector.load %arg2[%c128, %c0_12] : memref<288x32xbf16, #tpu.memory_space<vmem>>, vector<32x32xbf16>
    %cst_13 = arith.constant dense<0.000000e+00> : vector<256x32xf32>
    %32 = tpu.matmul %30, %31, %cst_13 {dimension_numbers = #tpu.dot_dimension_numbers<[1], [0], [0], [1], [0, 0, 1, 1], [], []>} : vector<256x32xbf16>, vector<32x32xbf16>, vector<256x32xf32> -> vector<256x32xf32>
    %33 = arith.addf %27, %32 : vector<256x32xf32>
    %34 = vector.extract_strided_slice %2 {offsets = [1, 2, 0], sizes = [16, 16, 32], strides = [1, 1, 1]} : vector<18x18x32xf32> to vector<16x16x32xf32>
    %35 = vector.shape_cast %34 : vector<16x16x32xf32> to vector<256x32xf32>
    %36 = arith.truncf %35 : vector<256x32xf32> to vector<256x32xbf16>
    %c160 = arith.constant 160 : index
    %c0_14 = arith.constant 0 : index
    %37 = vector.load %arg2[%c160, %c0_14] : memref<288x32xbf16, #tpu.memory_space<vmem>>, vector<32x32xbf16>
    %cst_15 = arith.constant dense<0.000000e+00> : vector<256x32xf32>
    %38 = tpu.matmul %36, %37, %cst_15 {dimension_numbers = #tpu.dot_dimension_numbers<[1], [0], [0], [1], [0, 0, 1, 1], [], []>} : vector<256x32xbf16>, vector<32x32xbf16>, vector<256x32xf32> -> vector<256x32xf32>
    %39 = arith.addf %33, %38 : vector<256x32xf32>
    %40 = vector.extract_strided_slice %2 {offsets = [2, 0, 0], sizes = [16, 16, 32], strides = [1, 1, 1]} : vector<18x18x32xf32> to vector<16x16x32xf32>
    %41 = vector.shape_cast %40 : vector<16x16x32xf32> to vector<256x32xf32>
    %42 = arith.truncf %41 : vector<256x32xf32> to vector<256x32xbf16>
    %c192 = arith.constant 192 : index
    %c0_16 = arith.constant 0 : index
    %43 = vector.load %arg2[%c192, %c0_16] : memref<288x32xbf16, #tpu.memory_space<vmem>>, vector<32x32xbf16>
    %cst_17 = arith.constant dense<0.000000e+00> : vector<256x32xf32>
    %44 = tpu.matmul %42, %43, %cst_17 {dimension_numbers = #tpu.dot_dimension_numbers<[1], [0], [0], [1], [0, 0, 1, 1], [], []>} : vector<256x32xbf16>, vector<32x32xbf16>, vector<256x32xf32> -> vector<256x32xf32>
    %45 = arith.addf %39, %44 : vector<256x32xf32>
    %46 = vector.extract_strided_slice %2 {offsets = [2, 1, 0], sizes = [16, 16, 32], strides = [1, 1, 1]} : vector<18x18x32xf32> to vector<16x16x32xf32>
    %47 = vector.shape_cast %46 : vector<16x16x32xf32> to vector<256x32xf32>
    %48 = arith.truncf %47 : vector<256x32xf32> to vector<256x32xbf16>
    %c224 = arith.constant 224 : index
    %c0_18 = arith.constant 0 : index
    %49 = vector.load %arg2[%c224, %c0_18] : memref<288x32xbf16, #tpu.memory_space<vmem>>, vector<32x32xbf16>
    %cst_19 = arith.constant dense<0.000000e+00> : vector<256x32xf32>
    %50 = tpu.matmul %48, %49, %cst_19 {dimension_numbers = #tpu.dot_dimension_numbers<[1], [0], [0], [1], [0, 0, 1, 1], [], []>} : vector<256x32xbf16>, vector<32x32xbf16>, vector<256x32xf32> -> vector<256x32xf32>
    %51 = arith.addf %45, %50 : vector<256x32xf32>
    %52 = vector.extract_strided_slice %2 {offsets = [2, 2, 0], sizes = [16, 16, 32], strides = [1, 1, 1]} : vector<18x18x32xf32> to vector<16x16x32xf32>
    %53 = vector.shape_cast %52 : vector<16x16x32xf32> to vector<256x32xf32>
    %54 = arith.truncf %53 : vector<256x32xf32> to vector<256x32xbf16>
    %c256 = arith.constant 256 : index
    %c0_20 = arith.constant 0 : index
    %55 = vector.load %arg2[%c256, %c0_20] : memref<288x32xbf16, #tpu.memory_space<vmem>>, vector<32x32xbf16>
    %cst_21 = arith.constant dense<0.000000e+00> : vector<256x32xf32>
    %56 = tpu.matmul %54, %55, %cst_21 {dimension_numbers = #tpu.dot_dimension_numbers<[1], [0], [0], [1], [0, 0, 1, 1], [], []>} : vector<256x32xbf16>, vector<32x32xbf16>, vector<256x32xf32> -> vector<256x32xf32>
    %57 = arith.addf %51, %56 : vector<256x32xf32>
    %c0_22 = arith.constant 0 : index
    %c0_23 = arith.constant 0 : index
    %58 = vector.load %arg3[%c0_22, %c0_23] : memref<1x32xf32, #tpu.memory_space<vmem>>, vector<1x32xf32>
    %59 = vector.broadcast %58 : vector<1x32xf32> to vector<256x32xf32>
    %60 = arith.addf %57, %59 : vector<256x32xf32>
    %c0_24 = arith.constant 0 : index
    %c0_25 = arith.constant 0 : index
    %c0_26 = arith.constant 0 : index
    %c0_27 = arith.constant 0 : index
    %61 = vector.load %arg4[%c0_24, %c0_25, %c0_26, %c0_27] : memref<1x16x16x32xbf16, #tpu.memory_space<vmem>>, vector<1x16x16x32xbf16>
    %62 = arith.extf %61 : vector<1x16x16x32xbf16> to vector<1x16x16x32xf32>
    %63 = vector.shape_cast %62 : vector<1x16x16x32xf32> to vector<256x32xf32>
    %64 = arith.addf %60, %63 : vector<256x32xf32>
    %cst_28 = arith.constant 0.000000e+00 : f32
    %65 = vector.broadcast %cst_28 : f32 to vector<256x32xf32>
    %66 = arith.maximumf %64, %65 : vector<256x32xf32>
    %67 = vector.shape_cast %66 : vector<256x32xf32> to vector<1x16x16x32xf32>
    %68 = arith.truncf %67 : vector<1x16x16x32xf32> to vector<1x16x16x32xbf16>
    %c0_29 = arith.constant 0 : index
    %c0_30 = arith.constant 0 : index
    %c0_31 = arith.constant 0 : index
    %c0_32 = arith.constant 0 : index
    %69 = vector.load %arg5[%c0_29, %c0_30, %c0_31, %c0_32] : memref<1x16x16x32xbf16, #tpu.memory_space<vmem>>, vector<1x16x16x32xbf16>
    tpu.vector_store %arg5[%c0_29, %c0_30, %c0_31, %c0_32], %68 {strides = array<i32>} : memref<1x16x16x32xbf16, #tpu.memory_space<vmem>>, vector<1x16x16x32xbf16>,
    return
  }
  func.func @transform_0(%arg0: i32) -> (i32, i32, i32, i32) {
    %c0_i32 = arith.constant 0 : i32
    %c0_i32_0 = arith.constant 0 : i32
    %c0_i32_1 = arith.constant 0 : i32
    %c0_i32_2 = arith.constant 0 : i32
    return %arg0, %c0_i32, %c0_i32_0, %c0_i32_1 : i32, i32, i32, i32
  }
  func.func @transform_1(%arg0: i32) -> (i32, i32) {
    %c0_i32 = arith.constant 0 : i32
    %c0_i32_0 = arith.constant 0 : i32
    %c0_i32_1 = arith.constant 0 : i32
    return %c0_i32, %c0_i32_0 : i32, i32
  }
  func.func @transform_2(%arg0: i32) -> (i32, i32) {
    %c0_i32 = arith.constant 0 : i32
    %c0_i32_0 = arith.constant 0 : i32
    %c0_i32_1 = arith.constant 0 : i32
    return %c0_i32, %c0_i32_0 : i32, i32
  }
  func.func @transform_3(%arg0: i32) -> (i32, i32, i32, i32) {
    %c0_i32 = arith.constant 0 : i32
    %c0_i32_0 = arith.constant 0 : i32
    %c0_i32_1 = arith.constant 0 : i32
    %c0_i32_2 = arith.constant 0 : i32
    return %arg0, %c0_i32, %c0_i32_0, %c0_i32_1 : i32, i32, i32, i32
  }
  func.func @transform_4(%arg0: i32) -> (i32, i32, i32, i32) {
    %c0_i32 = arith.constant 0 : i32
    %c0_i32_0 = arith.constant 0 : i32
    %c0_i32_1 = arith.constant 0 : i32
    %c0_i32_2 = arith.constant 0 : i32
    return %arg0, %c0_i32, %c0_i32_0, %c0_i32_1 : i32, i32, i32, i32
  }
}

module attributes {stable_mosaic.version = 11 : i64} {
  func.func @_conv3x3_kernel(%arg0: i32, %arg1: memref<1x18x18x32xbf16, #tpu.memory_space<vmem>>, %arg2: memref<288x32xbf16, #tpu.memory_space<vmem>>, %arg3: memref<1x32xf32, #tpu.memory_space<vmem>>, %arg4: memref<1x16x16x32xbf16, #tpu.memory_space<vmem>>) attributes {dimension_semantics = [#tpu.dimension_semantics<parallel>], iteration_bounds = array<i64: 2>, scalar_prefetch = 0 : i64, scratch_operands = 0 : i64, tpu.core_type = #tpu.core_type<tc>, window_params = [{transform_indices = @transform_0, window_bounds = array<i64: 1, 18, 18, 32>}, {pipeline_mode = #tpu.pipeline_mode<synchronous>, transform_indices = @transform_1, window_bounds = array<i64: 288, 32>}, {pipeline_mode = #tpu.pipeline_mode<synchronous>, transform_indices = @transform_2, window_bounds = array<i64: 1, 32>}, {transform_indices = @transform_3, window_bounds = array<i64: 1, 16, 16, 32>}]} {
    %c0 = arith.constant 0 : index
    %c0_0 = arith.constant 0 : index
    %c0_1 = arith.constant 0 : index
    %c0_2 = arith.constant 0 : index
    %0 = vector.load %arg1[%c0, %c0_0, %c0_1, %c0_2] : memref<1x18x18x32xbf16, #tpu.memory_space<vmem>>, vector<1x18x18x32xbf16>
    %1 = vector.shape_cast %0 : vector<1x18x18x32xbf16> to vector<18x18x32xbf16>
    %2 = arith.extf %1 : vector<18x18x32xbf16> to vector<18x18x32xf32>
    %cst = arith.constant 0.000000e+00 : f32
    %3 = vector.broadcast %cst : f32 to vector<256x32xf32>
    %4 = vector.extract_strided_slice %2 {offsets = [0, 0, 0], sizes = [16, 16, 32], strides = [1, 1, 1]} : vector<18x18x32xf32> to vector<16x16x32xf32>
    %5 = vector.shape_cast %4 : vector<16x16x32xf32> to vector<256x32xf32>
    %6 = arith.truncf %5 : vector<256x32xf32> to vector<256x32xbf16>
    %c0_3 = arith.constant 0 : index
    %c0_4 = arith.constant 0 : index
    %7 = vector.load %arg2[%c0_3, %c0_4] : memref<288x32xbf16, #tpu.memory_space<vmem>>, vector<32x32xbf16>
    %cst_5 = arith.constant dense<0.000000e+00> : vector<256x32xf32>
    %8 = tpu.matmul %6, %7, %cst_5 {dimension_numbers = #tpu.dot_dimension_numbers<[1], [0], [0], [1], [0, 0, 1, 1], [], []>} : vector<256x32xbf16>, vector<32x32xbf16>, vector<256x32xf32> -> vector<256x32xf32>
    %9 = arith.addf %3, %8 : vector<256x32xf32>
    %10 = vector.extract_strided_slice %2 {offsets = [0, 1, 0], sizes = [16, 16, 32], strides = [1, 1, 1]} : vector<18x18x32xf32> to vector<16x16x32xf32>
    %11 = vector.shape_cast %10 : vector<16x16x32xf32> to vector<256x32xf32>
    %12 = arith.truncf %11 : vector<256x32xf32> to vector<256x32xbf16>
    %c32 = arith.constant 32 : index
    %c0_6 = arith.constant 0 : index
    %13 = vector.load %arg2[%c32, %c0_6] : memref<288x32xbf16, #tpu.memory_space<vmem>>, vector<32x32xbf16>
    %cst_7 = arith.constant dense<0.000000e+00> : vector<256x32xf32>
    %14 = tpu.matmul %12, %13, %cst_7 {dimension_numbers = #tpu.dot_dimension_numbers<[1], [0], [0], [1], [0, 0, 1, 1], [], []>} : vector<256x32xbf16>, vector<32x32xbf16>, vector<256x32xf32> -> vector<256x32xf32>
    %15 = arith.addf %9, %14 : vector<256x32xf32>
    %16 = vector.extract_strided_slice %2 {offsets = [0, 2, 0], sizes = [16, 16, 32], strides = [1, 1, 1]} : vector<18x18x32xf32> to vector<16x16x32xf32>
    %17 = vector.shape_cast %16 : vector<16x16x32xf32> to vector<256x32xf32>
    %18 = arith.truncf %17 : vector<256x32xf32> to vector<256x32xbf16>
    %c64 = arith.constant 64 : index
    %c0_8 = arith.constant 0 : index
    %19 = vector.load %arg2[%c64, %c0_8] : memref<288x32xbf16, #tpu.memory_space<vmem>>, vector<32x32xbf16>
    %cst_9 = arith.constant dense<0.000000e+00> : vector<256x32xf32>
    %20 = tpu.matmul %18, %19, %cst_9 {dimension_numbers = #tpu.dot_dimension_numbers<[1], [0], [0], [1], [0, 0, 1, 1], [], []>} : vector<256x32xbf16>, vector<32x32xbf16>, vector<256x32xf32> -> vector<256x32xf32>
    %21 = arith.addf %15, %20 : vector<256x32xf32>
    %22 = vector.extract_strided_slice %2 {offsets = [1, 0, 0], sizes = [16, 16, 32], strides = [1, 1, 1]} : vector<18x18x32xf32> to vector<16x16x32xf32>
    %23 = vector.shape_cast %22 : vector<16x16x32xf32> to vector<256x32xf32>
    %24 = arith.truncf %23 : vector<256x32xf32> to vector<256x32xbf16>
    %c96 = arith.constant 96 : index
    %c0_10 = arith.constant 0 : index
    %25 = vector.load %arg2[%c96, %c0_10] : memref<288x32xbf16, #tpu.memory_space<vmem>>, vector<32x32xbf16>
    %cst_11 = arith.constant dense<0.000000e+00> : vector<256x32xf32>
    %26 = tpu.matmul %24, %25, %cst_11 {dimension_numbers = #tpu.dot_dimension_numbers<[1], [0], [0], [1], [0, 0, 1, 1], [], []>} : vector<256x32xbf16>, vector<32x32xbf16>, vector<256x32xf32> -> vector<256x32xf32>
    %27 = arith.addf %21, %26 : vector<256x32xf32>
    %28 = vector.extract_strided_slice %2 {offsets = [1, 1, 0], sizes = [16, 16, 32], strides = [1, 1, 1]} : vector<18x18x32xf32> to vector<16x16x32xf32>
    %29 = vector.shape_cast %28 : vector<16x16x32xf32> to vector<256x32xf32>
    %30 = arith.truncf %29 : vector<256x32xf32> to vector<256x32xbf16>
    %c128 = arith.constant 128 : index
    %c0_12 = arith.constant 0 : index
    %31 = vector.load %arg2[%c128, %c0_12] : memref<288x32xbf16, #tpu.memory_space<vmem>>, vector<32x32xbf16>
    %cst_13 = arith.constant dense<0.000000e+00> : vector<256x32xf32>
    %32 = tpu.matmul %30, %31, %cst_13 {dimension_numbers = #tpu.dot_dimension_numbers<[1], [0], [0], [1], [0, 0, 1, 1], [], []>} : vector<256x32xbf16>, vector<32x32xbf16>, vector<256x32xf32> -> vector<256x32xf32>
    %33 = arith.addf %27, %32 : vector<256x32xf32>
    %34 = vector.extract_strided_slice %2 {offsets = [1, 2, 0], sizes = [16, 16, 32], strides = [1, 1, 1]} : vector<18x18x32xf32> to vector<16x16x32xf32>
    %35 = vector.shape_cast %34 : vector<16x16x32xf32> to vector<256x32xf32>
    %36 = arith.truncf %35 : vector<256x32xf32> to vector<256x32xbf16>
    %c160 = arith.constant 160 : index
    %c0_14 = arith.constant 0 : index
    %37 = vector.load %arg2[%c160, %c0_14] : memref<288x32xbf16, #tpu.memory_space<vmem>>, vector<32x32xbf16>
    %cst_15 = arith.constant dense<0.000000e+00> : vector<256x32xf32>
    %38 = tpu.matmul %36, %37, %cst_15 {dimension_numbers = #tpu.dot_dimension_numbers<[1], [0], [0], [1], [0, 0, 1, 1], [], []>} : vector<256x32xbf16>, vector<32x32xbf16>, vector<256x32xf32> -> vector<256x32xf32>
    %39 = arith.addf %33, %38 : vector<256x32xf32>
    %40 = vector.extract_strided_slice %2 {offsets = [2, 0, 0], sizes = [16, 16, 32], strides = [1, 1, 1]} : vector<18x18x32xf32> to vector<16x16x32xf32>
    %41 = vector.shape_cast %40 : vector<16x16x32xf32> to vector<256x32xf32>
    %42 = arith.truncf %41 : vector<256x32xf32> to vector<256x32xbf16>
    %c192 = arith.constant 192 : index
    %c0_16 = arith.constant 0 : index
    %43 = vector.load %arg2[%c192, %c0_16] : memref<288x32xbf16, #tpu.memory_space<vmem>>, vector<32x32xbf16>
    %cst_17 = arith.constant dense<0.000000e+00> : vector<256x32xf32>
    %44 = tpu.matmul %42, %43, %cst_17 {dimension_numbers = #tpu.dot_dimension_numbers<[1], [0], [0], [1], [0, 0, 1, 1], [], []>} : vector<256x32xbf16>, vector<32x32xbf16>, vector<256x32xf32> -> vector<256x32xf32>
    %45 = arith.addf %39, %44 : vector<256x32xf32>
    %46 = vector.extract_strided_slice %2 {offsets = [2, 1, 0], sizes = [16, 16, 32], strides = [1, 1, 1]} : vector<18x18x32xf32> to vector<16x16x32xf32>
    %47 = vector.shape_cast %46 : vector<16x16x32xf32> to vector<256x32xf32>
    %48 = arith.truncf %47 : vector<256x32xf32> to vector<256x32xbf16>
    %c224 = arith.constant 224 : index
    %c0_18 = arith.constant 0 : index
    %49 = vector.load %arg2[%c224, %c0_18] : memref<288x32xbf16, #tpu.memory_space<vmem>>, vector<32x32xbf16>
    %cst_19 = arith.constant dense<0.000000e+00> : vector<256x32xf32>
    %50 = tpu.matmul %48, %49, %cst_19 {dimension_numbers = #tpu.dot_dimension_numbers<[1], [0], [0], [1], [0, 0, 1, 1], [], []>} : vector<256x32xbf16>, vector<32x32xbf16>, vector<256x32xf32> -> vector<256x32xf32>
    %51 = arith.addf %45, %50 : vector<256x32xf32>
    %52 = vector.extract_strided_slice %2 {offsets = [2, 2, 0], sizes = [16, 16, 32], strides = [1, 1, 1]} : vector<18x18x32xf32> to vector<16x16x32xf32>
    %53 = vector.shape_cast %52 : vector<16x16x32xf32> to vector<256x32xf32>
    %54 = arith.truncf %53 : vector<256x32xf32> to vector<256x32xbf16>
    %c256 = arith.constant 256 : index
    %c0_20 = arith.constant 0 : index
    %55 = vector.load %arg2[%c256, %c0_20] : memref<288x32xbf16, #tpu.memory_space<vmem>>, vector<32x32xbf16>
    %cst_21 = arith.constant dense<0.000000e+00> : vector<256x32xf32>
    %56 = tpu.matmul %54, %55, %cst_21 {dimension_numbers = #tpu.dot_dimension_numbers<[1], [0], [0], [1], [0, 0, 1, 1], [], []>} : vector<256x32xbf16>, vector<32x32xbf16>, vector<256x32xf32> -> vector<256x32xf32>
    %57 = arith.addf %51, %56 : vector<256x32xf32>
    %c0_22 = arith.constant 0 : index
    %c0_23 = arith.constant 0 : index
    %58 = vector.load %arg3[%c0_22, %c0_23] : memref<1x32xf32, #tpu.memory_space<vmem>>, vector<1x32xf32>
    %59 = vector.broadcast %58 : vector<1x32xf32> to vector<256x32xf32>
    %60 = arith.addf %57, %59 : vector<256x32xf32>
    %cst_24 = arith.constant 0.000000e+00 : f32
    %61 = vector.broadcast %cst_24 : f32 to vector<256x32xf32>
    %62 = arith.maximumf %60, %61 : vector<256x32xf32>
    %63 = vector.shape_cast %62 : vector<256x32xf32> to vector<1x16x16x32xf32>
    %64 = arith.truncf %63 : vector<1x16x16x32xf32> to vector<1x16x16x32xbf16>
    %c0_25 = arith.constant 0 : index
    %c0_26 = arith.constant 0 : index
    %c0_27 = arith.constant 0 : index
    %c0_28 = arith.constant 0 : index
    %65 = vector.load %arg4[%c0_25, %c0_26, %c0_27, %c0_28] : memref<1x16x16x32xbf16, #tpu.memory_space<vmem>>, vector<1x16x16x32xbf16>
    tpu.vector_store %arg4[%c0_25, %c0_26, %c0_27, %c0_28], %64 {strides = array<i32>} : memref<1x16x16x32xbf16, #tpu.memory_space<vmem>>, vector<1x16x16x32xbf16>,
    return
  }
  func.func @transform_0(%arg0: i32) -> (i32, i32, i32, i32) {
    %c0_i32 = arith.constant 0 : i32
    %c0_i32_0 = arith.constant 0 : i32
    %c0_i32_1 = arith.constant 0 : i32
    %c0_i32_2 = arith.constant 0 : i32
    return %arg0, %c0_i32, %c0_i32_0, %c0_i32_1 : i32, i32, i32, i32
  }
  func.func @transform_1(%arg0: i32) -> (i32, i32) {
    %c0_i32 = arith.constant 0 : i32
    %c0_i32_0 = arith.constant 0 : i32
    %c0_i32_1 = arith.constant 0 : i32
    return %c0_i32, %c0_i32_0 : i32, i32
  }
  func.func @transform_2(%arg0: i32) -> (i32, i32) {
    %c0_i32 = arith.constant 0 : i32
    %c0_i32_0 = arith.constant 0 : i32
    %c0_i32_1 = arith.constant 0 : i32
    return %c0_i32, %c0_i32_0 : i32, i32
  }
  func.func @transform_3(%arg0: i32) -> (i32, i32, i32, i32) {
    %c0_i32 = arith.constant 0 : i32
    %c0_i32_0 = arith.constant 0 : i32
    %c0_i32_1 = arith.constant 0 : i32
    %c0_i32_2 = arith.constant 0 : i32
    return %arg0, %c0_i32, %c0_i32_0, %c0_i32_1 : i32, i32, i32, i32
  }
}

module attributes {stable_mosaic.version = 11 : i64} {
  func.func @_gemm_shift_kernel(%arg0: i32, %arg1: memref<64x32xbf16, #tpu.memory_space<vmem>>, %arg2: memref<32x64xbf16, #tpu.memory_space<vmem>>, %arg3: memref<1x64xf32, #tpu.memory_space<vmem>>, %arg4: memref<64x64xbf16, #tpu.memory_space<vmem>>) attributes {dimension_semantics = [#tpu.dimension_semantics<parallel>], iteration_bounds = array<i64: 2>, scalar_prefetch = 0 : i64, scratch_operands = 0 : i64, tpu.core_type = #tpu.core_type<tc>, window_params = [{transform_indices = @transform_0, window_bounds = array<i64: 64, 32>}, {pipeline_mode = #tpu.pipeline_mode<synchronous>, transform_indices = @transform_1, window_bounds = array<i64: 32, 64>}, {pipeline_mode = #tpu.pipeline_mode<synchronous>, transform_indices = @transform_2, window_bounds = array<i64: 1, 64>}, {transform_indices = @transform_3, window_bounds = array<i64: 64, 64>}]} {
    %c0 = arith.constant 0 : index
    %c0_0 = arith.constant 0 : index
    %0 = vector.load %arg1[%c0, %c0_0] : memref<64x32xbf16, #tpu.memory_space<vmem>>, vector<64x32xbf16>
    %c0_1 = arith.constant 0 : index
    %c0_2 = arith.constant 0 : index
    %1 = vector.load %arg2[%c0_1, %c0_2] : memref<32x64xbf16, #tpu.memory_space<vmem>>, vector<32x64xbf16>
    %cst = arith.constant dense<0.000000e+00> : vector<64x64xf32>
    %2 = tpu.matmul %0, %1, %cst {dimension_numbers = #tpu.dot_dimension_numbers<[1], [0], [0], [1], [0, 0, 1, 1], [], []>} : vector<64x32xbf16>, vector<32x64xbf16>, vector<64x64xf32> -> vector<64x64xf32>
    %c0_3 = arith.constant 0 : index
    %c0_4 = arith.constant 0 : index
    %3 = vector.load %arg3[%c0_3, %c0_4] : memref<1x64xf32, #tpu.memory_space<vmem>>, vector<1x64xf32>
    %4 = vector.broadcast %3 : vector<1x64xf32> to vector<64x64xf32>
    %5 = arith.addf %2, %4 : vector<64x64xf32>
    %6 = arith.truncf %5 : vector<64x64xf32> to vector<64x64xbf16>
    %c0_5 = arith.constant 0 : index
    %c0_6 = arith.constant 0 : index
    %7 = vector.load %arg4[%c0_5, %c0_6] : memref<64x64xbf16, #tpu.memory_space<vmem>>, vector<64x64xbf16>
    tpu.vector_store %arg4[%c0_5, %c0_6], %6 {strides = array<i32>} : memref<64x64xbf16, #tpu.memory_space<vmem>>, vector<64x64xbf16>,
    return
  }
  func.func @transform_0(%arg0: i32) -> (i32, i32) {
    %c0_i32 = arith.constant 0 : i32
    %c0_i32_0 = arith.constant 0 : i32
    return %arg0, %c0_i32 : i32, i32
  }
  func.func @transform_1(%arg0: i32) -> (i32, i32) {
    %c0_i32 = arith.constant 0 : i32
    %c0_i32_0 = arith.constant 0 : i32
    %c0_i32_1 = arith.constant 0 : i32
    return %c0_i32, %c0_i32_0 : i32, i32
  }
  func.func @transform_2(%arg0: i32) -> (i32, i32) {
    %c0_i32 = arith.constant 0 : i32
    %c0_i32_0 = arith.constant 0 : i32
    %c0_i32_1 = arith.constant 0 : i32
    return %c0_i32, %c0_i32_0 : i32, i32
  }
  func.func @transform_3(%arg0: i32) -> (i32, i32) {
    %c0_i32 = arith.constant 0 : i32
    %c0_i32_0 = arith.constant 0 : i32
    return %arg0, %c0_i32 : i32, i32
  }
}

module attributes {stable_mosaic.version = 11 : i64} {
  func.func @_gemm_shift_kernel(%arg0: i32, %arg1: memref<64x288xbf16, #tpu.memory_space<vmem>>, %arg2: memref<288x64xbf16, #tpu.memory_space<vmem>>, %arg3: memref<1x64xf32, #tpu.memory_space<vmem>>, %arg4: memref<64x64xbf16, #tpu.memory_space<vmem>>) attributes {dimension_semantics = [#tpu.dimension_semantics<parallel>], iteration_bounds = array<i64: 2>, scalar_prefetch = 0 : i64, scratch_operands = 0 : i64, tpu.core_type = #tpu.core_type<tc>, window_params = [{transform_indices = @transform_0, window_bounds = array<i64: 64, 288>}, {pipeline_mode = #tpu.pipeline_mode<synchronous>, transform_indices = @transform_1, window_bounds = array<i64: 288, 64>}, {pipeline_mode = #tpu.pipeline_mode<synchronous>, transform_indices = @transform_2, window_bounds = array<i64: 1, 64>}, {transform_indices = @transform_3, window_bounds = array<i64: 64, 64>}]} {
    %c0 = arith.constant 0 : index
    %c0_0 = arith.constant 0 : index
    %0 = vector.load %arg1[%c0, %c0_0] : memref<64x288xbf16, #tpu.memory_space<vmem>>, vector<64x288xbf16>
    %c0_1 = arith.constant 0 : index
    %c0_2 = arith.constant 0 : index
    %1 = vector.load %arg2[%c0_1, %c0_2] : memref<288x64xbf16, #tpu.memory_space<vmem>>, vector<288x64xbf16>
    %cst = arith.constant dense<0.000000e+00> : vector<64x64xf32>
    %2 = tpu.matmul %0, %1, %cst {dimension_numbers = #tpu.dot_dimension_numbers<[1], [0], [0], [1], [0, 0, 1, 1], [], []>} : vector<64x288xbf16>, vector<288x64xbf16>, vector<64x64xf32> -> vector<64x64xf32>
    %c0_3 = arith.constant 0 : index
    %c0_4 = arith.constant 0 : index
    %3 = vector.load %arg3[%c0_3, %c0_4] : memref<1x64xf32, #tpu.memory_space<vmem>>, vector<1x64xf32>
    %4 = vector.broadcast %3 : vector<1x64xf32> to vector<64x64xf32>
    %5 = arith.addf %2, %4 : vector<64x64xf32>
    %cst_5 = arith.constant 0.000000e+00 : f32
    %6 = vector.broadcast %cst_5 : f32 to vector<64x64xf32>
    %7 = arith.maximumf %5, %6 : vector<64x64xf32>
    %8 = arith.truncf %7 : vector<64x64xf32> to vector<64x64xbf16>
    %c0_6 = arith.constant 0 : index
    %c0_7 = arith.constant 0 : index
    %9 = vector.load %arg4[%c0_6, %c0_7] : memref<64x64xbf16, #tpu.memory_space<vmem>>, vector<64x64xbf16>
    tpu.vector_store %arg4[%c0_6, %c0_7], %8 {strides = array<i32>} : memref<64x64xbf16, #tpu.memory_space<vmem>>, vector<64x64xbf16>,
    return
  }
  func.func @transform_0(%arg0: i32) -> (i32, i32) {
    %c0_i32 = arith.constant 0 : i32
    %c0_i32_0 = arith.constant 0 : i32
    return %arg0, %c0_i32 : i32, i32
  }
  func.func @transform_1(%arg0: i32) -> (i32, i32) {
    %c0_i32 = arith.constant 0 : i32
    %c0_i32_0 = arith.constant 0 : i32
    %c0_i32_1 = arith.constant 0 : i32
    return %c0_i32, %c0_i32_0 : i32, i32
  }
  func.func @transform_2(%arg0: i32) -> (i32, i32) {
    %c0_i32 = arith.constant 0 : i32
    %c0_i32_0 = arith.constant 0 : i32
    %c0_i32_1 = arith.constant 0 : i32
    return %c0_i32, %c0_i32_0 : i32, i32
  }
  func.func @transform_3(%arg0: i32) -> (i32, i32) {
    %c0_i32 = arith.constant 0 : i32
    %c0_i32_0 = arith.constant 0 : i32
    return %arg0, %c0_i32 : i32, i32
  }
}

module attributes {stable_mosaic.version = 11 : i64} {
  func.func @_conv3x3_res_kernel(%arg0: i32, %arg1: memref<1x10x10x64xbf16, #tpu.memory_space<vmem>>, %arg2: memref<576x64xbf16, #tpu.memory_space<vmem>>, %arg3: memref<1x64xf32, #tpu.memory_space<vmem>>, %arg4: memref<1x8x8x64xbf16, #tpu.memory_space<vmem>>, %arg5: memref<1x8x8x64xbf16, #tpu.memory_space<vmem>>) attributes {dimension_semantics = [#tpu.dimension_semantics<parallel>], iteration_bounds = array<i64: 2>, scalar_prefetch = 0 : i64, scratch_operands = 0 : i64, tpu.core_type = #tpu.core_type<tc>, window_params = [{transform_indices = @transform_0, window_bounds = array<i64: 1, 10, 10, 64>}, {pipeline_mode = #tpu.pipeline_mode<synchronous>, transform_indices = @transform_1, window_bounds = array<i64: 576, 64>}, {pipeline_mode = #tpu.pipeline_mode<synchronous>, transform_indices = @transform_2, window_bounds = array<i64: 1, 64>}, {transform_indices = @transform_3, window_bounds = array<i64: 1, 8, 8, 64>}, {transform_indices = @transform_4, window_bounds = array<i64: 1, 8, 8, 64>}]} {
    %c0 = arith.constant 0 : index
    %c0_0 = arith.constant 0 : index
    %c0_1 = arith.constant 0 : index
    %c0_2 = arith.constant 0 : index
    %0 = vector.load %arg1[%c0, %c0_0, %c0_1, %c0_2] : memref<1x10x10x64xbf16, #tpu.memory_space<vmem>>, vector<1x10x10x64xbf16>
    %1 = vector.shape_cast %0 : vector<1x10x10x64xbf16> to vector<10x10x64xbf16>
    %2 = arith.extf %1 : vector<10x10x64xbf16> to vector<10x10x64xf32>
    %cst = arith.constant 0.000000e+00 : f32
    %3 = vector.broadcast %cst : f32 to vector<64x64xf32>
    %4 = vector.extract_strided_slice %2 {offsets = [0, 0, 0], sizes = [8, 8, 64], strides = [1, 1, 1]} : vector<10x10x64xf32> to vector<8x8x64xf32>
    %5 = vector.shape_cast %4 : vector<8x8x64xf32> to vector<64x64xf32>
    %6 = arith.truncf %5 : vector<64x64xf32> to vector<64x64xbf16>
    %c0_3 = arith.constant 0 : index
    %c0_4 = arith.constant 0 : index
    %7 = vector.load %arg2[%c0_3, %c0_4] : memref<576x64xbf16, #tpu.memory_space<vmem>>, vector<64x64xbf16>
    %cst_5 = arith.constant dense<0.000000e+00> : vector<64x64xf32>
    %8 = tpu.matmul %6, %7, %cst_5 {dimension_numbers = #tpu.dot_dimension_numbers<[1], [0], [0], [1], [0, 0, 1, 1], [], []>} : vector<64x64xbf16>, vector<64x64xbf16>, vector<64x64xf32> -> vector<64x64xf32>
    %9 = arith.addf %3, %8 : vector<64x64xf32>
    %10 = vector.extract_strided_slice %2 {offsets = [0, 1, 0], sizes = [8, 8, 64], strides = [1, 1, 1]} : vector<10x10x64xf32> to vector<8x8x64xf32>
    %11 = vector.shape_cast %10 : vector<8x8x64xf32> to vector<64x64xf32>
    %12 = arith.truncf %11 : vector<64x64xf32> to vector<64x64xbf16>
    %c64 = arith.constant 64 : index
    %c0_6 = arith.constant 0 : index
    %13 = vector.load %arg2[%c64, %c0_6] : memref<576x64xbf16, #tpu.memory_space<vmem>>, vector<64x64xbf16>
    %cst_7 = arith.constant dense<0.000000e+00> : vector<64x64xf32>
    %14 = tpu.matmul %12, %13, %cst_7 {dimension_numbers = #tpu.dot_dimension_numbers<[1], [0], [0], [1], [0, 0, 1, 1], [], []>} : vector<64x64xbf16>, vector<64x64xbf16>, vector<64x64xf32> -> vector<64x64xf32>
    %15 = arith.addf %9, %14 : vector<64x64xf32>
    %16 = vector.extract_strided_slice %2 {offsets = [0, 2, 0], sizes = [8, 8, 64], strides = [1, 1, 1]} : vector<10x10x64xf32> to vector<8x8x64xf32>
    %17 = vector.shape_cast %16 : vector<8x8x64xf32> to vector<64x64xf32>
    %18 = arith.truncf %17 : vector<64x64xf32> to vector<64x64xbf16>
    %c128 = arith.constant 128 : index
    %c0_8 = arith.constant 0 : index
    %19 = vector.load %arg2[%c128, %c0_8] : memref<576x64xbf16, #tpu.memory_space<vmem>>, vector<64x64xbf16>
    %cst_9 = arith.constant dense<0.000000e+00> : vector<64x64xf32>
    %20 = tpu.matmul %18, %19, %cst_9 {dimension_numbers = #tpu.dot_dimension_numbers<[1], [0], [0], [1], [0, 0, 1, 1], [], []>} : vector<64x64xbf16>, vector<64x64xbf16>, vector<64x64xf32> -> vector<64x64xf32>
    %21 = arith.addf %15, %20 : vector<64x64xf32>
    %22 = vector.extract_strided_slice %2 {offsets = [1, 0, 0], sizes = [8, 8, 64], strides = [1, 1, 1]} : vector<10x10x64xf32> to vector<8x8x64xf32>
    %23 = vector.shape_cast %22 : vector<8x8x64xf32> to vector<64x64xf32>
    %24 = arith.truncf %23 : vector<64x64xf32> to vector<64x64xbf16>
    %c192 = arith.constant 192 : index
    %c0_10 = arith.constant 0 : index
    %25 = vector.load %arg2[%c192, %c0_10] : memref<576x64xbf16, #tpu.memory_space<vmem>>, vector<64x64xbf16>
    %cst_11 = arith.constant dense<0.000000e+00> : vector<64x64xf32>
    %26 = tpu.matmul %24, %25, %cst_11 {dimension_numbers = #tpu.dot_dimension_numbers<[1], [0], [0], [1], [0, 0, 1, 1], [], []>} : vector<64x64xbf16>, vector<64x64xbf16>, vector<64x64xf32> -> vector<64x64xf32>
    %27 = arith.addf %21, %26 : vector<64x64xf32>
    %28 = vector.extract_strided_slice %2 {offsets = [1, 1, 0], sizes = [8, 8, 64], strides = [1, 1, 1]} : vector<10x10x64xf32> to vector<8x8x64xf32>
    %29 = vector.shape_cast %28 : vector<8x8x64xf32> to vector<64x64xf32>
    %30 = arith.truncf %29 : vector<64x64xf32> to vector<64x64xbf16>
    %c256 = arith.constant 256 : index
    %c0_12 = arith.constant 0 : index
    %31 = vector.load %arg2[%c256, %c0_12] : memref<576x64xbf16, #tpu.memory_space<vmem>>, vector<64x64xbf16>
    %cst_13 = arith.constant dense<0.000000e+00> : vector<64x64xf32>
    %32 = tpu.matmul %30, %31, %cst_13 {dimension_numbers = #tpu.dot_dimension_numbers<[1], [0], [0], [1], [0, 0, 1, 1], [], []>} : vector<64x64xbf16>, vector<64x64xbf16>, vector<64x64xf32> -> vector<64x64xf32>
    %33 = arith.addf %27, %32 : vector<64x64xf32>
    %34 = vector.extract_strided_slice %2 {offsets = [1, 2, 0], sizes = [8, 8, 64], strides = [1, 1, 1]} : vector<10x10x64xf32> to vector<8x8x64xf32>
    %35 = vector.shape_cast %34 : vector<8x8x64xf32> to vector<64x64xf32>
    %36 = arith.truncf %35 : vector<64x64xf32> to vector<64x64xbf16>
    %c320 = arith.constant 320 : index
    %c0_14 = arith.constant 0 : index
    %37 = vector.load %arg2[%c320, %c0_14] : memref<576x64xbf16, #tpu.memory_space<vmem>>, vector<64x64xbf16>
    %cst_15 = arith.constant dense<0.000000e+00> : vector<64x64xf32>
    %38 = tpu.matmul %36, %37, %cst_15 {dimension_numbers = #tpu.dot_dimension_numbers<[1], [0], [0], [1], [0, 0, 1, 1], [], []>} : vector<64x64xbf16>, vector<64x64xbf16>, vector<64x64xf32> -> vector<64x64xf32>
    %39 = arith.addf %33, %38 : vector<64x64xf32>
    %40 = vector.extract_strided_slice %2 {offsets = [2, 0, 0], sizes = [8, 8, 64], strides = [1, 1, 1]} : vector<10x10x64xf32> to vector<8x8x64xf32>
    %41 = vector.shape_cast %40 : vector<8x8x64xf32> to vector<64x64xf32>
    %42 = arith.truncf %41 : vector<64x64xf32> to vector<64x64xbf16>
    %c384 = arith.constant 384 : index
    %c0_16 = arith.constant 0 : index
    %43 = vector.load %arg2[%c384, %c0_16] : memref<576x64xbf16, #tpu.memory_space<vmem>>, vector<64x64xbf16>
    %cst_17 = arith.constant dense<0.000000e+00> : vector<64x64xf32>
    %44 = tpu.matmul %42, %43, %cst_17 {dimension_numbers = #tpu.dot_dimension_numbers<[1], [0], [0], [1], [0, 0, 1, 1], [], []>} : vector<64x64xbf16>, vector<64x64xbf16>, vector<64x64xf32> -> vector<64x64xf32>
    %45 = arith.addf %39, %44 : vector<64x64xf32>
    %46 = vector.extract_strided_slice %2 {offsets = [2, 1, 0], sizes = [8, 8, 64], strides = [1, 1, 1]} : vector<10x10x64xf32> to vector<8x8x64xf32>
    %47 = vector.shape_cast %46 : vector<8x8x64xf32> to vector<64x64xf32>
    %48 = arith.truncf %47 : vector<64x64xf32> to vector<64x64xbf16>
    %c448 = arith.constant 448 : index
    %c0_18 = arith.constant 0 : index
    %49 = vector.load %arg2[%c448, %c0_18] : memref<576x64xbf16, #tpu.memory_space<vmem>>, vector<64x64xbf16>
    %cst_19 = arith.constant dense<0.000000e+00> : vector<64x64xf32>
    %50 = tpu.matmul %48, %49, %cst_19 {dimension_numbers = #tpu.dot_dimension_numbers<[1], [0], [0], [1], [0, 0, 1, 1], [], []>} : vector<64x64xbf16>, vector<64x64xbf16>, vector<64x64xf32> -> vector<64x64xf32>
    %51 = arith.addf %45, %50 : vector<64x64xf32>
    %52 = vector.extract_strided_slice %2 {offsets = [2, 2, 0], sizes = [8, 8, 64], strides = [1, 1, 1]} : vector<10x10x64xf32> to vector<8x8x64xf32>
    %53 = vector.shape_cast %52 : vector<8x8x64xf32> to vector<64x64xf32>
    %54 = arith.truncf %53 : vector<64x64xf32> to vector<64x64xbf16>
    %c512 = arith.constant 512 : index
    %c0_20 = arith.constant 0 : index
    %55 = vector.load %arg2[%c512, %c0_20] : memref<576x64xbf16, #tpu.memory_space<vmem>>, vector<64x64xbf16>
    %cst_21 = arith.constant dense<0.000000e+00> : vector<64x64xf32>
    %56 = tpu.matmul %54, %55, %cst_21 {dimension_numbers = #tpu.dot_dimension_numbers<[1], [0], [0], [1], [0, 0, 1, 1], [], []>} : vector<64x64xbf16>, vector<64x64xbf16>, vector<64x64xf32> -> vector<64x64xf32>
    %57 = arith.addf %51, %56 : vector<64x64xf32>
    %c0_22 = arith.constant 0 : index
    %c0_23 = arith.constant 0 : index
    %58 = vector.load %arg3[%c0_22, %c0_23] : memref<1x64xf32, #tpu.memory_space<vmem>>, vector<1x64xf32>
    %59 = vector.broadcast %58 : vector<1x64xf32> to vector<64x64xf32>
    %60 = arith.addf %57, %59 : vector<64x64xf32>
    %c0_24 = arith.constant 0 : index
    %c0_25 = arith.constant 0 : index
    %c0_26 = arith.constant 0 : index
    %c0_27 = arith.constant 0 : index
    %61 = vector.load %arg4[%c0_24, %c0_25, %c0_26, %c0_27] : memref<1x8x8x64xbf16, #tpu.memory_space<vmem>>, vector<1x8x8x64xbf16>
    %62 = arith.extf %61 : vector<1x8x8x64xbf16> to vector<1x8x8x64xf32>
    %63 = vector.shape_cast %62 : vector<1x8x8x64xf32> to vector<64x64xf32>
    %64 = arith.addf %60, %63 : vector<64x64xf32>
    %cst_28 = arith.constant 0.000000e+00 : f32
    %65 = vector.broadcast %cst_28 : f32 to vector<64x64xf32>
    %66 = arith.maximumf %64, %65 : vector<64x64xf32>
    %67 = vector.shape_cast %66 : vector<64x64xf32> to vector<1x8x8x64xf32>
    %68 = arith.truncf %67 : vector<1x8x8x64xf32> to vector<1x8x8x64xbf16>
    %c0_29 = arith.constant 0 : index
    %c0_30 = arith.constant 0 : index
    %c0_31 = arith.constant 0 : index
    %c0_32 = arith.constant 0 : index
    %69 = vector.load %arg5[%c0_29, %c0_30, %c0_31, %c0_32] : memref<1x8x8x64xbf16, #tpu.memory_space<vmem>>, vector<1x8x8x64xbf16>
    tpu.vector_store %arg5[%c0_29, %c0_30, %c0_31, %c0_32], %68 {strides = array<i32>} : memref<1x8x8x64xbf16, #tpu.memory_space<vmem>>, vector<1x8x8x64xbf16>,
    return
  }
  func.func @transform_0(%arg0: i32) -> (i32, i32, i32, i32) {
    %c0_i32 = arith.constant 0 : i32
    %c0_i32_0 = arith.constant 0 : i32
    %c0_i32_1 = arith.constant 0 : i32
    %c0_i32_2 = arith.constant 0 : i32
    return %arg0, %c0_i32, %c0_i32_0, %c0_i32_1 : i32, i32, i32, i32
  }
  func.func @transform_1(%arg0: i32) -> (i32, i32) {
    %c0_i32 = arith.constant 0 : i32
    %c0_i32_0 = arith.constant 0 : i32
    %c0_i32_1 = arith.constant 0 : i32
    return %c0_i32, %c0_i32_0 : i32, i32
  }
  func.func @transform_2(%arg0: i32) -> (i32, i32) {
    %c0_i32 = arith.constant 0 : i32
    %c0_i32_0 = arith.constant 0 : i32
    %c0_i32_1 = arith.constant 0 : i32
    return %c0_i32, %c0_i32_0 : i32, i32
  }
  func.func @transform_3(%arg0: i32) -> (i32, i32, i32, i32) {
    %c0_i32 = arith.constant 0 : i32
    %c0_i32_0 = arith.constant 0 : i32
    %c0_i32_1 = arith.constant 0 : i32
    %c0_i32_2 = arith.constant 0 : i32
    return %arg0, %c0_i32, %c0_i32_0, %c0_i32_1 : i32, i32, i32, i32
  }
  func.func @transform_4(%arg0: i32) -> (i32, i32, i32, i32) {
    %c0_i32 = arith.constant 0 : i32
    %c0_i32_0 = arith.constant 0 : i32
    %c0_i32_1 = arith.constant 0 : i32
    %c0_i32_2 = arith.constant 0 : i32
    return %arg0, %c0_i32, %c0_i32_0, %c0_i32_1 : i32, i32, i32, i32
  }
}

</mosaic_0001>

<bundles_post_ra>
// kernel: fwd.8
= control target key start
LH: loop header
LB: loop body
LE: loop exit
PB: predicated region body
PF: predicated region fallthrough
CT: control target
= control target key end

     0   :  { %s503_s12 = smov 0   ;;  %s537_s0 = inlined_call_operand.vmem [shape: bf16[128,32], index: 0, kind: input, shape index: {}]   ;;  %s538_s1 = inlined_call_operand.vmem [shape: bf16[32,64], index: 1, kind: input, shape index: {}]   ;;  %s539_s2 = inlined_call_operand.vmem [shape: f32[1,64], index: 2, kind: input, shape index: {}]   ;;  %s540_s3 = inlined_call_operand.vmem [shape: bf16[128,64], index: 3, kind: output, shape index: {}]  }
   0x1 LB: > { %s401_s13 = sadd.s32 4294967295, %s481_s12   ;;  %p405_p0 = scmp.ge.s32.totalorder %s481_s12, 1  ;;  %s481_s12 = sphi %s503_s12, %s13_s12  }
   0x2   : > { %p138_p1 = scmp.lt.s32.totalorder %s481_s12, 3 }
   0x4   : > { %p139_p2 = pnand %p405_p0, %p138_p1 }
   0x5   : > { %s406_s16 = sshll.u32 (!%p139_p2), %s401_s13, 3 }
   0x6   : > { %142 = sbr.rel (%p139_p2) target bundleno = 224 (0xe0), region = 32  ;;  %p163_p3 = scmp.lt.s32.totalorder (!%p139_p2), %s406_s16, 15 }
   0xb   : > { %v469_v0 = vld [vmem:[%s538_s1 + $0x8] sm:$0xff]   ;;  %v470_v1 = vld [vmem:[%s538_s1] sm:$0xff]   ;;  %s542_s16 = smov (!%p163_p3, %s406_s16), 15  ;;  %vm226_vm0 = vcmask 261120   ;;  %vm336_vm1 = vcmask 519168  }
   0xc   : > { %445 = vmatprep.subr.bf16.mxu0 %v469_v0  ;;  %457 = vmatprep.subr.bf16.mxu1 %v469_v0  ;;  %s407_s19 = sshll.u32 %s542_s16, 2  ;;  %v410_v6 = vld [vmem:[%s539_s2] ss:$0 sm:$0xff] }
   0xd   : > { %446 = vmatpush3.bf16.msra.mxu0 %v469_v0  ;;  %459 = vmatpush3.bf16.msra.mxu1 %v469_v0  ;;  %s166_s22 = scalar_lea.vmem %s537_s0, %s407_s19  ;;  %s172_s27 = scalar_lea.vmem %s540_s3, %s407_s19 }
   0xe   : > { %447 = vmatprep.subr.bf16.mxu0 %v470_v1  ;;  %458 = vmatprep.subr.bf16.mxu1 %v470_v1  ;;  %v471_v2 = vld [vmem:[%s166_s22] sm:$0xff]   ;;  %v472_v3 = vld [vmem:[%s166_s22 + $0x10] sm:$0xff]   ;;  %v473_v4 = vld [vmem:[%s166_s22 + $0x8] sm:$0xff]  }
   0xf   : > { %449 = vmatprep.mubr.msk.bf16.mxu0 %vm226_vm0, %v471_v2  ;;  %453 = vmatprep.mubr.msk.bf16.mxu1 %vm226_vm0, %v472_v3  ;;  %v474_v5 = vld [vmem:[%s166_s22 + $0x18] sm:$0xff]  }
  0x11   : > { %448 = vmatpush3.bf16.msra.mxu0 %v470_v1  ;;  %460 = vmatpush3.bf16.msra.mxu1 %v470_v1 }
  0x14   : > { %450 = vmatmul.mubr.msk.bf16.vlgmr.msra.gmra.mxu0 %vm226_vm0, %v473_v4  ;;  %454 = vmatmul.mubr.msk.bf16.vlgmr.msra.gmra.mxu1 %vm226_vm0, %v474_v5 }
  0xd4   : > { %v451_v7 = vpop.f32.mrf.mxu0  ;;  %v455_v9 = vpop.f32.mrf.mxu1 }
  0xd5   : > { %v282_v8 = vadd.f32 %v451_v7, %v410_v6  ;;  %v298_v10 = vadd.f32 %v455_v9, %v410_v6 }
  0xd6   : > { %v273_v11 = vpop.f32.mrf.mxu0  ;;  %v289_v14 = vpop.f32.mrf.mxu1 }
  0xd7   : > { %v433_v12 = vpack.c.bf16 %v282_v8, %v282_v8  ;;  %v274_v13 = vadd.f32 %v410_v6, %v273_v11  ;;  %v437_v15 = vpack.c.bf16 %v298_v10, %v298_v10  ;;  %v290_v16 = vadd.f32 %v410_v6, %v289_v14 }
  0xd8   : > { %v452_v17 = vpop.f32.mrf.mxu0  ;;  %v456_v20 = vpop.f32.mrf.mxu1 }
  0xd9   : > { %339 = vst.msk [vmem:[%s172_s27 + $0x8] sm:$0xf] %vm336_vm1, %v433_v12  ;;  %v431_v18 = vpack.c.bf16 %v274_v13, %v274_v13  ;;  %v285_v19 = vadd.f32 %v452_v17, %v410_v6  ;;  %343 = vst.msk [vmem:[%s172_s27 + $0x18] sm:$0xf] %vm336_vm1, %v437_v15  ;;  %v435_v21 = vpack.c.bf16 %v290_v16, %v290_v16 }
  0xda   : > { %v301_v22 = vadd.f32 %v456_v20, %v410_v6  ;;  %v276_v23 = vpop.f32.mrf.mxu0  ;;  %v292_v26 = vpop.f32.mrf.mxu1 }
  0xdb   : > { %337 = vst.msk [vmem:[%s172_s27] sm:$0xf] %vm336_vm1, %v431_v18  ;;  %v434_v24 = vpack.c.bf16 %v285_v19, %v285_v19  ;;  %v277_v25 = vadd.f32 %v410_v6, %v276_v23  ;;  %341 = vst.msk [vmem:[%s172_s27 + $0x10] sm:$0xf] %vm336_vm1, %v435_v21  ;;  %v293_v28 = vadd.f32 %v410_v6, %v292_v26 }
  0xdc   : > { %v438_v27 = vpack.c.bf16 %v301_v22, %v301_v22 }
  0xdd   : > { %340 = vst.msk [vmem:[%s172_s27 + $0xc] sm:$0xf] %vm336_vm1, %v434_v24  ;;  %v432_v29 = vpack.c.bf16 %v277_v25, %v277_v25  ;;  %v436_v30 = vpack.c.bf16 %v293_v28, %v293_v28 }
  0xde   : > { %344 = vst.msk [vmem:[%s172_s27 + $0x1c] sm:$0xf] %vm336_vm1, %v438_v27 }
  0xdf   : > { %338 = vst.msk [vmem:[%s172_s27 + $0x4] sm:$0xf] %vm336_vm1, %v432_v29  ;;  %342 = vst.msk [vmem:[%s172_s27 + $0x14] sm:$0xf] %vm336_vm1, %v436_v30 }
  0xe0 PF: > { %s13_s12 = sadd.s32 1, %s481_s12  }
  0xe1   : > { %p10_p4 = scmp.ge.s32.totalorder %s13_s12, 4  }
  0xe3   :  { %12 = sbr.rel (!%p10_p4) target bundleno = 1 (0x1), region = 62 }

// kernel: fwd.5
= control target key start
LH: loop header
LB: loop body
LE: loop exit
PB: predicated region body
PF: predicated region fallthrough
CT: control target
= control target key end

     0   :  { %s3746_s12 = smov 0   ;;  %s5174_s0 = inlined_call_operand.vmem [shape: bf16[2,18,18,32], index: 0, kind: input, shape index: {}]   ;;  %s5175_s1 = inlined_call_operand.vmem [shape: bf16[288,32], index: 1, kind: input, shape index: {}]   ;;  %s5176_s2 = inlined_call_operand.vmem [shape: f32[1,32], index: 2, kind: input, shape index: {}]   ;;  %s5177_s3 = inlined_call_operand.vmem [shape: bf16[2,16,16,32], index: 3, kind: output, shape index: {}]  }
   0x1 LB: > { %s2909_s13 = sadd.s32 4294967295, %s3724_s12   ;;  %p2913_p0 = scmp.ge.s32.totalorder %s3724_s12, 1  ;;  %s3724_s12 = sphi %s3746_s12, %s13_s12  }
   0x2   : > { %p137_p1 = scmp.lt.s32.totalorder %s3724_s12, 3 }
   0x4   : > { %p138_p2 = pnand %p2913_p0, %p137_p1 }
   0x6   : > { %141 = sbr.rel (%p138_p2) target bundleno = 525 (0x20d), region = 32 }
   0xb   : > { %v3664_v0 = vld [vmem:[%s5175_s1 + $0x18] sm:$0xff]   ;;  %p161_p3 = scmp.lt.s32.totalorder %s2909_s13, 1  ;;  %v3665_v1 = vld [vmem:[%s5175_s1 + $0x10] sm:$0xff]   ;;  %v3765_v2 = vld [vmem:[%s5175_s1 + $0x8] sm:$0xff]   ;;  %vm348_vm0 = vcmask 1046528   ;;  %vm493_vm1 = vcmask 261120  }
   0xc   : > { %3651 = vmatprep.subr.bf16.mxu1 %v3664_v0  ;;  %3327 = vmatprep.subr.bf16.mxu0 %v3664_v0  ;;  %v3771_v3 = vld [vmem:[%s5175_s1 + $0x28] sm:$0xff]   ;;  %v3670_v54 = vld [vmem:[%s5175_s1 + $0x20] sm:$0xff]   ;;  %vm924_vm2 = vcmask 1045504   ;;  %vm2821_vm3 = vcmask 257024  }
   0xd   : > { %s5374_s13 = smov (!%p161_p3, %s2909_s13), 1  ;;  %3653 = vmatpush3.bf16.msra.mxu1 %v3664_v0  ;;  %3328 = vmatpush3.bf16.msra.mxu0 %v3664_v0 }
   0xe   : > { %3652 = vmatprep.subr.bf16.mxu1 %v3665_v1  ;;  %3329 = vmatprep.subr.bf16.mxu0 %v3665_v1  ;;  %s3655_s20 = smul.u32 216, %s5374_s13  ;;  %s3132_s4 = sshll.u32 %s5374_s13, 7 }
   0xf   : > { %s5001_s6 = scalar_lea.vmem %s5177_s3, %s3132_s4 }
  0x10   : > { %s3776_s25 = scalar_lea.vmem %s5174_s0, %s3655_s20 }
  0x11   : > { %3654 = vmatpush3.bf16.msra.mxu1 %v3665_v1  ;;  %3330 = vmatpush3.bf16.msra.mxu0 %v3665_v1  ;;  %v3779_v4 = vld [vmem:[%s3776_s25] sm:$0xff]   ;;  %v174_v5 = vld [vmem:[%s3776_s25 + $0x8] sm:$0x1]  ;;  %v3793_v12 = vld [vmem:[%s3776_s25 + $0xc] sm:$0xff]  }
  0x12   : > { %v3783_v6 = vld [vmem:[%s3776_s25 + $0x60] sm:$0xff]   ;;  %v226_v7 = vunpack.c.l.bf16 %v3779_v4  ;;  %v227_v8 = vunpack.c.h.bf16 %v3779_v4  ;;  %v228_v9 = vunpack.c.l.bf16 %v174_v5  ;;  %v3788_v10 = vld [vmem:[%s3776_s25 + $0x68] sm:$0x1]  ;;  %3363 = vmatprep.subr.bf16.mxu1 %v3765_v2  ;;  %3399 = vmatprep.subr.bf16.mxu0 %v3771_v3  ;;  %v3799_v15 = vld [vmem:[%s3776_s25 + $0x14] sm:$0x1]  ;;  %v229_v16 = vunpack.c.l.bf16 %v3793_v12 }
  0x13   : > { %v5192_v11 = vunpack.c.l.bf16 %v3783_v6  ;;  %v5191_v13 = vunpack.c.h.bf16 %v3783_v6  ;;  %v5187_v14 = vunpack.c.l.bf16 %v3788_v10  ;;  %v230_v20 = vunpack.c.h.bf16 %v3793_v12  ;;  %v3815_v28 = vld [vmem:[%s3776_s25 + $0x6c] sm:$0xff]   ;;  %v3821_v33 = vld [vmem:[%s3776_s25 + $0x74] sm:$0x1]  ;;  %v3829_v38 = vld [vmem:[%s3776_s25 + $0x18] sm:$0xff]  }
  0x14   : > { %v349_v17 = vrot.slane %v226_v7, 1  ;;  %v350_v18 = vrot.slane %v227_v8, 1  ;;  %v352_v19 = vrot.slane %v228_v9, 1  ;;  %v3803_v21 = vrot.slane %v226_v7, 2  ;;  %v3840_v43 = vld [vmem:[%s3776_s25 + $0x20] sm:$0x1] }
  0x15   : > { %v389_v22 = vrot.slane %v5192_v11, 1  ;;  %v390_v23 = vrot.slane %v5191_v13, 1  ;;  %v392_v26 = vrot.slane %v5187_v14, 1  ;;  %v5212_v27 = vunpack.c.l.bf16 %v3799_v15  ;;  %v3843_v44 = vld [vmem:[%s3776_s25 + $0x78] sm:$0xff]   ;;  %v3850_v49 = vld [vmem:[%s3776_s25 + $0x80] sm:$0x1] }
  0x16   : > { %v351_v24 = vsel %vm348_vm0, %v349_v17, %v350_v18  ;;  %v353_v25 = vsel %vm348_vm0, %v350_v18, %v352_v19  ;;  %v3817_v30 = vrot.slane %v227_v8, 2  ;;  %v354_v32 = vrot.slane %v229_v16, 1  ;;  %v3870_v59 = vld [vmem:[%s3776_s25 + $0x24] sm:$0xff]   ;;  %v3881_v0 = vld [vmem:[%s3776_s25 + $0x2c] sm:$0x1]  ;;  %v3900_v18 = vld [vmem:[%s3776_s25 + $0x30] sm:$0xff]  }
  0x17   : > { %v461_v29 = vpack.c.bf16 %v353_v25, %v351_v24  ;;  %v391_v31 = vsel %vm348_vm0, %v389_v22, %v390_v23  ;;  %v3823_v34 = vrot.slane %v228_v9, 2  ;;  %v393_v35 = vsel %vm348_vm0, %v390_v23, %v392_v26  ;;  %v3669_v1 = vld [vmem:[%s5175_s1] sm:$0xff]   ;;  %v3897_v17 = vld [vmem:[%s3776_s25 + $0x8c] sm:$0x1]  ;;  %v3910_v23 = vld [vmem:[%s3776_s25 + $0x38] sm:$0x1] }
  0x18   : > { %v355_v36 = vrot.slane %v230_v20, 1  ;;  %v357_v37 = vrot.slane %v5212_v27, 1  ;;  %v3832_v39 = vpack.c.bf16 %v393_v35, %v391_v31  ;;  %v3834_v40 = vrot.slane %v229_v16, 2  ;;  %v3894_v16 = vld [vmem:[%s3776_s25 + $0x84] sm:$0xff]   ;;  %v4026_v13 = vld [vmem:[%s3776_s25 + $0x50] sm:$0x1] }
  0x19   : > { %3331 = vmatprep.mubr.msk.bf16.mxu0 %vm493_vm1, %v461_v29  ;;  %v3836_v41 = vrot.slane %v230_v20, 2  ;;  %v5186_v42 = vunpack.c.l.bf16 %v3815_v28  ;;  %v5185_v47 = vunpack.c.h.bf16 %v3815_v28  ;;  %v5184_v48 = vunpack.c.l.bf16 %v3821_v33  ;;  %v3919_v31 = vld [vmem:[%s5175_s1 + $0x48] sm:$0xff]  }
  0x1a   : > { %v356_v45 = vsel %vm348_vm0, %v354_v32, %v355_v36  ;;  %v358_v46 = vsel %vm348_vm0, %v355_v36, %v357_v37  ;;  %3347 = vmatprep.mubr.msk.bf16.mxu1 %vm493_vm1, %v3832_v39  ;;  %v5211_v52 = vunpack.c.l.bf16 %v3829_v38  ;;  %v5209_v53 = vunpack.c.h.bf16 %v3829_v38  ;;  %v4029_v11 = vld [vmem:[%s3776_s25 + $0xa8] sm:$0xff]  }
  0x1b   : > { %v3854_v50 = vpack.c.bf16 %v358_v46, %v356_v45  ;;  %v394_v51 = vrot.slane %v5186_v42, 1  ;;  %v395_v55 = vrot.slane %v5185_v47, 1  ;;  %v397_v56 = vrot.slane %v5184_v48, 1  ;;  %v3929_v45 = vld [vmem:[%s3776_s25 + $0x90] sm:$0xff]  }
  0x1c   : > { %v5205_v57 = vunpack.c.l.bf16 %v3840_v43  ;;  %v5180_v58 = vunpack.c.l.bf16 %v3843_v44  ;;  %v359_v60 = vrot.slane %v5211_v52, 1  ;;  %v360_v61 = vrot.slane %v5209_v53, 1  ;;  %v4091_v53 = vld [vmem:[%s3776_s25 + $0xbc] sm:$0x1] }
  0x1d   : > { %3332 = vmatmul.mubr.msk.bf16.vlgmr.msra.gmra.mxu0 %vm493_vm1, %v3854_v50  ;;  %v5179_v62 = vunpack.c.h.bf16 %v3843_v44  ;;  %v5178_v63 = vunpack.c.l.bf16 %v3850_v49  ;;  %v396_v5 = vsel %vm348_vm0, %v394_v51, %v395_v55  ;;  %v398_v7 = vsel %vm348_vm0, %v395_v55, %v397_v56 }
  0x1e   : > { %3400 = vmatpush3.bf16.msra.mxu0 %v3771_v3  ;;  %v362_v8 = vrot.slane %v5205_v57, 1  ;;  %v399_v9 = vrot.slane %v5180_v58, 1  ;;  %v3902_v19 = vpack.c.bf16 %v398_v7, %v396_v5  ;;  %v361_v20 = vsel %vm348_vm0, %v359_v60, %v360_v61  ;;  %v3941_v60 = vld [vmem:[%s3776_s25 + $0x98] sm:$0x1]  ;;  %v3986_v58 = vld [vmem:[%s3776_s25 + $0xa4] sm:$0x1] }
  0x1f   : > { %v400_v3 = vrot.slane %v5179_v62, 1  ;;  %v402_v22 = vrot.slane %v5178_v63, 1  ;;  %3401 = vmatprep.subr.bf16.mxu0 %v3670_v54  ;;  %v5204_v25 = vunpack.c.l.bf16 %v3870_v59  ;;  %v5203_v26 = vunpack.c.h.bf16 %v3870_v59  ;;  %v4064_v57 = vld [vmem:[%s3776_s25 + $0x5c] sm:$0x1] }
  0x20   : > { %v363_v24 = vsel %vm348_vm0, %v360_v61, %v362_v8  ;;  %v5202_v29 = vunpack.c.l.bf16 %v3881_v0  ;;  %3348 = vmatmul.mubr.msk.bf16.vlgmr.msra.gmra.mxu1 %vm493_vm1, %v3902_v19  ;;  %v5183_v37 = vunpack.c.l.bf16 %v3894_v16  ;;  %v3944_v61 = vld [vmem:[%s3776_s25 + $0x3c] sm:$0xff]   ;;  %v5181_v5 = vunpack.c.l.bf16 %v3897_v17 }
  0x21   : > { %v3923_v32 = vpack.c.bf16 %v363_v24, %v361_v20  ;;  %v401_v35 = vsel %vm348_vm0, %v399_v9, %v400_v3  ;;  %v403_v36 = vsel %vm348_vm0, %v400_v3, %v402_v22  ;;  %3364 = vmatpush3.bf16.msra.mxu1 %v3765_v2  ;;  %v364_v51 = vrot.slane %v5204_v25, 1  ;;  %v3956_v9 = vld [vmem:[%s5175_s1 + $0x38] sm:$0xff]  }
  0x22   : > { %v3932_v46 = vpack.c.bf16 %v403_v36, %v401_v35  ;;  %v365_v55 = vrot.slane %v5203_v26, 1  ;;  %v367_v56 = vrot.slane %v5202_v29, 1  ;;  %3402 = vmatpush3.bf16.msra.mxu0 %v3670_v54  ;;  %v5182_v2 = vunpack.c.h.bf16 %v3894_v16  ;;  %3365 = vmatprep.subr.bf16.mxu1 %v3669_v1 }
  0x23   : > { %3335 = vmatprep.mubr.msk.bf16.mxu0 %vm493_vm1, %v3923_v32  ;;  %v404_v7 = vrot.slane %v5183_v37, 1  ;;  %v5200_v8 = vunpack.c.l.bf16 %v3900_v18  ;;  %v5196_v3 = vunpack.c.h.bf16 %v3900_v18  ;;  %v5194_v22 = vunpack.c.l.bf16 %v3910_v23  ;;  %3471 = vmatprep.subr.bf16.mxu0 %v3919_v31 }
  0x24   : > { %3351 = vmatprep.mubr.msk.bf16.mxu1 %vm493_vm1, %v3932_v46  ;;  %v366_v54 = vsel %vm348_vm0, %v364_v51, %v365_v55  ;;  %v368_v20 = vsel %vm348_vm0, %v365_v55, %v367_v56  ;;  %v405_v35 = vrot.slane %v5182_v2, 1  ;;  %v407_v36 = vrot.slane %v5181_v5, 1  ;;  %v3974_v51 = vld [vmem:[%s3776_s25 + $0x44] sm:$0x1]  ;;  %v3977_v55 = vld [vmem:[%s3776_s25 + $0x9c] sm:$0xff]  }
  0x25   : > { %v3965_v24 = vpack.c.bf16 %v368_v20, %v366_v54  ;;  %v369_v63 = vrot.slane %v5200_v8, 1  ;;  %v370_v56 = vrot.slane %v5196_v3, 1  ;;  %v372_v54 = vrot.slane %v5194_v22, 1  ;;  %3366 = vmatpush3.bf16.msra.mxu1 %v3669_v1  ;;  %v4054_v8 = vld [vmem:[%s3776_s25 + $0x54] sm:$0xff]  }
  0x26   : > { %v5190_v20 = vunpack.c.l.bf16 %v3929_v45  ;;  %v5189_v62 = vunpack.c.h.bf16 %v3929_v45  ;;  %v406_v5 = vsel %vm348_vm0, %v404_v7, %v405_v35  ;;  %v408_v2 = vsel %vm348_vm0, %v405_v35, %v407_v36  ;;  %3435 = vmatprep.subr.bf16.mxu1 %v3956_v9 }
  0x27   : > { %3336 = vmatmul.mubr.msk.bf16.gmra.mxu0 %vm493_vm1, %v3965_v24  ;;  %v5188_v37 = vunpack.c.l.bf16 %v3941_v60  ;;  %v5193_v48 = vunpack.c.l.bf16 %v3944_v61  ;;  %v3995_v47 = vpack.c.bf16 %v408_v2, %v406_v5  ;;  %v371_v42 = vsel %vm348_vm0, %v369_v63, %v370_v56 }
  0x28   : > { %v373_v1 = vsel %vm348_vm0, %v370_v56, %v372_v54  ;;  %v409_v14 = vrot.slane %v5190_v20, 1  ;;  %v410_v35 = vrot.slane %v5189_v62, 1  ;;  %v5195_v2 = vunpack.c.h.bf16 %v3944_v61  ;;  %v4016_v54 = vld [vmem:[%s3776_s25 + $0x48] sm:$0xff]  }
  0x29   : > { %v4001_v7 = vpack.c.bf16 %v373_v1, %v371_v42  ;;  %v412_v36 = vrot.slane %v5188_v37, 1  ;;  %3352 = vmatmul.mubr.msk.bf16.gmra.mxu1 %vm493_vm1, %v3995_v47  ;;  %v5199_v63 = vunpack.c.l.bf16 %v3974_v51  ;;  %v374_v5 = vrot.slane %v5193_v48, 1 }
  0x2a   : > { %v5197_v42 = vunpack.c.l.bf16 %v3977_v55  ;;  %v5198_v56 = vunpack.c.h.bf16 %v3977_v55  ;;  %v411_v1 = vsel %vm348_vm0, %v409_v14, %v410_v35  ;;  %v375_v62 = vrot.slane %v5195_v2, 1 }
  0x2b   : > { %3339 = vmatprep.mubr.msk.bf16.mxu0 %vm493_vm1, %v4001_v7  ;;  %v413_v37 = vsel %vm348_vm0, %v410_v35, %v412_v36  ;;  %v5201_v20 = vunpack.c.l.bf16 %v3986_v58  ;;  %v377_v22 = vrot.slane %v5199_v63, 1  ;;  %v5208_v3 = vunpack.c.l.bf16 %v4016_v54 }
  0x2c   : > { %v4031_v48 = vpack.c.bf16 %v413_v37, %v411_v1  ;;  %v414_v14 = vrot.slane %v5197_v42, 1  ;;  %v415_v35 = vrot.slane %v5198_v56, 1  ;;  %v376_v36 = vsel %vm348_vm0, %v374_v5, %v375_v62  ;;  %v4045_v1 = vld [vmem:[%s3776_s25 + $0xb0] sm:$0x1] }
  0x2d   : > { %v417_v2 = vrot.slane %v5201_v20, 1  ;;  %v5207_v37 = vunpack.c.h.bf16 %v4016_v54  ;;  %v378_v42 = vsel %vm348_vm0, %v375_v62, %v377_v22  ;;  %v5206_v63 = vunpack.c.l.bf16 %v4026_v13 }
  0x2e   : > { %3355 = vmatprep.mubr.msk.bf16.mxu1 %vm493_vm1, %v4031_v48  ;;  %v416_v56 = vsel %vm348_vm0, %v414_v14, %v415_v35  ;;  %v5210_v5 = vunpack.c.l.bf16 %v4029_v11  ;;  %v4056_v20 = vpack.c.bf16 %v378_v42, %v376_v36  ;;  %v379_v26 = vrot.slane %v5208_v3, 1  ;;  %v4073_v36 = vld [vmem:[%s3776_s25 + $0xb4] sm:$0xff]  }
  0x2f   : > { %v418_v29 = vsel %vm348_vm0, %v415_v35, %v417_v2  ;;  %v380_v25 = vrot.slane %v5207_v37, 1  ;;  %v382_v22 = vrot.slane %v5206_v63, 1  ;;  %v5213_v14 = vunpack.c.h.bf16 %v4029_v11 }
  0x30   : > { %v4066_v62 = vpack.c.bf16 %v418_v29, %v416_v56  ;;  %v5214_v42 = vunpack.c.l.bf16 %v4045_v1  ;;  %3340 = vmatmul.mubr.msk.bf16.gmra.mxu0 %vm493_vm1, %v4056_v20  ;;  %v419_v35 = vrot.slane %v5210_v5, 1  ;;  %v5218_v29 = vunpack.c.l.bf16 %v4054_v8 }
  0x31   : > { %v381_v2 = vsel %vm348_vm0, %v379_v26, %v380_v25  ;;  %v5217_v56 = vunpack.c.h.bf16 %v4054_v8  ;;  %v383_v63 = vsel %vm348_vm0, %v380_v25, %v382_v22  ;;  %v420_v37 = vrot.slane %v5213_v14, 1 }
  0x32   : > { %5224 = vst [vmem:[#allocation2_spill] sm:$0xff] %v4066_v62  ;;  %3356 = vmatmul.mubr.msk.bf16.gmra.mxu1 %vm493_vm1, %v4066_v62  ;;  %v422_v3 = vrot.slane %v5214_v42, 1  ;;  %v5219_v26 = vunpack.c.l.bf16 %v4064_v57  ;;  %v4093_v5 = vpack.c.bf16 %v383_v63, %v381_v2  ;;  %v384_v52 = vrot.slane %v5218_v29, 1 }
  0x33   : > { %v385_v27 = vrot.slane %v5217_v56, 1  ;;  %v5221_v25 = vunpack.c.l.bf16 %v4073_v36  ;;  %v421_v22 = vsel %vm348_vm0, %v419_v35, %v420_v37  ;;  %v5220_v62 = vunpack.c.h.bf16 %v4073_v36 }
  0x34   : > { %v423_v14 = vsel %vm348_vm0, %v420_v37, %v422_v3  ;;  %v387_v42 = vrot.slane %v5219_v26, 1  ;;  %3343 = vmatprep.mubr.msk.bf16.mxu0 %vm493_vm1, %v4093_v5  ;;  %v5222_v56 = vunpack.c.l.bf16 %v4091_v53  ;;  %v5225_v35 = vunpack.c.l.bf16 %v3799_v15 }
  0x35   : > { %v4107_v63 = vpack.c.bf16 %v423_v14, %v421_v22  ;;  %v386_v2 = vsel %vm348_vm0, %v384_v52, %v385_v27  ;;  %v424_v29 = vrot.slane %v5221_v25, 1  ;;  %v425_v26 = vrot.slane %v5220_v62, 1 }
  0x36   : > { %v933_v3 = vrot.slane %v5225_v35, 2  ;;  %v388_v37 = vsel %vm348_vm0, %v385_v27, %v387_v42  ;;  %v927_v14 = vsel %vm924_vm2, %v3803_v21, %v3817_v30  ;;  %v427_v22 = vrot.slane %v5222_v56, 1 }
  0x37   : > { %3359 = vmatprep.mubr.msk.bf16.mxu1 %vm493_vm1, %v4107_v63  ;;  %v4123_v52 = vpack.c.bf16 %v388_v37, %v386_v2  ;;  %v929_v15 = vsel %vm924_vm2, %v3817_v30, %v3823_v34  ;;  %v426_v27 = vsel %vm348_vm0, %v424_v29, %v425_v26  ;;  %v5226_v35 = vunpack.c.l.bf16 %v3829_v38 }
  0x38   : > { %v1037_v42 = vpack.c.bf16 %v929_v15, %v927_v14  ;;  %v428_v21 = vsel %vm348_vm0, %v425_v26, %v427_v22  ;;  %v5227_v2 = vunpack.c.h.bf16 %v3829_v38  ;;  %v932_v30 = vsel %vm924_vm2, %v3834_v40, %v3836_v41 }
  0x39   : > { %3344 = vmatmul.mubr.msk.bf16.gmra.mxu0 %vm493_vm1, %v4123_v52  ;;  %v935_v62 = vrot.slane %v5226_v35, 2  ;;  %v4138_v25 = vpack.c.bf16 %v428_v21, %v426_v27  ;;  %v934_v34 = vsel %vm924_vm2, %v3836_v41, %v933_v3  ;;  %v5228_v29 = vunpack.c.l.bf16 %v3840_v43 }
  0x3a   : > { %v936_v37 = vrot.slane %v5227_v2, 2  ;;  %3403 = vmatprep.mubr.msk.bf16.mxu0 %vm493_vm1, %v1037_v42  ;;  %v5229_v15 = vunpack.c.l.bf16 %v3870_v59  ;;  %v5230_v42 = vunpack.c.h.bf16 %v3870_v59  ;;  %v5231_v40 = vunpack.c.l.bf16 %v3881_v0  ;;  %v3683_v0 = vld [vmem:[%s5175_s1 + $0x40] sm:$0xff]  }
  0x3b   : > { %v938_v26 = vrot.slane %v5228_v29, 2  ;;  %3360 = vmatmul.mubr.msk.bf16.gmra.mxu1 %vm493_vm1, %v4138_v25  ;;  %v4160_v41 = vpack.c.bf16 %v934_v34, %v932_v30  ;;  %v5232_v43 = vunpack.c.l.bf16 %v3900_v18  ;;  %v5233_v3 = vunpack.c.h.bf16 %v3900_v18 }
  0x3c   : > { %v937_v14 = vsel %vm924_vm2, %v935_v62, %v936_v37  ;;  %v940_v27 = vrot.slane %v5229_v15, 2  ;;  %v941_v21 = vrot.slane %v5230_v42, 2  ;;  %v943_v35 = vrot.slane %v5231_v40, 2  ;;  %3367 = vmatprep.mubr.msk.bf16.mxu1 %vm493_vm1, %v3779_v4 }
  0x3d   : > { %v939_v22 = vsel %vm924_vm2, %v936_v37, %v938_v26  ;;  %v945_v62 = vrot.slane %v5232_v43, 2  ;;  %v946_v2 = vrot.slane %v5233_v3, 2  ;;  %v5234_v37 = vunpack.c.l.bf16 %v3910_v23  ;;  %v3681_v23 = vld [vmem:[%s5175_s1 + $0x30] sm:$0xff]  }
  0x3e   : > { %v4168_v26 = vpack.c.bf16 %v939_v22, %v937_v14  ;;  %v942_v15 = vsel %vm924_vm2, %v940_v27, %v941_v21  ;;  %v944_v4 = vsel %vm924_vm2, %v941_v21, %v943_v35  ;;  %v5235_v22 = vunpack.c.l.bf16 %v3944_v61 }
  0x3f   : > { %v948_v29 = vrot.slane %v5234_v37, 2  ;;  %v947_v30 = vsel %vm924_vm2, %v945_v62, %v946_v2  ;;  %v4185_v14 = vpack.c.bf16 %v944_v4, %v942_v15  ;;  %v5236_v42 = vunpack.c.l.bf16 %v3783_v6 }
  0x40   : > { %v950_v27 = vrot.slane %v5235_v22, 2  ;;  %v5237_v35 = vunpack.c.h.bf16 %v3944_v61  ;;  %v5238_v62 = vunpack.c.h.bf16 %v3783_v6  ;;  %v5241_v4 = vunpack.c.l.bf16 %v3815_v28 }
  0x41   : > { %3404 = vmatmul.mubr.msk.bf16.vlgmr.msra.gmra.mxu0 %vm493_vm1, %v4160_v41  ;;  %v949_v34 = vsel %vm924_vm2, %v946_v2, %v948_v29  ;;  %v965_v21 = vrot.slane %v5236_v42, 2  ;;  %v5239_v2 = vunpack.c.l.bf16 %v3788_v10  ;;  %v5240_v29 = vunpack.c.l.bf16 %v3974_v51 }
  0x42   : > { %3472 = vmatpush3.bf16.msra.mxu0 %v3919_v31  ;;  %3407 = vmatprep.mubr.msk.bf16.mxu0 %vm493_vm1, %v4168_v26  ;;  %v4194_v31 = vld [vmem:[%s5175_s1 + $0x68] sm:$0xff]   ;;  %v4198_v40 = vpack.c.bf16 %v949_v34, %v947_v30  ;;  %v951_v43 = vrot.slane %v5237_v35, 2  ;;  %v966_v3 = vrot.slane %v5238_v62, 2  ;;  %v970_v30 = vrot.slane %v5241_v4, 2 }
  0x43   : > { %3473 = vmatprep.subr.bf16.mxu0 %v3683_v0  ;;  %3368 = vmatmul.mubr.msk.bf16.vlgmr.msra.gmra.mxu1 %vm493_vm1, %v3793_v12  ;;  %v968_v37 = vrot.slane %v5239_v2, 2  ;;  %v953_v15 = vrot.slane %v5240_v29, 2  ;;  %v5242_v34 = vunpack.c.h.bf16 %v3815_v28  ;;  %v5243_v42 = vunpack.c.l.bf16 %v3821_v33  ;;  %v4226_v29 = vld [vmem:[%s5175_s1 + $0x58] sm:$0xff]  }
  0x44   : > { %3436 = vmatpush3.bf16.msra.mxu1 %v3956_v9  ;;  %3371 = vmatprep.mubr.msk.bf16.mxu1 %vm493_vm1, %v3829_v38  ;;  %v5244_v10 = vunpack.c.l.bf16 %v4016_v54  ;;  %v5245_v9 = vunpack.c.h.bf16 %v4016_v54  ;;  %v967_v56 = vsel %vm924_vm2, %v965_v21, %v966_v3  ;;  %v5246_v33 = vunpack.c.l.bf16 %v4026_v13 }
  0x45   : > { %v971_v22 = vrot.slane %v5242_v34, 2  ;;  %v973_v35 = vrot.slane %v5243_v42, 2  ;;  %v969_v51 = vsel %vm924_vm2, %v966_v3, %v968_v37  ;;  %3437 = vmatprep.subr.bf16.mxu1 %v3681_v23  ;;  %v5248_v13 = vunpack.c.h.bf16 %v3894_v16 }
  0x46   : > { %v955_v62 = vrot.slane %v5244_v10, 2  ;;  %v956_v2 = vrot.slane %v5245_v9, 2  ;;  %3474 = vmatpush3.bf16.msra.mxu0 %v3683_v0  ;;  %v958_v4 = vrot.slane %v5246_v33, 2  ;;  %v4230_v34 = vpack.c.bf16 %v969_v51, %v967_v56 }
  0x47   : > { %v972_v42 = vsel %vm924_vm2, %v970_v30, %v971_v22  ;;  %v974_v10 = vsel %vm924_vm2, %v971_v22, %v973_v35  ;;  %3543 = vmatprep.subr.bf16.mxu0 %v4194_v31  ;;  %v5247_v0 = vunpack.c.l.bf16 %v3894_v16  ;;  %v981_v37 = vrot.slane %v5248_v13, 2 }
  0x48   : > { %v4235_v21 = vpack.c.bf16 %v974_v10, %v972_v42  ;;  %3438 = vmatpush3.bf16.msra.mxu1 %v3681_v23  ;;  %v5249_v56 = vunpack.c.l.bf16 %v3897_v17  ;;  %v952_v30 = vsel %vm924_vm2, %v950_v27, %v951_v43  ;;  %v954_v22 = vsel %vm924_vm2, %v951_v43, %v953_v15 }
  0x49   : > { %v980_v3 = vrot.slane %v5247_v0, 2  ;;  %3408 = vmatmul.mubr.msk.bf16.gmra.mxu0 %vm493_vm1, %v4185_v14  ;;  %3507 = vmatprep.subr.bf16.mxu1 %v4226_v29  ;;  %v957_v35 = vsel %vm924_vm2, %v955_v62, %v956_v2  ;;  %v959_v51 = vsel %vm924_vm2, %v956_v2, %v958_v4  ;;  %v5250_v42 = vunpack.c.l.bf16 %v3977_v55 }
  0x4a   : > { %v983_v9 = vrot.slane %v5249_v56, 2  ;;  %3411 = vmatprep.mubr.msk.bf16.mxu0 %vm493_vm1, %v4198_v40  ;;  %v4262_v43 = vpack.c.bf16 %v954_v22, %v952_v30  ;;  %v5251_v15 = vunpack.c.h.bf16 %v3977_v55  ;;  %v5252_v2 = vunpack.c.l.bf16 %v3986_v58 }
  0x4b   : > { %v982_v23 = vsel %vm924_vm2, %v980_v3, %v981_v37  ;;  %3372 = vmatmul.mubr.msk.bf16.gmra.mxu1 %vm493_vm1, %v3870_v59  ;;  %v990_v27 = vrot.slane %v5250_v42, 2  ;;  %v4268_v10 = vpack.c.bf16 %v959_v51, %v957_v35  ;;  %v5253_v0 = vunpack.c.l.bf16 %v4054_v8 }
  0x4c   : > { %v984_v33 = vsel %vm924_vm2, %v981_v37, %v983_v9  ;;  %3375 = vmatprep.mubr.msk.bf16.mxu1 %vm493_vm1, %v3900_v18  ;;  %v991_v62 = vrot.slane %v5251_v15, 2  ;;  %v993_v4 = vrot.slane %v5252_v2, 2  ;;  %v5254_v13 = vunpack.c.h.bf16 %v4054_v8 }
  0x4d   : > { %v4256_v17 = vpack.c.bf16 %v984_v33, %v982_v23  ;;  %v960_v3 = vrot.slane %v5253_v0, 2  ;;  %v5255_v56 = vunpack.c.l.bf16 %v4064_v57  ;;  %v5256_v51 = vunpack.c.l.bf16 %v3843_v44 }
  0x4e   : > { %v961_v37 = vrot.slane %v5254_v13, 2  ;;  %v992_v30 = vsel %vm924_vm2, %v990_v27, %v991_v62  ;;  %v994_v22 = vsel %vm924_vm2, %v991_v62, %v993_v4  ;;  %v5257_v42 = vunpack.c.h.bf16 %v3843_v44 }
  0x4f   : > { %v963_v9 = vrot.slane %v5255_v56, 2  ;;  %v4278_v23 = vpack.c.bf16 %v994_v22, %v992_v30  ;;  %v975_v33 = vrot.slane %v5256_v51, 2  ;;  %v5258_v15 = vunpack.c.l.bf16 %v3850_v49 }
  0x50   : > { %v962_v58 = vsel %vm924_vm2, %v960_v3, %v961_v37  ;;  %v976_v27 = vrot.slane %v5257_v42, 2  ;;  %v5259_v49 = vunpack.c.l.bf16 %v3929_v45  ;;  %v5260_v13 = vunpack.c.h.bf16 %v3929_v45 }
  0x51   : > { %3412 = vmatmul.mubr.msk.bf16.gmra.mxu0 %vm493_vm1, %v4262_v43  ;;  %v964_v35 = vsel %vm924_vm2, %v961_v37, %v963_v9  ;;  %v978_v62 = vrot.slane %v5258_v15, 2  ;;  %v5261_v56 = vunpack.c.l.bf16 %v3941_v60  ;;  %v5262_v60 = vunpack.c.l.bf16 %v4029_v11 }
  0x52   : > { %3415 = vmatprep.mubr.msk.bf16.mxu0 %vm493_vm1, %v4268_v10  ;;  %v4290_v57 = vpack.c.bf16 %v964_v35, %v962_v58  ;;  %v977_v2 = vsel %vm924_vm2, %v975_v33, %v976_v27  ;;  %v985_v3 = vrot.slane %v5259_v49, 2  ;;  %v986_v37 = vrot.slane %v5260_v13, 2 }
  0x53   : > { %3376 = vmatmul.mubr.msk.bf16.gmra.mxu1 %vm493_vm1, %v3944_v61  ;;  %v979_v4 = vsel %vm924_vm2, %v976_v27, %v978_v62  ;;  %v988_v9 = vrot.slane %v5261_v56, 2  ;;  %v995_v35 = vrot.slane %v5262_v60, 2  ;;  %v5263_v51 = vunpack.c.h.bf16 %v4029_v11  ;;  %v4353_v56 = vld [vmem:[%s3776_s25 + $0xc0] sm:$0xff]  }
  0x54   : > { %3379 = vmatprep.mubr.msk.bf16.mxu1 %vm493_vm1, %v4016_v54  ;;  %v4308_v0 = vpack.c.bf16 %v979_v4, %v977_v2  ;;  %v987_v30 = vsel %vm924_vm2, %v985_v3, %v986_v37  ;;  %v5264_v42 = vunpack.c.l.bf16 %v4045_v1  ;;  %v5265_v1 = vunpack.c.l.bf16 %v4073_v36 }
  0x55   : > { %v989_v22 = vsel %vm924_vm2, %v986_v37, %v988_v9  ;;  %v996_v33 = vrot.slane %v5263_v51, 2  ;;  %v5266_v49 = vunpack.c.h.bf16 %v4073_v36  ;;  %v5267_v13 = vunpack.c.l.bf16 %v4091_v53 }
  0x56   : > { %v4326_v58 = vpack.c.bf16 %v989_v22, %v987_v30  ;;  %v998_v27 = vrot.slane %v5264_v42, 2  ;;  %v1000_v4 = vrot.slane %v5265_v1, 2  ;;  %v222_v22 = vld [vmem:[%s3776_s25 + $0xc8] sm:$0x1]  ;;  %v274_v60 = vunpack.c.l.bf16 %v4353_v56 }
  0x57   : > { %v997_v15 = vsel %vm924_vm2, %v995_v35, %v996_v33  ;;  %v1001_v3 = vrot.slane %v5266_v49, 2  ;;  %v1003_v37 = vrot.slane %v5267_v13, 2  ;;  %v275_v35 = vunpack.c.h.bf16 %v4353_v56 }
  0x58   : > { %v999_v62 = vsel %vm924_vm2, %v996_v33, %v998_v27  ;;  %v1746_v51 = vrot.slane %v274_v60, 2  ;;  %v276_v42 = vunpack.c.l.bf16 %v222_v22  ;;  %v1526_v49 = vrot.slane %v274_v60, 1  ;;  %v3698_v22 = vld [vmem:[%s5175_s1 + $0x80] sm:$0xff]  }
  0x59   : > { %3416 = vmatmul.mubr.msk.bf16.gmra.mxu0 %vm493_vm1, %v4290_v57  ;;  %v4344_v2 = vpack.c.bf16 %v999_v62, %v997_v15  ;;  %v1002_v9 = vsel %vm924_vm2, %v1000_v4, %v1001_v3  ;;  %v1004_v30 = vsel %vm924_vm2, %v1001_v3, %v1003_v37  ;;  %v1747_v33 = vrot.slane %v275_v35, 2  ;;  %v3693_v4 = vld [vmem:[%s5175_s1 + $0x60] sm:$0xff]  }
  0x5a   : > { %3419 = vmatprep.mubr.msk.bf16.mxu0 %vm493_vm1, %v4230_v34  ;;  %v4368_v53 = vpack.c.bf16 %v1004_v30, %v1002_v9  ;;  %v1749_v27 = vrot.slane %v276_v42, 2  ;;  %v1527_v3 = vrot.slane %v275_v35, 1  ;;  %v1529_v13 = vrot.slane %v276_v42, 1 }
  0x5b   : > { %3380 = vmatmul.mubr.msk.bf16.gmra.mxu1 %vm493_vm1, %v4054_v8  ;;  %v1748_v15 = vsel %vm924_vm2, %v1746_v51, %v1747_v33 }
  0x5c   : > { %3383 = vmatprep.mubr.msk.bf16.mxu1 %vm493_vm1, %v3783_v6  ;;  %v1750_v62 = vsel %vm924_vm2, %v1747_v33, %v1749_v27  ;;  %v1528_v37 = vsel %vm348_vm0, %v1526_v49, %v1527_v3  ;;  %v1530_v9 = vsel %vm348_vm0, %v1527_v3, %v1529_v13  ;;  %v4553_v27 = vld [vmem:[%s3776_s25 + $0xcc] sm:$0xff]  }
  0x5d   : > { %v4376_v1 = vpack.c.bf16 %v1750_v62, %v1748_v15  ;;  %v4454_v30 = vpack.c.bf16 %v1530_v9, %v1528_v37 }
  0x61   : > { %3420 = vmatmul.mubr.msk.bf16.gmra.mxu0 %vm493_vm1, %v4235_v21 }
  0x62   : > { %3423 = vmatprep.mubr.msk.bf16.mxu0 %vm493_vm1, %v4308_v0 }
  0x63   : > { %3384 = vmatmul.mubr.msk.bf16.gmra.mxu1 %vm493_vm1, %v3815_v28 }
  0x64   : > { %3387 = vmatprep.mubr.msk.bf16.mxu1 %vm493_vm1, %v3843_v44 }
  0x69   : > { %3424 = vmatmul.mubr.msk.bf16.gmra.mxu0 %vm493_vm1, %v4256_v17 }
  0x6a   : > { %3427 = vmatprep.mubr.msk.bf16.mxu0 %vm493_vm1, %v4326_v58 }
  0x6b   : > { %3388 = vmatmul.mubr.msk.bf16.gmra.mxu1 %vm493_vm1, %v3894_v16 }
  0x6c   : > { %3391 = vmatprep.mubr.msk.bf16.mxu1 %vm493_vm1, %v3929_v45 }
  0x71   : > { %3428 = vmatmul.mubr.msk.bf16.gmra.mxu0 %vm493_vm1, %v4278_v23 }
  0x72   : > { %3431 = vmatprep.mubr.msk.bf16.mxu0 %vm493_vm1, %v4344_v2 }
  0x73   : > { %3392 = vmatmul.mubr.msk.bf16.gmra.mxu1 %vm493_vm1, %v3977_v55 }
  0x74   : > { %3395 = vmatprep.mubr.msk.bf16.mxu1 %vm493_vm1, %v4029_v11 }
  0x79   : > { %3432 = vmatmul.mubr.msk.bf16.gmra.mxu0 %vm493_vm1, %v4368_v53 }
  0x7a   : > { %3475 = vmatprep.mubr.msk.bf16.mxu0 %vm493_vm1, %v3854_v50  ;;  %v3692_v50 = vld [vmem:[%s5175_s1 + $0x50] sm:$0xff]  }
  0x7b   : > { %3396 = vmatmul.mubr.msk.bf16.gmra.mxu1 %vm493_vm1, %v4073_v36 }
  0x7c   : > { %3439 = vmatprep.mubr.msk.bf16.mxu1 %vm493_vm1, %v3793_v12  ;;  %v3696_v12 = vld [vmem:[%s5175_s1 + $0x88] sm:$0xff]  }
  0x81   : > { %3476 = vmatmul.mubr.msk.bf16.vlgmr.msra.gmra.mxu0 %vm493_vm1, %v3923_v32 }
  0x82   : > { %3544 = vmatpush3.bf16.msra.mxu0 %v4194_v31  ;;  %3479 = vmatprep.mubr.msk.bf16.mxu0 %vm493_vm1, %v3965_v24  ;;  %v3695_v31 = vld [vmem:[%s5175_s1 + $0x78] sm:$0xff]  }
  0x83   : > { %3545 = vmatprep.subr.bf16.mxu0 %v3693_v4  ;;  %3440 = vmatmul.mubr.msk.bf16.vlgmr.msra.gmra.mxu1 %vm493_vm1, %v3829_v38 }
  0x84   : > { %3508 = vmatpush3.bf16.msra.mxu1 %v4226_v29  ;;  %3443 = vmatprep.mubr.msk.bf16.mxu1 %vm493_vm1, %v3870_v59  ;;  %v5268_v29 = vld [vmem:[#allocation2_spill] sm:$0xff] }
  0x85   : > { %3509 = vmatprep.subr.bf16.mxu1 %v3692_v50  ;;  %5269 = vst [vmem:[#allocation2_spill] sm:$0xff] %v4454_v30 }
  0x86   : > { %3546 = vmatpush3.bf16.msra.mxu0 %v3693_v4 }
  0x87   : > { %3615 = vmatprep.subr.bf16.mxu0 %v3696_v12 }
  0x88   : > { %3510 = vmatpush3.bf16.msra.mxu1 %v3692_v50 }
  0x89   : > { %3480 = vmatmul.mubr.msk.bf16.gmra.mxu0 %vm493_vm1, %v4001_v7  ;;  %3579 = vmatprep.subr.bf16.mxu1 %v3695_v31 }
  0x8a   : > { %3483 = vmatprep.mubr.msk.bf16.mxu0 %vm493_vm1, %v4056_v20 }
  0x8b   : > { %3444 = vmatmul.mubr.msk.bf16.gmra.mxu1 %vm493_vm1, %v3900_v18 }
  0x8c   : > { %3447 = vmatprep.mubr.msk.bf16.mxu1 %vm493_vm1, %v3944_v61 }
  0x91   : > { %3484 = vmatmul.mubr.msk.bf16.gmra.mxu0 %vm493_vm1, %v4093_v5 }
  0x92   : > { %3487 = vmatprep.mubr.msk.bf16.mxu0 %vm493_vm1, %v4123_v52 }
  0x93   : > { %3448 = vmatmul.mubr.msk.bf16.gmra.mxu1 %vm493_vm1, %v4016_v54 }
  0x94   : > { %3451 = vmatprep.mubr.msk.bf16.mxu1 %vm493_vm1, %v4054_v8 }
  0x99   : > { %3488 = vmatmul.mubr.msk.bf16.gmra.mxu0 %vm493_vm1, %v3832_v39 }
  0x9a   : > { %3491 = vmatprep.mubr.msk.bf16.mxu0 %vm493_vm1, %v3902_v19 }
  0x9b   : > { %3452 = vmatmul.mubr.msk.bf16.gmra.mxu1 %vm493_vm1, %v3783_v6 }
  0x9c   : > { %3455 = vmatprep.mubr.msk.bf16.mxu1 %vm493_vm1, %v3815_v28 }
  0xa1   : > { %3492 = vmatmul.mubr.msk.bf16.gmra.mxu0 %vm493_vm1, %v3932_v46 }
  0xa2   : > { %3495 = vmatprep.mubr.msk.bf16.mxu0 %vm493_vm1, %v3995_v47 }
  0xa3   : > { %3456 = vmatmul.mubr.msk.bf16.gmra.mxu1 %vm493_vm1, %v3843_v44 }
  0xa4   : > { %3459 = vmatprep.mubr.msk.bf16.mxu1 %vm493_vm1, %v3894_v16 }
  0xa9   : > { %3496 = vmatmul.mubr.msk.bf16.gmra.mxu0 %vm493_vm1, %v4031_v48 }
  0xaa   : > { %3499 = vmatprep.mubr.msk.bf16.mxu0 %vm493_vm1, %v5268_v29 }
  0xab   : > { %3460 = vmatmul.mubr.msk.bf16.gmra.mxu1 %vm493_vm1, %v3929_v45 }
  0xac   : > { %3463 = vmatprep.mubr.msk.bf16.mxu1 %vm493_vm1, %v3977_v55 }
  0xb1   : > { %3500 = vmatmul.mubr.msk.bf16.gmra.mxu0 %vm493_vm1, %v4107_v63 }
  0xb2   : > { %3503 = vmatprep.mubr.msk.bf16.mxu0 %vm493_vm1, %v4138_v25 }
  0xb3   : > { %3464 = vmatmul.mubr.msk.bf16.gmra.mxu1 %vm493_vm1, %v4029_v11 }
  0xb4   : > { %3467 = vmatprep.mubr.msk.bf16.mxu1 %vm493_vm1, %v4073_v36 }
  0xb9   : > { %3504 = vmatmul.mubr.msk.bf16.gmra.mxu0 %vm493_vm1, %v4454_v30 }
  0xba   : > { %3547 = vmatprep.mubr.msk.bf16.mxu0 %vm493_vm1, %v3829_v38  ;;  %v3697_v38 = vld [vmem:[%s5175_s1 + $0x70] sm:$0xff]  }
  0xbb   : > { %3468 = vmatmul.mubr.msk.bf16.gmra.mxu1 %vm493_vm1, %v4353_v56 }
  0xbc   : > { %3511 = vmatprep.mubr.msk.bf16.mxu1 %vm493_vm1, %v4160_v41 }
  0xc1   : > { %3548 = vmatmul.mubr.msk.bf16.vlgmr.msra.gmra.mxu0 %vm493_vm1, %v3870_v59 }
  0xc2   : > { %3616 = vmatpush3.bf16.msra.mxu0 %v3696_v12  ;;  %3551 = vmatprep.mubr.msk.bf16.mxu0 %vm493_vm1, %v3900_v18 }
  0xc3   : > { %3617 = vmatprep.subr.bf16.mxu0 %v3698_v22  ;;  %3512 = vmatmul.mubr.msk.bf16.vlgmr.msra.gmra.mxu1 %vm493_vm1, %v4168_v26 }
  0xc4   : > { %3580 = vmatpush3.bf16.msra.mxu1 %v3695_v31  ;;  %3515 = vmatprep.mubr.msk.bf16.mxu1 %vm493_vm1, %v4185_v14 }
  0xc5   : > { %3581 = vmatprep.subr.bf16.mxu1 %v3697_v38 }
  0xc6   : > { %3618 = vmatpush3.bf16.msra.mxu0 %v3698_v22 }
  0xc8   : > { %3582 = vmatpush3.bf16.msra.mxu1 %v3697_v38 }
  0xc9   : > { %3552 = vmatmul.mubr.msk.bf16.gmra.mxu0 %vm493_vm1, %v3944_v61 }
  0xca   : > { %3555 = vmatprep.mubr.msk.bf16.mxu0 %vm493_vm1, %v4016_v54 }
  0xcb   : > { %3516 = vmatmul.mubr.msk.bf16.gmra.mxu1 %vm493_vm1, %v4198_v40 }
  0xcc   : > { %3519 = vmatprep.mubr.msk.bf16.mxu1 %vm493_vm1, %v4262_v43 }
  0xd1   : > { %3556 = vmatmul.mubr.msk.bf16.gmra.mxu0 %vm493_vm1, %v4054_v8 }
  0xd2   : > { %3559 = vmatprep.mubr.msk.bf16.mxu0 %vm493_vm1, %v3783_v6 }
  0xd3   : > { %3520 = vmatmul.mubr.msk.bf16.gmra.mxu1 %vm493_vm1, %v4268_v10 }
  0xd4   : > { %3523 = vmatprep.mubr.msk.bf16.mxu1 %vm493_vm1, %v4290_v57 }
  0xd9   : > { %3560 = vmatmul.mubr.msk.bf16.gmra.mxu0 %vm493_vm1, %v3815_v28 }
  0xda   : > { %3563 = vmatprep.mubr.msk.bf16.mxu0 %vm493_vm1, %v3843_v44 }
  0xdb   : > { %3524 = vmatmul.mubr.msk.bf16.gmra.mxu1 %vm493_vm1, %v4230_v34 }
  0xdc   : > { %3527 = vmatprep.mubr.msk.bf16.mxu1 %vm493_vm1, %v4235_v21 }
  0xdd   : > { %v3333_v59 = vpop.f32.mrf.mxu0 }
  0xdf   : > { %v576_v6 = vpop.f32.mrf.mxu0 }
  0xe0   : > { %v4502_v18 = vpop.f32.mrf.mxu1 }
  0xe1   : > { %3564 = vmatmul.mubr.msk.bf16.gmra.mxu0 %vm493_vm1, %v3894_v16  ;;  %v3334_v61 = vpop.f32.mrf.mxu0 }
  0xe2   : > { %3567 = vmatprep.mubr.msk.bf16.mxu0 %vm493_vm1, %v3929_v45  ;;  %v4508_v28 = vpop.f32.mrf.mxu1 }
  0xe3   : > { %v4510_v44 = vpop.f32.mrf.mxu0  ;;  %3528 = vmatmul.mubr.msk.bf16.gmra.mxu1 %vm493_vm1, %v4308_v0 }
  0xe4   : > { %v4514_v8 = vpop.f32.mrf.mxu1  ;;  %3531 = vmatprep.mubr.msk.bf16.mxu1 %vm493_vm1, %v4256_v17 }
  0xe6   : > { %v4518_v54 = vpop.f32.mrf.mxu1 }
  0xe7   : > { %v4520_v41 = vpop.f32.mrf.mxu0 }
  0xe9   : > { %3568 = vmatmul.mubr.msk.bf16.gmra.mxu0 %vm493_vm1, %v3977_v55  ;;  %v4524_v16 = vpop.f32.mrf.mxu0  ;;  %v4526_v45 = vpop.f32.mrf.mxu1 }
  0xea   : > { %3571 = vmatprep.mubr.msk.bf16.mxu0 %vm493_vm1, %v4029_v11 }
  0xeb   : > { %v4530_v60 = vpop.f32.mrf.mxu0  ;;  %3532 = vmatmul.mubr.msk.bf16.gmra.mxu1 %vm493_vm1, %v4326_v58  ;;  %v4534_v35 = vpop.f32.mrf.mxu1 }
  0xec   : > { %3535 = vmatprep.mubr.msk.bf16.mxu1 %vm493_vm1, %v4278_v23 }
  0xed   : > { %v4536_v51 = vpop.f32.mrf.mxu0  ;;  %v4540_v55 = vpop.f32.mrf.mxu1 }
  0xef   : > { %v4542_v33 = vpop.f32.mrf.mxu1 }
  0xf0   : > { %v4544_v42 = vpop.f32.mrf.mxu0 }
  0xf1   : > { %3572 = vmatmul.mubr.msk.bf16.gmra.mxu0 %vm493_vm1, %v4073_v36 }
  0xf2   : > { %v4548_v11 = vpop.f32.mrf.mxu1  ;;  %3575 = vmatprep.mubr.msk.bf16.mxu0 %vm493_vm1, %v4353_v56  ;;  %v4555_v15 = vpop.f32.mrf.mxu0 }
  0xf3   : > { %5270 = vst [vmem:[#allocation3_spill] sm:$0xff] %v4548_v11  ;;  %3536 = vmatmul.mubr.msk.bf16.gmra.mxu1 %vm493_vm1, %v4344_v2 }
  0xf4   : > { %v4559_v62 = vpop.f32.mrf.mxu1  ;;  %v4561_v4 = vpop.f32.mrf.mxu0  ;;  %3539 = vmatprep.mubr.msk.bf16.mxu1 %vm493_vm1, %v4368_v53 }
  0xf5   : > { %5271 = vst [vmem:[#allocation4_spill] sm:$0xff] %v4559_v62 }
  0xf6   : > { %v4565_v36 = vpop.f32.mrf.mxu1  ;;  %v4567_v50 = vpop.f32.mrf.mxu0 }
  0xf7   : > { %5272 = vst [vmem:[#allocation5_spill] sm:$0xff] %v4565_v36 }
  0xf8   : > { %v4569_v12 = vpop.f32.mrf.mxu1 }
  0xf9   : > { %5273 = vst [vmem:[#allocation6_spill] sm:$0xff] %v4569_v12  ;;  %v4571_v56 = vpop.f32.mrf.mxu0  ;;  %3576 = vmatmul.mubr.msk.bf16.gmra.mxu0 %vm493_vm1, %v4553_v27 }
  0xfa   : > { %3619 = vmatprep.mubr.msk.bf16.mxu0 %vm493_vm1, %v4168_v26 }
  0xfb   : > { %v4577_v31 = vpop.f32.mrf.mxu0  ;;  %v4579_v49 = vpop.f32.mrf.mxu1  ;;  %3540 = vmatmul.mubr.msk.bf16.gmra.mxu1 %vm493_vm1, %v4376_v1 }
  0xfc   : > { %5274 = vst [vmem:[#allocation7_spill] sm:$0xff] %v4579_v49  ;;  %3583 = vmatprep.mubr.msk.bf16.mxu1 %vm493_vm1, %v3923_v32 }
  0xfd   : > { %v4583_v3 = vpop.f32.mrf.mxu0  ;;  %v4587_v13 = vpop.f32.mrf.mxu1 }
  0xfe   : > { %5275 = vst [vmem:[#allocation8_spill] sm:$0xff] %v4587_v13 }
  0xff   : > { %v4589_v37 = vpop.f32.mrf.mxu0  ;;  %v4591_v9 = vpop.f32.mrf.mxu1 }
 0x100   : > { %5276 = vst [vmem:[#allocation9_spill] sm:$0xff] %v4591_v9 }
 0x101   : > { %v3405_v22 = vpop.f32.mrf.mxu0  ;;  %3620 = vmatmul.mubr.msk.bf16.vlgmr.msra.gmra.mxu0 %vm493_vm1, %v4185_v14  ;;  %v4595_v26 = vpop.f32.mrf.mxu1 }
 0x102   : > { %5277 = vst [vmem:[#allocation10_spill] sm:$0xff] %v4595_v26  ;;  %3623 = vmatprep.mubr.msk.bf16.mxu0 %vm493_vm1, %v4198_v40 }
 0x103   : > { %v1151_v38 = vpop.f32.mrf.mxu0  ;;  %v3369_v49 = vpop.f32.mrf.mxu1  ;;  %3584 = vmatmul.mubr.msk.bf16.vlgmr.msra.gmra.mxu1 %vm493_vm1, %v3965_v24 }
 0x104   : > { %v806_v32 = vadd.f32 %v3369_v49, %v3333_v59  ;;  %3587 = vmatprep.mubr.msk.bf16.mxu1 %vm493_vm1, %v4001_v7 }
 0x105   : > { %v3406_v13 = vpop.f32.mrf.mxu0  ;;  %v797_v9 = vpop.f32.mrf.mxu1 }
 0x106   : > { %v4603_v12 = vadd.f32 %v3405_v22, %v806_v32  ;;  %v798_v36 = vadd.f32 %v797_v9, %v576_v6 }
 0x107   : > { %v1154_v14 = vpop.f32.mrf.mxu0  ;;  %v3370_v62 = vpop.f32.mrf.mxu1 }
 0x108   : > { %v4605_v26 = vadd.f32 %v1151_v38, %v798_v36  ;;  %v809_v30 = vadd.f32 %v3370_v62, %v3334_v61 }
 0x109   : > { %v3409_v40 = vpop.f32.mrf.mxu0  ;;  %3624 = vmatmul.mubr.msk.bf16.gmra.mxu0 %vm493_vm1, %v4262_v43  ;;  %v800_v11 = vpop.f32.mrf.mxu1 }
 0x10a   : > { %3627 = vmatprep.mubr.msk.bf16.mxu0 %vm493_vm1, %v4268_v10  ;;  %v4611_v24 = vadd.f32 %v3406_v13, %v809_v30  ;;  %v801_v7 = vadd.f32 %v800_v11, %v4510_v44 }
 0x10b   : > { %v1167_v59 = vpop.f32.mrf.mxu0  ;;  %v3373_v49 = vpop.f32.mrf.mxu1  ;;  %3588 = vmatmul.mubr.msk.bf16.gmra.mxu1 %vm493_vm1, %v4056_v20 }
 0x10c   : > { %v4616_v6 = vadd.f32 %v1154_v14, %v801_v7  ;;  %v822_v61 = vadd.f32 %v3373_v49, %v4520_v41  ;;  %3591 = vmatprep.mubr.msk.bf16.mxu1 %vm493_vm1, %v4093_v5 }
 0x10d   : > { %v3410_v62 = vpop.f32.mrf.mxu0  ;;  %v813_v43 = vpop.f32.mrf.mxu1 }
 0x10e   : > { %v4621_v36 = vadd.f32 %v3409_v40, %v822_v61  ;;  %v814_v10 = vadd.f32 %v813_v43, %v4524_v16 }
 0x10f   : > { %v1170_v30 = vpop.f32.mrf.mxu0  ;;  %v3374_v44 = vpop.f32.mrf.mxu1 }
 0x110   : > { %v4624_v11 = vadd.f32 %v1167_v59, %v814_v10  ;;  %v825_v13 = vadd.f32 %v3374_v44, %v4530_v60 }
 0x111   : > { %v3413_v20 = vpop.f32.mrf.mxu0  ;;  %3628 = vmatmul.mubr.msk.bf16.gmra.mxu0 %vm493_vm1, %v4290_v57  ;;  %v816_v41 = vpop.f32.mrf.mxu1 }
 0x112   : > { %3631 = vmatprep.mubr.msk.bf16.mxu0 %vm493_vm1, %v4230_v34  ;;  %v4631_v5 = vadd.f32 %v3410_v62, %v825_v13  ;;  %v817_v9 = vadd.f32 %v816_v41, %v4536_v51 }
 0x113   : > { %v1183_v22 = vpop.f32.mrf.mxu0  ;;  %v3377_v16 = vpop.f32.mrf.mxu1  ;;  %3592 = vmatmul.mubr.msk.bf16.gmra.mxu1 %vm493_vm1, %v4123_v52 }
 0x114   : > { %v4636_v38 = vadd.f32 %v1170_v30, %v817_v9  ;;  %v838_v60 = vadd.f32 %v3377_v16, %v4544_v42  ;;  %3595 = vmatprep.mubr.msk.bf16.mxu1 %vm493_vm1, %v3832_v39 }
 0x115   : > { %v3414_v32 = vpop.f32.mrf.mxu0  ;;  %v829_v57 = vpop.f32.mrf.mxu1 }
 0x116   : > { %v4641_v14 = vadd.f32 %v3413_v20, %v838_v60  ;;  %v830_v34 = vadd.f32 %v829_v57, %v4555_v15 }
 0x117   : > { %v1186_v40 = vpop.f32.mrf.mxu0  ;;  %v3378_v51 = vpop.f32.mrf.mxu1 }
 0x118   : > { %v4644_v7 = vadd.f32 %v1183_v22, %v830_v34  ;;  %v841_v59 = vadd.f32 %v3378_v51, %v4561_v4 }
 0x119   : > { %v3417_v52 = vpop.f32.mrf.mxu0  ;;  %3632 = vmatmul.mubr.msk.bf16.gmra.mxu0 %vm493_vm1, %v4235_v21  ;;  %v832_v42 = vpop.f32.mrf.mxu1 }
 0x11a   : > { %3635 = vmatprep.mubr.msk.bf16.mxu0 %vm493_vm1, %v4308_v0  ;;  %v4651_v39 = vadd.f32 %v3414_v32, %v841_v59  ;;  %v833_v49 = vadd.f32 %v832_v42, %v4567_v50 }
 0x11b   : > { %v1199_v61 = vpop.f32.mrf.mxu0  ;;  %v3381_v15 = vpop.f32.mrf.mxu1  ;;  %3596 = vmatmul.mubr.msk.bf16.gmra.mxu1 %vm493_vm1, %v3902_v19 }
 0x11c   : > { %v4656_v62 = vadd.f32 %v1186_v40, %v833_v49  ;;  %v854_v4 = vadd.f32 %v3381_v15, %v4571_v56  ;;  %3599 = vmatprep.mubr.msk.bf16.mxu1 %vm493_vm1, %v3932_v46 }
 0x11d   : > { %v3418_v43 = vpop.f32.mrf.mxu0  ;;  %v845_v21 = vpop.f32.mrf.mxu1 }
 0x11e   : > { %v4661_v10 = vadd.f32 %v3417_v52, %v854_v4  ;;  %v846_v0 = vadd.f32 %v845_v21, %v4577_v31 }
 0x11f   : > { %v1202_v30 = vpop.f32.mrf.mxu0  ;;  %v3382_v50 = vpop.f32.mrf.mxu1 }
 0x120   : > { %v4664_v44 = vadd.f32 %v1199_v61, %v846_v0  ;;  %v857_v13 = vadd.f32 %v3382_v50, %v4583_v3 }
 0x121   : > { %v3421_v19 = vpop.f32.mrf.mxu0  ;;  %3636 = vmatmul.mubr.msk.bf16.gmra.mxu0 %vm493_vm1, %v4256_v17  ;;  %v848_v56 = vpop.f32.mrf.mxu1 }
 0x122   : > { %3639 = vmatprep.mubr.msk.bf16.mxu0 %vm493_vm1, %v4326_v58  ;;  %v4671_v46 = vadd.f32 %v3418_v43, %v857_v13  ;;  %v849_v20 = vadd.f32 %v848_v56, %v4589_v37  ;;  %v225_v37 = vld [vmem:[%s3776_s25 + $0xd4] sm:$0x1] }
 0x123   : > { %v1215_v31 = vpop.f32.mrf.mxu0  ;;  %v3385_v41 = vpop.f32.mrf.mxu1  ;;  %3600 = vmatmul.mubr.msk.bf16.gmra.mxu1 %vm493_vm1, %v3995_v47 }
 0x124   : > { %v4676_v9 = vadd.f32 %v1202_v30, %v849_v20  ;;  %v870_v3 = vadd.f32 %v3385_v41, %v4502_v18  ;;  %3603 = vmatprep.mubr.msk.bf16.mxu1 %vm493_vm1, %v4031_v48  ;;  %v277_v18 = vunpack.c.l.bf16 %v4553_v27  ;;  %v278_v48 = vunpack.c.h.bf16 %v4553_v27 }
 0x125   : > { %v3422_v22 = vpop.f32.mrf.mxu0  ;;  %v861_v17 = vpop.f32.mrf.mxu1 }
 0x126   : > { %v4681_v16 = vadd.f32 %v3421_v19, %v870_v3  ;;  %v862_v58 = vadd.f32 %v861_v17, %v4508_v28  ;;  %v279_v28 = vunpack.c.l.bf16 %v225_v37  ;;  %v2402_v27 = vrot.slane %v277_v18, 2  ;;  %v5278_v3 = vld [vmem:[#allocation3_spill] sm:$0xff]  ;;  %v5279_v17 = vld [vmem:[#allocation2_spill] sm:$0xff] }
 0x127   : > { %v1218_v60 = vpop.f32.mrf.mxu0  ;;  %v3386_v32 = vpop.f32.mrf.mxu1  ;;  %v2182_v21 = vrot.slane %v277_v18, 1  ;;  %v2183_v0 = vrot.slane %v278_v48, 1 }
 0x128   : > { %v4685_v57 = vadd.f32 %v1215_v31, %v862_v58  ;;  %v873_v47 = vadd.f32 %v3386_v32, %v4514_v8  ;;  %v2405_v15 = vrot.slane %v279_v28, 2  ;;  %v5280_v32 = vld [vmem:[#allocation4_spill] sm:$0xff] }
 0x129   : > { %v3425_v34 = vpop.f32.mrf.mxu0  ;;  %3640 = vmatmul.mubr.msk.bf16.gmra.mxu0 %vm493_vm1, %v4278_v23  ;;  %v864_v40 = vpop.f32.mrf.mxu1 }
 0x12a   : > { %3643 = vmatprep.mubr.msk.bf16.mxu0 %vm493_vm1, %v4344_v2  ;;  %v4694_v51 = vadd.f32 %v3422_v22, %v873_v47  ;;  %v865_v59 = vadd.f32 %v864_v40, %v4518_v54  ;;  %v2403_v2 = vrot.slane %v278_v48, 2  ;;  %v5281_v40 = vld [vmem:[#allocation5_spill] sm:$0xff] }
 0x12b   : > { %v1231_v52 = vpop.f32.mrf.mxu0  ;;  %v3389_v42 = vpop.f32.mrf.mxu1  ;;  %3604 = vmatmul.mubr.msk.bf16.gmra.mxu1 %vm493_vm1, %v5268_v29 }
 0x12c   : > { %v4699_v8 = vadd.f32 %v1218_v60, %v865_v59  ;;  %v886_v23 = vadd.f32 %v3389_v42, %v4526_v45  ;;  %3607 = vmatprep.mubr.msk.bf16.mxu1 %vm493_vm1, %v4107_v63  ;;  %v2185_v63 = vrot.slane %v279_v28, 1  ;;  %v2404_v19 = vsel %vm924_vm2, %v2402_v27, %v2403_v2 }
 0x12d   : > { %v3426_v49 = vpop.f32.mrf.mxu0  ;;  %v877_v61 = vpop.f32.mrf.mxu1 }
 0x12e   : > { %v4704_v4 = vadd.f32 %v3425_v34, %v886_v23  ;;  %v878_v54 = vadd.f32 %v877_v61, %v4534_v35  ;;  %v2406_v35 = vsel %vm924_vm2, %v2403_v2, %v2405_v15  ;;  %v2186_v58 = vsel %vm348_vm0, %v2183_v0, %v2185_v63  ;;  %v5282_v23 = vld [vmem:[#allocation6_spill] sm:$0xff]  ;;  %v5283_v15 = vld [vmem:[#allocation7_spill] sm:$0xff] }
 0x12f   : > { %v1234_v43 = vpop.f32.mrf.mxu0  ;;  %v3390_v29 = vpop.f32.mrf.mxu1  ;;  %v2409_v60 = vpack.c.bf16 %v2406_v35, %v2404_v19  ;;  %v5285_v19 = vld [vmem:[#allocation9_spill] sm:$0xff] }
 0x130   : > { %v4707_v30 = vadd.f32 %v1231_v52, %v878_v54  ;;  %v889_v45 = vadd.f32 %v3390_v29, %v4540_v55  ;;  %v5284_v29 = vld [vmem:[#allocation8_spill] sm:$0xff] }
 0x131   : > { %v3429_v50 = vpop.f32.mrf.mxu0  ;;  %3644 = vmatmul.mubr.msk.bf16.gmra.mxu0 %vm493_vm1, %v4368_v53  ;;  %v880_v13 = vpop.f32.mrf.mxu1  ;;  %v2184_v53 = vsel %vm348_vm0, %v2182_v21, %v2183_v0 }
 0x132   : > { %3647 = vmatprep.mubr.msk.bf16.mxu0 %vm493_vm1, %v4376_v1  ;;  %v4716_v56 = vadd.f32 %v3426_v49, %v889_v45  ;;  %v881_v20 = vadd.f32 %v880_v13, %v4542_v33  ;;  %v2189_v18 = vpack.c.bf16 %v2186_v58, %v2184_v53  ;;  %v5286_v53 = vld [vmem:[#allocation10_spill] sm:$0xff] }
 0x133   : > { %v1247_v31 = vpop.f32.mrf.mxu0  ;;  %v3393_v41 = vpop.f32.mrf.mxu1  ;;  %3608 = vmatmul.mubr.msk.bf16.gmra.mxu1 %vm493_vm1, %v4138_v25 }
 0x134   : > { %v4722_v55 = vadd.f32 %v1234_v43, %v881_v20  ;;  %v902_v22 = vadd.f32 %v3393_v41, %v5278_v3  ;;  %3611 = vmatprep.mubr.msk.bf16.mxu1 %vm493_vm1, %v5279_v17 }
 0x135   : > { %v3430_v1 = vpop.f32.mrf.mxu0  ;;  %v893_v37 = vpop.f32.mrf.mxu1 }
 0x136   : > { %v4728_v33 = vadd.f32 %v3429_v50, %v902_v22  ;;  %v894_v47 = vadd.f32 %v893_v37, %v5280_v32 }
 0x137   : > { %v1250_v34 = vpop.f32.mrf.mxu0  ;;  %v3394_v25 = vpop.f32.mrf.mxu1 }
 0x138   : > { %v4731_v48 = vadd.f32 %v1247_v31, %v894_v47  ;;  %v905_v28 = vadd.f32 %v3394_v25, %v5281_v40 }
 0x139   : > { %v3433_v59 = vpop.f32.mrf.mxu0  ;;  %3648 = vmatmul.mubr.msk.bf16.gmra.mxu0 %vm493_vm1, %v2409_v60  ;;  %v896_v52 = vpop.f32.mrf.mxu1 }
 0x13a   : > { %v4735_v42 = vadd.f32 %v3430_v1, %v905_v28  ;;  %v897_v49 = vadd.f32 %v896_v52, %v5282_v23 }
 0x13b   : > { %v1263_v27 = vpop.f32.mrf.mxu0  ;;  %v3397_v2 = vpop.f32.mrf.mxu1  ;;  %3612 = vmatmul.mubr.msk.bf16.gmra.mxu1 %vm493_vm1, %v2189_v18 }
 0x13c   : > { %v4739_v61 = vadd.f32 %v1250_v34, %v897_v49  ;;  %v918_v54 = vadd.f32 %v3397_v2, %v5283_v15 }
 0x13d   : > { %v3434_v43 = vpop.f32.mrf.mxu0  ;;  %v909_v21 = vpop.f32.mrf.mxu1 }
 0x13e   : > { %v4742_v0 = vadd.f32 %v3433_v59, %v918_v54  ;;  %v910_v45 = vadd.f32 %v909_v21, %v5284_v29 }
 0x13f   : > { %v1266_v50 = vpop.f32.mrf.mxu0  ;;  %v3398_v63 = vpop.f32.mrf.mxu1 }
 0x140   : > { %v4745_v13 = vadd.f32 %v1263_v27, %v910_v45  ;;  %v921_v35 = vadd.f32 %v3398_v63, %v5285_v19 }
 0x141   : > { %v3477_v20 = vpop.f32.mrf.mxu0  ;;  %v912_v31 = vpop.f32.mrf.mxu1 }
 0x142   : > { %v4748_v41 = vadd.f32 %v3434_v43, %v921_v35  ;;  %v913_v3 = vadd.f32 %v912_v31, %v5286_v53 }
 0x143   : > { %v1587_v22 = vpop.f32.mrf.mxu0  ;;  %v3441_v1 = vpop.f32.mrf.mxu1 }
 0x144   : > { %v4751_v17 = vadd.f32 %v1266_v50, %v913_v3  ;;  %v1493_v58 = vadd.f32 %v3441_v1, %v4603_v12 }
 0x145   : > { %v3478_v60 = vpop.f32.mrf.mxu0  ;;  %v1364_v37 = vpop.f32.mrf.mxu1 }
 0x146   : > { %v4754_v32 = vadd.f32 %v3477_v20, %v1493_v58  ;;  %v1491_v47 = vadd.f32 %v1364_v37, %v4605_v26 }
 0x147   : > { %v1590_v34 = vpop.f32.mrf.mxu0  ;;  %v3442_v25 = vpop.f32.mrf.mxu1 }
 0x148   : > { %v4757_v18 = vadd.f32 %v1587_v22, %v1491_v47  ;;  %v1494_v40 = vadd.f32 %v3442_v25, %v4611_v24 }
 0x149   : > { %v3481_v28 = vpop.f32.mrf.mxu0  ;;  %v1367_v59 = vpop.f32.mrf.mxu1 }
 0x14a   : > { %v4760_v52 = vadd.f32 %v3478_v60, %v1494_v40  ;;  %v1492_v23 = vadd.f32 %v1367_v59, %v4616_v6 }
 0x14b   : > { %v1603_v49 = vpop.f32.mrf.mxu0  ;;  %v3445_v12 = vpop.f32.mrf.mxu1 }
 0x14c   : > { %v4763_v27 = vadd.f32 %v1590_v34, %v1492_v23  ;;  %v1497_v2 = vadd.f32 %v3445_v12, %v4621_v36 }
 0x14d   : > { %v3482_v15 = vpop.f32.mrf.mxu0  ;;  %v1380_v26 = vpop.f32.mrf.mxu1 }
 0x14e   : > { %v4766_v54 = vadd.f32 %v3481_v28, %v1497_v2  ;;  %v1495_v43 = vadd.f32 %v1380_v26, %v4624_v11 }
 0x14f   : > { %v1606_v21 = vpop.f32.mrf.mxu0  ;;  %v3446_v24 = vpop.f32.mrf.mxu1 }
 0x150   : > { %v4769_v29 = vadd.f32 %v1603_v49, %v1495_v43  ;;  %v1498_v45 = vadd.f32 %v3446_v24, %v4631_v5 }
 0x151   : > { %v3485_v50 = vpop.f32.mrf.mxu0  ;;  %v1383_v6 = vpop.f32.mrf.mxu1 }
 0x152   : > { %v4772_v63 = vadd.f32 %v3482_v15, %v1498_v45  ;;  %v1496_v19 = vadd.f32 %v1383_v6, %v4636_v38 }
 0x153   : > { %v1619_v35 = vpop.f32.mrf.mxu0  ;;  %v3449_v36 = vpop.f32.mrf.mxu1 }
 0x154   : > { %v4775_v20 = vadd.f32 %v1606_v21, %v1496_v19  ;;  %v1501_v31 = vadd.f32 %v3449_v36, %v4641_v14 }
 0x155   : > { %v3486_v53 = vpop.f32.mrf.mxu0  ;;  %v1396_v11 = vpop.f32.mrf.mxu1 }
 0x156   : > { %v4778_v3 = vadd.f32 %v3485_v50, %v1501_v31  ;;  %v1499_v22 = vadd.f32 %v1396_v11, %v4644_v7 }
 0x157   : > { %v1622_v1 = vpop.f32.mrf.mxu0  ;;  %v3450_v5 = vpop.f32.mrf.mxu1 }
 0x158   : > { %v4781_v58 = vadd.f32 %v1619_v35, %v1499_v22  ;;  %v1502_v60 = vadd.f32 %v3450_v5, %v4651_v39 }
 0x159   : > { %v3489_v37 = vpop.f32.mrf.mxu0  ;;  %v1399_v38 = vpop.f32.mrf.mxu1 }
 0x15a   : > { %v4784_v47 = vadd.f32 %v3486_v53, %v1502_v60  ;;  %v1500_v34 = vadd.f32 %v1399_v38, %v4656_v62 }
 0x15b   : > { %v1635_v25 = vpop.f32.mrf.mxu0  ;;  %v3453_v14 = vpop.f32.mrf.mxu1 }
 0x15c   : > { %v4787_v40 = vadd.f32 %v1622_v1, %v1500_v34  ;;  %v1505_v28 = vadd.f32 %v3453_v14, %v4661_v10 }
 0x15d   : > { %v3490_v59 = vpop.f32.mrf.mxu0  ;;  %v1412_v7 = vpop.f32.mrf.mxu1 }
 0x15e   : > { %v4790_v23 = vadd.f32 %v3489_v37, %v1505_v28  ;;  %v1503_v49 = vadd.f32 %v1412_v7, %v4664_v44 }
 0x15f   : > { %v1638_v12 = vpop.f32.mrf.mxu0  ;;  %v3454_v39 = vpop.f32.mrf.mxu1 }
 0x160   : > { %v4793_v2 = vadd.f32 %v1635_v25, %v1503_v49  ;;  %v1506_v15 = vadd.f32 %v3454_v39, %v4671_v46 }
 0x161   : > { %v3493_v26 = vpop.f32.mrf.mxu0  ;;  %v1415_v62 = vpop.f32.mrf.mxu1 }
 0x162   : > { %v4796_v43 = vadd.f32 %v3490_v59, %v1506_v15  ;;  %v1504_v21 = vadd.f32 %v1415_v62, %v4676_v9 }
 0x163   : > { %v1651_v24 = vpop.f32.mrf.mxu0  ;;  %v3457_v10 = vpop.f32.mrf.mxu1 }
 0x164   : > { %v4799_v45 = vadd.f32 %v1638_v12, %v1504_v21  ;;  %v1509_v50 = vadd.f32 %v3457_v10, %v4681_v16 }
 0x165   : > { %v3494_v6 = vpop.f32.mrf.mxu0  ;;  %v1428_v44 = vpop.f32.mrf.mxu1 }
 0x166   : > { %v4802_v19 = vadd.f32 %v3493_v26, %v1509_v50  ;;  %v1507_v35 = vadd.f32 %v1428_v44, %v4685_v57 }
 0x167   : > { %v1654_v36 = vpop.f32.mrf.mxu0  ;;  %v3458_v46 = vpop.f32.mrf.mxu1 }
 0x168   : > { %v4805_v31 = vadd.f32 %v1651_v24, %v1507_v35  ;;  %v1510_v53 = vadd.f32 %v3458_v46, %v4694_v51 }
 0x169   : > { %v3497_v11 = vpop.f32.mrf.mxu0  ;;  %v1431_v9 = vpop.f32.mrf.mxu1 }
 0x16a   : > { %v4808_v22 = vadd.f32 %v3494_v6, %v1510_v53  ;;  %v1508_v1 = vadd.f32 %v1431_v9, %v4699_v8 }
 0x16b   : > { %v1667_v5 = vpop.f32.mrf.mxu0  ;;  %v3461_v16 = vpop.f32.mrf.mxu1 }
 0x16c   : > { %5287 = vst [vmem:[#allocation3_spill] sm:$0xff] %v4808_v22  ;;  %v4811_v60 = vadd.f32 %v1654_v36, %v1508_v1  ;;  %v1513_v37 = vadd.f32 %v3461_v16, %v4704_v4 }
 0x16d   : > { %v3498_v38 = vpop.f32.mrf.mxu0  ;;  %v1444_v57 = vpop.f32.mrf.mxu1 }
 0x16e   : > { %5288 = vst [vmem:[#allocation2_spill] sm:$0xff] %v4811_v60  ;;  %v4814_v34 = vadd.f32 %v3497_v11, %v1513_v37  ;;  %v1511_v25 = vadd.f32 %v1444_v57, %v4707_v30 }
 0x16f   : > { %v1670_v14 = vpop.f32.mrf.mxu0  ;;  %v3462_v51 = vpop.f32.mrf.mxu1 }
 0x170   : > { %5289 = vst [vmem:[#allocation4_spill] sm:$0xff] %v4814_v34  ;;  %v4817_v28 = vadd.f32 %v1667_v5, %v1511_v25  ;;  %v1514_v59 = vadd.f32 %v3462_v51, %v4716_v56 }
 0x171   : > { %v3501_v7 = vpop.f32.mrf.mxu0  ;;  %v1447_v8 = vpop.f32.mrf.mxu1 }
 0x172   : > { %5290 = vst [vmem:[#allocation5_spill] sm:$0xff] %v4817_v28  ;;  %v4820_v49 = vadd.f32 %v3498_v38, %v1514_v59  ;;  %v1512_v12 = vadd.f32 %v1447_v8, %v4722_v55 }
 0x173   : > { %v1683_v39 = vpop.f32.mrf.mxu0  ;;  %v3465_v4 = vpop.f32.mrf.mxu1 }
 0x174   : > { %5291 = vst [vmem:[#allocation6_spill] sm:$0xff] %v4820_v49  ;;  %v4823_v15 = vadd.f32 %v1670_v14, %v1512_v12  ;;  %v1517_v26 = vadd.f32 %v3465_v4, %v4728_v33 }
 0x175   : > { %v3502_v62 = vpop.f32.mrf.mxu0  ;;  %v1460_v30 = vpop.f32.mrf.mxu1 }
 0x176   : > { %5292 = vst [vmem:[#allocation7_spill] sm:$0xff] %v4823_v15  ;;  %v4826_v21 = vadd.f32 %v3501_v7, %v1517_v26  ;;  %v1515_v24 = vadd.f32 %v1460_v30, %v4731_v48 }
 0x177   : > { %v1686_v10 = vpop.f32.mrf.mxu0  ;;  %v3466_v56 = vpop.f32.mrf.mxu1 }
 0x178   : > { %5293 = vst [vmem:[#allocation8_spill] sm:$0xff] %v4826_v21  ;;  %v4829_v50 = vadd.f32 %v1683_v39, %v1515_v24  ;;  %v1518_v6 = vadd.f32 %v3466_v56, %v4735_v42 }
 0x179   : > { %v3505_v44 = vpop.f32.mrf.mxu0  ;;  %v1463_v55 = vpop.f32.mrf.mxu1 }
 0x17a   : > { %5294 = vst [vmem:[#allocation9_spill] sm:$0xff] %v4829_v50  ;;  %v4832_v35 = vadd.f32 %v3502_v62, %v1518_v6  ;;  %v1516_v36 = vadd.f32 %v1463_v55, %v4739_v61 }
 0x17b   : > { %v1699_v46 = vpop.f32.mrf.mxu0  ;;  %v3469_v33 = vpop.f32.mrf.mxu1 }
 0x17c   : > { %5295 = vst [vmem:[#allocation10_spill] sm:$0xff] %v4832_v35  ;;  %v4835_v53 = vadd.f32 %v1686_v10, %v1516_v36  ;;  %v1521_v11 = vadd.f32 %v3469_v33, %v4742_v0 }
 0x17d   : > { %v3506_v9 = vpop.f32.mrf.mxu0  ;;  %v1476_v48 = vpop.f32.mrf.mxu1 }
 0x17e   : > { %5296 = vst [vmem:[#allocation11_spill] sm:$0xff] %v4835_v53  ;;  %v4838_v1 = vadd.f32 %v3505_v44, %v1521_v11  ;;  %v1519_v5 = vadd.f32 %v1476_v48, %v4745_v13 }
 0x17f   : > { %v1702_v16 = vpop.f32.mrf.mxu0  ;;  %v3470_v42 = vpop.f32.mrf.mxu1 }
 0x180   : > { %5297 = vst [vmem:[#allocation12_spill] sm:$0xff] %v4838_v1  ;;  %v4841_v37 = vadd.f32 %v1699_v46, %v1519_v5  ;;  %v1522_v38 = vadd.f32 %v3470_v42, %v4748_v41 }
 0x181   : > { %v4844_v57 = vpop.f32.mrf.mxu0  ;;  %v1479_v61 = vpop.f32.mrf.mxu1 }
 0x182   : > { %5298 = vst [vmem:[#allocation13_spill] sm:$0xff] %v4841_v37  ;;  %v4846_v25 = vadd.f32 %v3506_v9, %v1522_v38  ;;  %v1520_v14 = vadd.f32 %v1479_v61, %v4751_v17 }
 0x183   : > { %v4849_v0 = vpop.f32.mrf.mxu0  ;;  %v3513_v51 = vpop.f32.mrf.mxu1 }
 0x184   : > { %5299 = vst [vmem:[#allocation14_spill] sm:$0xff] %v4846_v25  ;;  %v4851_v59 = vadd.f32 %v1702_v16, %v1520_v14 }
 0x185   : > { %v4853_v7 = vpop.f32.mrf.mxu0  ;;  %v1807_v13 = vpop.f32.mrf.mxu1 }
 0x186   : > { %5300 = vst [vmem:[#allocation15_spill] sm:$0xff] %v4851_v59 }
 0x187   : > { %v4855_v8 = vpop.f32.mrf.mxu0  ;;  %v3514_v12 = vpop.f32.mrf.mxu1 }
 0x189   : > { %v4857_v39 = vpop.f32.mrf.mxu0  ;;  %v4859_v41 = vpop.f32.mrf.mxu1 }
 0x18b   : > { %v4861_v4 = vpop.f32.mrf.mxu0  ;;  %v4863_v26 = vpop.f32.mrf.mxu1 }
 0x18d   : > { %v4865_v17 = vpop.f32.mrf.mxu0  ;;  %v4867_v62 = vpop.f32.mrf.mxu1 }
 0x18f   : > { %v4869_v30 = vpop.f32.mrf.mxu0  ;;  %v4871_v24 = vpop.f32.mrf.mxu1 }
 0x191   : > { %v4873_v10 = vpop.f32.mrf.mxu0  ;;  %v4875_v56 = vpop.f32.mrf.mxu1 }
 0x193   : > { %v4877_v6 = vpop.f32.mrf.mxu0  ;;  %v4879_v44 = vpop.f32.mrf.mxu1 }
 0x195   : > { %v4881_v55 = vpop.f32.mrf.mxu0  ;;  %v4883_v36 = vpop.f32.mrf.mxu1 }
 0x197   : > { %v4885_v46 = vpop.f32.mrf.mxu0  ;;  %v4887_v33 = vpop.f32.mrf.mxu1 }
 0x199   : > { %v4889_v11 = vpop.f32.mrf.mxu0  ;;  %v4891_v9 = vpop.f32.mrf.mxu1 }
 0x19b   : > { %v4893_v48 = vpop.f32.mrf.mxu0  ;;  %v4895_v5 = vpop.f32.mrf.mxu1 }
 0x19d   : > { %v4897_v16 = vpop.f32.mrf.mxu0  ;;  %v4899_v42 = vpop.f32.mrf.mxu1 }
 0x19f   : > { %v4901_v38 = vpop.f32.mrf.mxu0  ;;  %v4903_v61 = vpop.f32.mrf.mxu1 }
 0x1a1   : > { %v4905_v14 = vpop.f32.mrf.mxu0  ;;  %v4907_v59 = vpop.f32.mrf.mxu1 }
 0x1a3   : > { %v4909_v25 = vpop.f32.mrf.mxu0  ;;  %v4911_v37 = vpop.f32.mrf.mxu1 }
 0x1a4   : > { %5301 = vst [vmem:[#allocation16_spill] sm:$0xff] %v4909_v25 }
 0x1a5   : > { %v4913_v1 = vpop.f32.mrf.mxu0  ;;  %v4915_v53 = vpop.f32.mrf.mxu1 }
 0x1a6   : > { %5302 = vst [vmem:[#allocation17_spill] sm:$0xff] %v4913_v1 }
 0x1a7   : > { %v4917_v35 = vpop.f32.mrf.mxu0  ;;  %v4919_v50 = vpop.f32.mrf.mxu1 }
 0x1a8   : > { %5303 = vst [vmem:[#allocation18_spill] sm:$0xff] %v4917_v35  ;;  %5304 = vst [vmem:[#allocation19_spill] sm:$0xff] %v4919_v50 }
 0x1a9   : > { %v4921_v21 = vpop.f32.mrf.mxu0  ;;  %v4923_v15 = vpop.f32.mrf.mxu1 }
 0x1aa   : > { %5305 = vst [vmem:[#allocation20_spill] sm:$0xff] %v4921_v21  ;;  %5306 = vst [vmem:[#allocation21_spill] sm:$0xff] %v4923_v15 }
 0x1ab   : > { %v4925_v49 = vpop.f32.mrf.mxu0  ;;  %v4927_v28 = vpop.f32.mrf.mxu1 }
 0x1ac   : > { %5307 = vst [vmem:[#allocation22_spill] sm:$0xff] %v4925_v49  ;;  %5308 = vst [vmem:[#allocation23_spill] sm:$0xff] %v4927_v28 }
 0x1ad   : > { %v4929_v34 = vpop.f32.mrf.mxu0  ;;  %v4931_v60 = vpop.f32.mrf.mxu1 }
 0x1ae   : > { %5309 = vst [vmem:[#allocation24_spill] sm:$0xff] %v4929_v34  ;;  %5310 = vst [vmem:[#allocation25_spill] sm:$0xff] %v4931_v60 }
 0x1af   : > { %v4933_v25 = vpop.f32.mrf.mxu0  ;;  %v4935_v1 = vpop.f32.mrf.mxu1 }
 0x1b0   : > { %5311 = vst [vmem:[#allocation26_spill] sm:$0xff] %v4933_v25  ;;  %5312 = vst [vmem:[#allocation27_spill] sm:$0xff] %v4935_v1 }
 0x1b1   : > { %v4937_v22 = vpop.f32.mrf.mxu0  ;;  %v4939_v35 = vpop.f32.mrf.mxu1 }
 0x1b2   : > { %5313 = vst [vmem:[#allocation28_spill] sm:$0xff] %v4937_v22  ;;  %5314 = vst [vmem:[#allocation29_spill] sm:$0xff] %v4939_v35 }
 0x1b3   : > { %v4941_v50 = vpop.f32.mrf.mxu0  ;;  %v4943_v21 = vpop.f32.mrf.mxu1 }
 0x1b4   : > { %5315 = vst [vmem:[#allocation30_spill] sm:$0xff] %v4941_v50  ;;  %5316 = vst [vmem:[#allocation31_spill] sm:$0xff] %v4943_v21 }
 0x1b5   : > { %v4945_v15 = vpop.f32.mrf.mxu0  ;;  %v4947_v49 = vpop.f32.mrf.mxu1 }
 0x1b6   : > { %5317 = vst [vmem:[#allocation32_spill] sm:$0xff] %v4945_v15  ;;  %5318 = vst [vmem:[#allocation33_spill] sm:$0xff] %v4947_v49  ;;  %v1936_v15 = vadd.f32 %v3513_v51, %v4754_v32  ;;  %v1935_v32 = vadd.f32 %v4859_v41, %v4763_v27 }
 0x1b7   : > { %v4949_v28 = vpop.f32.mrf.mxu0  ;;  %v4951_v34 = vpop.f32.mrf.mxu1 }
 0x1b8   : > { %5319 = vst [vmem:[#allocation34_spill] sm:$0xff] %v4949_v28  ;;  %5320 = vst [vmem:[#allocation35_spill] sm:$0xff] %v4951_v34  ;;  %v1934_v28 = vadd.f32 %v1807_v13, %v4757_v18  ;;  %v4981_v18 = vld [vmem:[%s5176_s2] ss:$0 sm:$0xff] }
 0x1b9   : > { %v4953_v60 = vpop.f32.mrf.mxu0  ;;  %v4955_v25 = vpop.f32.mrf.mxu1 }
 0x1ba   : > { %5321 = vst [vmem:[#allocation36_spill] sm:$0xff] %v4953_v60  ;;  %5322 = vst [vmem:[#allocation37_spill] sm:$0xff] %v4955_v25  ;;  %v2149_v25 = vadd.f32 %v4844_v57, %v1936_v15 }
 0x1bb   : > { %v4957_v1 = vpop.f32.mrf.mxu0  ;;  %v4959_v22 = vpop.f32.mrf.mxu1 }
 0x1bc   : > { %5323 = vst [vmem:[#allocation38_spill] sm:$0xff] %v4957_v1  ;;  %5324 = vst [vmem:[#allocation39_spill] sm:$0xff] %v4959_v22  ;;  %v1937_v1 = vadd.f32 %v3514_v12, %v4760_v52 }
 0x1bd   : > { %v4961_v35 = vpop.f32.mrf.mxu0  ;;  %v4963_v50 = vpop.f32.mrf.mxu1 }
 0x1be   : > { %5325 = vst [vmem:[#allocation40_spill] sm:$0xff] %v4961_v35  ;;  %5326 = vst [vmem:[#allocation41_spill] sm:$0xff] %v4963_v50  ;;  %v2147_v50 = vadd.f32 %v4849_v0, %v1934_v28  ;;  %v2150_v15 = vadd.f32 %v4853_v7, %v1937_v1  ;;  %v1938_v28 = vadd.f32 %v4867_v62, %v4769_v29 }
 0x1bf   : > { %v4966_v21 = vpop.f32.mrf.mxu0  ;;  %v4968_v49 = vpop.f32.mrf.mxu1  ;;  %v1939_v62 = vadd.f32 %v4875_v56, %v4775_v20  ;;  %v1944_v20 = vadd.f32 %v4879_v44, %v4778_v3 }
 0x1c0   : > { %5327 = vst [vmem:[#allocation42_spill] sm:$0xff] %v4966_v21  ;;  %5328 = vst [vmem:[#allocation43_spill] sm:$0xff] %v4968_v49 }
 0x1c1   : > { %v3621_v34 = vpop.f32.mrf.mxu0  ;;  %v4971_v60 = vpop.f32.mrf.mxu1 }
 0x1c2   : > { %5329 = vst [vmem:[#allocation44_spill] sm:$0xff] %v4971_v60  ;;  %v1940_v60 = vadd.f32 %v4863_v26, %v4766_v54 }
 0x1c3   : > { %v2463_v22 = vpop.f32.mrf.mxu0  ;;  %v3585_v35 = vpop.f32.mrf.mxu1 }
 0x1c4   : > { %v2372_v51 = vadd.f32 %v3585_v35, %v2149_v25  ;;  %v2148_v35 = vadd.f32 %v4855_v8, %v1935_v32  ;;  %v2153_v29 = vadd.f32 %v4857_v39, %v1940_v60  ;;  %v2151_v8 = vadd.f32 %v4861_v4, %v1938_v28 }
 0x1c5   : > { %v3622_v21 = vpop.f32.mrf.mxu0  ;;  %v2243_v13 = vpop.f32.mrf.mxu1 }
 0x1c6   : > { %v2592_v57 = vadd.f32 %v3621_v34, %v2372_v51  ;;  %v2370_v52 = vadd.f32 %v2243_v13, %v2147_v50  ;;  %v1941_v34 = vadd.f32 %v4871_v24, %v4772_v63 }
 0x1c7   : > { %v2466_v12 = vpop.f32.mrf.mxu0  ;;  %v3586_v27 = vpop.f32.mrf.mxu1 }
 0x1c8   : > { %v2631_v25 = vadd.f32 %v4981_v18, %v2592_v57  ;;  %v2590_v0 = vadd.f32 %v2463_v22, %v2370_v52  ;;  %v2373_v41 = vadd.f32 %v3586_v27, %v2150_v15  ;;  %v2154_v39 = vadd.f32 %v4865_v17, %v1941_v34 }
 0x1c9   : > { %v3625_v49 = vpop.f32.mrf.mxu0  ;;  %v2246_v50 = vpop.f32.mrf.mxu1  ;;  %v2152_v27 = vadd.f32 %v4869_v30, %v1939_v62  ;;  %v1942_v34 = vadd.f32 %v4883_v36, %v4781_v58 }
 0x1ca   : > { %v2663_v1 = vmax.f32 %v2631_v25, 0.0  ;;  %v2629_v7 = vadd.f32 %v4981_v18, %v2590_v0  ;;  %v2593_v54 = vadd.f32 %v3622_v21, %v2373_v41  ;;  %v2371_v26 = vadd.f32 %v2246_v50, %v2148_v35 }
 0x1cb   : > { %v2479_v51 = vpop.f32.mrf.mxu0  ;;  %v3589_v63 = vpop.f32.mrf.mxu1  ;;  %v2157_v41 = vadd.f32 %v4873_v10, %v1944_v20  ;;  %v1945_v50 = vadd.f32 %v4887_v33, %v4784_v47  ;;  %v1943_v10 = vadd.f32 %v4891_v9, %v4787_v40 }
 0x1cc   : > { %v3135_v22 = vpack.c.bf16 %v2663_v1, %v2663_v1  ;;  %v2661_v24 = vmax.f32 %v2629_v7, 0.0  ;;  %v2632_v21 = vadd.f32 %v4981_v18, %v2593_v54  ;;  %v2591_v32 = vadd.f32 %v2466_v12, %v2371_v26 }
 0x1cd   : > { %v3626_v60 = vpop.f32.mrf.mxu0  ;;  %v2376_v4 = vadd.f32 %v3589_v63, %v2153_v29  ;;  %v2259_v56 = vpop.f32.mrf.mxu1  ;;  %v2155_v63 = vadd.f32 %v4877_v6, %v1942_v34 }
 0x1ce   : > { %2824 = vst.msk [vmem:[%s5001_s6 + $0x8] sm:$0xf] %vm2821_vm3, %v3135_v22  ;;  %v3133_v13 = vpack.c.bf16 %v2661_v24, %v2661_v24  ;;  %v2664_v15 = vmax.f32 %v2632_v21, 0.0  ;;  %v2630_v57 = vadd.f32 %v4981_v18, %v2591_v32  ;;  %v2374_v52 = vadd.f32 %v2259_v56, %v2151_v8 }
 0x1cf   : > { %v2482_v28 = vpop.f32.mrf.mxu0  ;;  %v2596_v12 = vadd.f32 %v3625_v49, %v2376_v4  ;;  %v3590_v35 = vpop.f32.mrf.mxu1  ;;  %v2158_v22 = vadd.f32 %v4881_v55, %v1945_v50  ;;  %v1948_v24 = vadd.f32 %v4895_v5, %v4790_v23  ;;  %v2156_v4 = vadd.f32 %v4885_v46, %v1943_v10 }
 0x1d0   : > { %2822 = vst.msk [vmem:[%s5001_s6] sm:$0xf] %vm2821_vm3, %v3133_v13  ;;  %v3136_v17 = vpack.c.bf16 %v2664_v15, %v2664_v15  ;;  %v2662_v25 = vmax.f32 %v2630_v57, 0.0  ;;  %v2594_v3 = vadd.f32 %v2479_v51, %v2374_v52  ;;  %v2377_v44 = vadd.f32 %v3590_v35, %v2154_v39 }
 0x1d1   : > { %v3629_v0 = vpop.f32.mrf.mxu0  ;;  %v2635_v30 = vadd.f32 %v4981_v18, %v2596_v12  ;;  %v2262_v49 = vpop.f32.mrf.mxu1  ;;  %v1946_v56 = vadd.f32 %v4899_v42, %v4793_v2  ;;  %v2161_v52 = vadd.f32 %v4889_v11, %v1948_v24 }
 0x1d2   : > { %2825 = vst.msk [vmem:[%s5001_s6 + $0xc] sm:$0xf] %vm2821_vm3, %v3136_v17  ;;  %v3134_v1 = vpack.c.bf16 %v2662_v25, %v2662_v25  ;;  %v2633_v7 = vadd.f32 %v4981_v18, %v2594_v3  ;;  %v2597_v54 = vadd.f32 %v3626_v60, %v2377_v44  ;;  %v2375_v26 = vadd.f32 %v2262_v49, %v2152_v27 }
 0x1d3   : > { %v2495_v51 = vpop.f32.mrf.mxu0  ;;  %v2667_v29 = vmax.f32 %v2635_v30, 0.0  ;;  %v3593_v8 = vpop.f32.mrf.mxu1  ;;  %v2159_v17 = vadd.f32 %v4893_v48, %v1946_v56  ;;  %v1949_v25 = vadd.f32 %v4903_v61, %v4796_v43  ;;  %v1947_v3 = vadd.f32 %v4907_v59, %v4799_v45 }
 0x1d4   : > { %2823 = vst.msk [vmem:[%s5001_s6 + $0x4] sm:$0xf] %vm2821_vm3, %v3134_v1  ;;  %v2665_v58 = vmax.f32 %v2633_v7, 0.0  ;;  %v2636_v47 = vadd.f32 %v4981_v18, %v2597_v54  ;;  %v2595_v36 = vadd.f32 %v2482_v28, %v2375_v26  ;;  %v2380_v33 = vadd.f32 %v3593_v8, %v2157_v41 }
 0x1d5   : > { %v3630_v62 = vpop.f32.mrf.mxu0  ;;  %v3139_v40 = vpack.c.bf16 %v2667_v29, %v2667_v29  ;;  %v2275_v9 = vpop.f32.mrf.mxu1  ;;  %v1952_v48 = vadd.f32 %v4911_v37, %v4802_v19  ;;  %v2162_v54 = vadd.f32 %v4897_v16, %v1949_v25  ;;  %v2160_v26 = vadd.f32 %v4901_v38, %v1947_v3  ;;  %v5339_v25 = vld [vmem:[#allocation25_spill] sm:$0xff] }
 0x1d6   : > { %v3137_v21 = vpack.c.bf16 %v2665_v58, %v2665_v58  ;;  %v2668_v32 = vmax.f32 %v2636_v47, 0.0  ;;  %v2634_v60 = vadd.f32 %v4981_v18, %v2595_v36  ;;  %v2600_v39 = vadd.f32 %v3629_v0, %v2380_v33  ;;  %v5330_v33 = vld [vmem:[#allocation3_spill] sm:$0xff] }
 0x1d7   : > { %v2498_v20 = vpop.f32.mrf.mxu0  ;;  %2828 = vst.msk [vmem:[%s5001_s6 + $0x18] sm:$0xf] %vm2821_vm3, %v3139_v40  ;;  %v2378_v6 = vadd.f32 %v2275_v9, %v2155_v63  ;;  %v3594_v55 = vpop.f32.mrf.mxu1  ;;  %v2165_v36 = vadd.f32 %v4905_v14, %v1952_v48  ;;  %v5332_v9 = vld [vmem:[#allocation16_spill] sm:$0xff]  ;;  %v5340_v48 = vld [vmem:[#allocation18_spill] sm:$0xff] }
 0x1d8   : > { %2826 = vst.msk [vmem:[%s5001_s6 + $0x10] sm:$0xf] %vm2821_vm3, %v3137_v21  ;;  %v3140_v23 = vpack.c.bf16 %v2668_v32, %v2668_v32  ;;  %v2666_v5 = vmax.f32 %v2634_v60, 0.0  ;;  %v2639_v13 = vadd.f32 %v4981_v18, %v2600_v39  ;;  %v2381_v15 = vadd.f32 %v3594_v55, %v2158_v22 }
 0x1d9   : > { %v3633_v57 = vpop.f32.mrf.mxu0  ;;  %v2598_v28 = vadd.f32 %v2495_v51, %v2378_v6  ;;  %v2278_v46 = vpop.f32.mrf.mxu1  ;;  %v1950_v51 = vadd.f32 %v4915_v53, %v4805_v31  ;;  %v5333_v6 = vld [vmem:[#allocation17_spill] sm:$0xff] }
 0x1da   : > { %2829 = vst.msk [vmem:[%s5001_s6 + $0x1c] sm:$0xf] %vm2821_vm3, %v3140_v23  ;;  %v3138_v2 = vpack.c.bf16 %v2666_v5, %v2666_v5  ;;  %v2671_v42 = vmax.f32 %v2639_v13, 0.0  ;;  %v2601_v27 = vadd.f32 %v3630_v62, %v2381_v15  ;;  %v2379_v12 = vadd.f32 %v2278_v46, %v2156_v4  ;;  %v5331_v62 = vld [vmem:[#allocation19_spill] sm:$0xff]  ;;  %v5334_v23 = vld [vmem:[#allocation2_spill] sm:$0xff]  ;;  %v5335_v5 = vld [vmem:[#allocation21_spill] sm:$0xff] }
 0x1db   : > { %v2511_v35 = vpop.f32.mrf.mxu0  ;;  %v2637_v11 = vadd.f32 %v4981_v18, %v2598_v28  ;;  %v3597_v44 = vpop.f32.mrf.mxu1  ;;  %v1953_v63 = vadd.f32 %v5331_v62, %v5330_v33  ;;  %v2163_v21 = vadd.f32 %v5332_v9, %v1950_v51  ;;  %v1951_v13 = vadd.f32 %v5335_v5, %v5334_v23  ;;  %v5336_v15 = vld [vmem:[#allocation4_spill] sm:$0xff]  ;;  %v5351_v23 = vld [vmem:[#allocation9_spill] sm:$0xff] }
 0x1dc   : > { %2827 = vst.msk [vmem:[%s5001_s6 + $0x14] sm:$0xf] %vm2821_vm3, %v3138_v2  ;;  %v3143_v0 = vpack.c.bf16 %v2671_v42, %v2671_v42  ;;  %v2640_v41 = vadd.f32 %v4981_v18, %v2601_v27  ;;  %v2599_v34 = vadd.f32 %v2498_v20, %v2379_v12  ;;  %v2384_v50 = vadd.f32 %v3597_v44, %v2161_v52  ;;  %v5352_v5 = vld [vmem:[#allocation33_spill] sm:$0xff] }
 0x1dd   : > { %v3634_v30 = vpop.f32.mrf.mxu0  ;;  %v2669_v49 = vmax.f32 %v2637_v11, 0.0  ;;  %v2291_v1 = vpop.f32.mrf.mxu1  ;;  %v2166_v55 = vadd.f32 %v5333_v6, %v1953_v63  ;;  %v5350_v6 = vld [vmem:[#allocation31_spill] sm:$0xff] }
 0x1de   : > { %2832 = vst.msk [vmem:[%s5001_s6 + $0x28] sm:$0xf] %vm2821_vm3, %v3143_v0  ;;  %v2672_v43 = vmax.f32 %v2640_v41, 0.0  ;;  %v2638_v45 = vadd.f32 %v4981_v18, %v2599_v34  ;;  %v2604_v59 = vadd.f32 %v3633_v57, %v2384_v50  ;;  %v2382_v61 = vadd.f32 %v2291_v1, %v2159_v17  ;;  %v5337_v57 = vld [vmem:[#allocation23_spill] sm:$0xff]  ;;  %v5338_v17 = vld [vmem:[#allocation5_spill] sm:$0xff]  ;;  %v5341_v1 = vld [vmem:[#allocation20_spill] sm:$0xff] }
 0x1df   : > { %v2514_v7 = vpop.f32.mrf.mxu0  ;;  %v3141_v19 = vpack.c.bf16 %v2669_v49, %v2669_v49  ;;  %v3598_v37 = vpop.f32.mrf.mxu1  ;;  %v1956_v52 = vadd.f32 %v5337_v57, %v5336_v15  ;;  %v1954_v3 = vadd.f32 %v5339_v25, %v5338_v17  ;;  %v2164_v49 = vadd.f32 %v5340_v48, %v1951_v13 }
 0x1e0   : > { %v3144_v10 = vpack.c.bf16 %v2672_v43, %v2672_v43  ;;  %v2670_v29 = vmax.f32 %v2638_v45, 0.0  ;;  %v2643_v8 = vadd.f32 %v4981_v18, %v2604_v59  ;;  %v2602_v58 = vadd.f32 %v2511_v35, %v2382_v61  ;;  %v5342_v45 = vld [vmem:[#allocation6_spill] sm:$0xff]  ;;  %v5343_v59 = vld [vmem:[#allocation27_spill] sm:$0xff] }
 0x1e1   : > { %v3637_v47 = vpop.f32.mrf.mxu0  ;;  %2830 = vst.msk [vmem:[%s5001_s6 + $0x20] sm:$0xf] %vm2821_vm3, %v3141_v19  ;;  %v2385_v16 = vadd.f32 %v3598_v37, %v2162_v54  ;;  %v2294_v38 = vpop.f32.mrf.mxu1  ;;  %v2169_v43 = vadd.f32 %v5341_v1, %v1956_v52  ;;  %v1957_v61 = vadd.f32 %v5343_v59, %v5342_v45  ;;  %v1958_v13 = vadd.f32 %v5352_v5, %v5351_v23  ;;  %v5358_v1 = vld [vmem:[#allocation37_spill] sm:$0xff] }
 0x1e2   : > { %2833 = vst.msk [vmem:[%s5001_s6 + $0x2c] sm:$0xf] %vm2821_vm3, %v3144_v10  ;;  %v3142_v31 = vpack.c.bf16 %v2670_v29, %v2670_v29  ;;  %v2675_v53 = vmax.f32 %v2643_v8, 0.0  ;;  %v2641_v22 = vadd.f32 %v4981_v18, %v2602_v58  ;;  %v2383_v24 = vadd.f32 %v2294_v38, %v2160_v26  ;;  %v5344_v29 = vld [vmem:[#allocation22_spill] sm:$0xff]  ;;  %v5345_v58 = vld [vmem:[#allocation7_spill] sm:$0xff] }
 0x1e3   : > { %v2527_v40 = vpop.f32.mrf.mxu0  ;;  %v2605_v32 = vadd.f32 %v3634_v30, %v2385_v16  ;;  %v3601_v14 = vpop.f32.mrf.mxu1  ;;  %v2167_v8 = vadd.f32 %v5344_v29, %v1954_v3  ;;  %v5361_v29 = vld [vmem:[#allocation39_spill] sm:$0xff] }
 0x1e4   : > { %2831 = vst.msk [vmem:[%s5001_s6 + $0x24] sm:$0xf] %vm2821_vm3, %v3142_v31  ;;  %v3147_v60 = vpack.c.bf16 %v2675_v53, %v2675_v53  ;;  %v2673_v39 = vmax.f32 %v2641_v22, 0.0  ;;  %v2603_v20 = vadd.f32 %v2514_v7, %v2383_v24  ;;  %v2388_v4 = vadd.f32 %v3601_v14, %v2165_v36  ;;  %v5347_v22 = vld [vmem:[#allocation24_spill] sm:$0xff] }
 0x1e5   : > { %v3638_v56 = vpop.f32.mrf.mxu0  ;;  %v2644_v28 = vadd.f32 %v4981_v18, %v2605_v32  ;;  %v2307_v46 = vpop.f32.mrf.mxu1  ;;  %v2170_v24 = vadd.f32 %v5347_v22, %v1957_v61 }
 0x1e6   : > { %2836 = vst.msk [vmem:[%s5001_s6 + $0x38] sm:$0xf] %vm2821_vm3, %v3147_v60  ;;  %v3145_v2 = vpack.c.bf16 %v2673_v39, %v2673_v39  ;;  %v2642_v42 = vadd.f32 %v4981_v18, %v2603_v20  ;;  %v2608_v27 = vadd.f32 %v3637_v47, %v2388_v4  ;;  %v2386_v12 = vadd.f32 %v2307_v46, %v2163_v21  ;;  %v5346_v47 = vld [vmem:[#allocation29_spill] sm:$0xff]  ;;  %v5348_v20 = vld [vmem:[#allocation26_spill] sm:$0xff] }
 0x1e7   : > { %v2530_v35 = vpop.f32.mrf.mxu0  ;;  %v2676_v11 = vmax.f32 %v2644_v28, 0.0  ;;  %v3602_v44 = vpop.f32.mrf.mxu1  ;;  %v1955_v36 = vadd.f32 %v5346_v47, %v5345_v58 }
 0x1e8   : > { %2834 = vst.msk [vmem:[%s5001_s6 + $0x30] sm:$0xf] %vm2821_vm3, %v3145_v2  ;;  %v2674_v0 = vmax.f32 %v2642_v42, 0.0  ;;  %v2647_v41 = vadd.f32 %v4981_v18, %v2608_v27  ;;  %v2606_v34 = vadd.f32 %v2527_v40, %v2386_v12  ;;  %v2389_v50 = vadd.f32 %v3602_v44, %v2166_v55  ;;  %v5353_v27 = vld [vmem:[#allocation10_spill] sm:$0xff]  ;;  %v5354_v12 = vld [vmem:[#allocation35_spill] sm:$0xff] }
 0x1e9   : > { %v3641_v30 = vpop.f32.mrf.mxu0  ;;  %v3148_v7 = vpack.c.bf16 %v2676_v11, %v2676_v11  ;;  %v2310_v54 = vpop.f32.mrf.mxu1  ;;  %v2168_v4 = vadd.f32 %v5348_v20, %v1955_v36  ;;  %v5365_v20 = vld [vmem:[#allocation41_spill] sm:$0xff] }
 0x1ea   : > { %v3146_v26 = vpack.c.bf16 %v2674_v0, %v2674_v0  ;;  %v2679_v51 = vmax.f32 %v2647_v41, 0.0  ;;  %v2645_v19 = vadd.f32 %v4981_v18, %v2606_v34  ;;  %v2609_v37 = vadd.f32 %v3638_v56, %v2389_v50  ;;  %v5349_v56 = vld [vmem:[#allocation8_spill] sm:$0xff] }
 0x1eb   : > { %v2543_v10 = vpop.f32.mrf.mxu0  ;;  %2837 = vst.msk [vmem:[%s5001_s6 + $0x3c] sm:$0xf] %vm2821_vm3, %v3148_v7  ;;  %v2387_v33 = vadd.f32 %v2310_v54, %v2164_v49  ;;  %v3605_v62 = vpop.f32.mrf.mxu1  ;;  %v1960_v55 = vadd.f32 %v5350_v6, %v5349_v56  ;;  %v5355_v34 = vld [vmem:[#allocation28_spill] sm:$0xff]  ;;  %v5357_v49 = vld [vmem:[#allocation11_spill] sm:$0xff]  ;;  %v5366_v56 = vld [vmem:[#allocation14_spill] sm:$0xff] }
 0x1ec   : > { %2835 = vst.msk [vmem:[%s5001_s6 + $0x34] sm:$0xf] %vm2821_vm3, %v3146_v26  ;;  %v3151_v63 = vpack.c.bf16 %v2679_v51, %v2679_v51  ;;  %v2677_v16 = vmax.f32 %v2645_v19, 0.0  ;;  %v2648_v38 = vadd.f32 %v4981_v18, %v2609_v37  ;;  %v2392_v31 = vadd.f32 %v3605_v62, %v2169_v43  ;;  %v5359_v19 = vld [vmem:[#allocation32_spill] sm:$0xff]  ;;  %v5367_v6 = vld [vmem:[#allocation43_spill] sm:$0xff] }
 0x1ed   : > { %v3642_v53 = vpop.f32.mrf.mxu0  ;;  %v2607_v40 = vadd.f32 %v2530_v35, %v2387_v33  ;;  %v2323_v9 = vpop.f32.mrf.mxu1  ;;  %v1961_v35 = vadd.f32 %v5354_v12, %v5353_v27  ;;  %v2173_v50 = vadd.f32 %v5355_v34, %v1960_v55  ;;  %v1959_v43 = vadd.f32 %v5358_v1, %v5357_v49 }
 0x1ee   : > { %2840 = vst.msk [vmem:[%s5001_s6 + $0x48] sm:$0xf] %vm2821_vm3, %v3151_v63  ;;  %v3149_v21 = vpack.c.bf16 %v2677_v16, %v2677_v16  ;;  %v2680_v32 = vmax.f32 %v2648_v38, 0.0  ;;  %v2612_v14 = vadd.f32 %v3641_v30, %v2392_v31  ;;  %v2390_v60 = vadd.f32 %v2323_v9, %v2167_v8  ;;  %v5356_v30 = vld [vmem:[#allocation30_spill] sm:$0xff] }
 0x1ef   : > { %v2546_v39 = vpop.f32.mrf.mxu0  ;;  %v2646_v15 = vadd.f32 %v4981_v18, %v2607_v40  ;;  %v3606_v57 = vpop.f32.mrf.mxu1  ;;  %v2171_v48 = vadd.f32 %v5356_v30, %v1958_v13  ;;  %v2174_v37 = vadd.f32 %v5359_v19, %v1961_v35  ;;  %v5362_v38 = vld [vmem:[#allocation34_spill] sm:$0xff]  ;;  %v1965_v55 = vadd.f32 %v5367_v6, %v5366_v56 }
 0x1f0   : > { %2838 = vst.msk [vmem:[%s5001_s6 + $0x40] sm:$0xf] %vm2821_vm3, %v3149_v21  ;;  %v3152_v52 = vpack.c.bf16 %v2680_v32, %v2680_v32  ;;  %v2651_v28 = vadd.f32 %v4981_v18, %v2612_v14  ;;  %v2610_v46 = vadd.f32 %v2543_v10, %v2390_v60  ;;  %v2393_v2 = vadd.f32 %v3606_v57, %v2170_v24  ;;  %v5360_v10 = vld [vmem:[#allocation12_spill] sm:$0xff] }
 0x1f1   : > { %v3645_v42 = vpop.f32.mrf.mxu0  ;;  %v2678_v17 = vmax.f32 %v2646_v15, 0.0  ;;  %v2326_v25 = vpop.f32.mrf.mxu1  ;;  %v1964_v8 = vadd.f32 %v5361_v29, %v5360_v10  ;;  %v2172_v31 = vadd.f32 %v5362_v38, %v1959_v43  ;;  %v5363_v14 = vld [vmem:[#allocation36_spill] sm:$0xff]  ;;  %v5372_v43 = vld [vmem:[#allocation42_spill] sm:$0xff] }
 0x1f2   : > { %2841 = vst.msk [vmem:[%s5001_s6 + $0x4c] sm:$0xf] %vm2821_vm3, %v3152_v52  ;;  %v2683_v3 = vmax.f32 %v2651_v28, 0.0  ;;  %v2649_v11 = vadd.f32 %v4981_v18, %v2610_v46  ;;  %v2613_v44 = vadd.f32 %v3642_v53, %v2393_v2  ;;  %v2391_v0 = vadd.f32 %v2326_v25, %v2168_v4  ;;  %v5368_v28 = vld [vmem:[#allocation15_spill] sm:$0xff]  ;;  %v5369_v46 = vld [vmem:[#allocation44_spill] sm:$0xff] }
 0x1f3   : > { %v2559_v41 = vpop.f32.mrf.mxu0  ;;  %v3150_v45 = vpack.c.bf16 %v2678_v17, %v2678_v17  ;;  %v3609_v59 = vpop.f32.mrf.mxu1  ;;  %v2177_v60 = vadd.f32 %v5363_v14, %v1964_v8  ;;  %v1963_v2 = vadd.f32 %v5369_v46, %v5368_v28 }
 0x1f4   : > { %v3155_v61 = vpack.c.bf16 %v2683_v3, %v2683_v3  ;;  %v2681_v7 = vmax.f32 %v2649_v11, 0.0  ;;  %v2652_v54 = vadd.f32 %v4981_v18, %v2613_v44  ;;  %v2611_v26 = vadd.f32 %v2546_v39, %v2391_v0  ;;  %v5364_v39 = vld [vmem:[#allocation13_spill] sm:$0xff]  ;;  %v5370_v11 = vld [vmem:[#allocation38_spill] sm:$0xff]  ;;  %v5371_v0 = vld [vmem:[#allocation40_spill] sm:$0xff] }
 0x1f5   : > { %v3646_v51 = vpop.f32.mrf.mxu0  ;;  %2839 = vst.msk [vmem:[%s5001_s6 + $0x44] sm:$0xf] %vm2821_vm3, %v3150_v45  ;;  %v2396_v58 = vadd.f32 %v3609_v59, %v2173_v50  ;;  %v2339_v47 = vpop.f32.mrf.mxu1  ;;  %v1962_v4 = vadd.f32 %v5365_v20, %v5364_v39  ;;  %v2176_v45 = vadd.f32 %v5372_v43, %v1963_v2 }
 0x1f6   : > { %2844 = vst.msk [vmem:[%s5001_s6 + $0x58] sm:$0xf] %vm2821_vm3, %v3155_v61  ;;  %v3153_v36 = vpack.c.bf16 %v2681_v7, %v2681_v7  ;;  %v2684_v33 = vmax.f32 %v2652_v54, 0.0  ;;  %v2650_v62 = vadd.f32 %v4981_v18, %v2611_v26  ;;  %v2394_v63 = vadd.f32 %v2339_v47, %v2171_v48 }
 0x1f7   : > { %v2562_v16 = vpop.f32.mrf.mxu0  ;;  %v2616_v53 = vadd.f32 %v3645_v42, %v2396_v58  ;;  %v3610_v22 = vpop.f32.mrf.mxu1  ;;  %v2175_v44 = vadd.f32 %v5370_v11, %v1962_v4 }
 0x1f8   : > { %2842 = vst.msk [vmem:[%s5001_s6 + $0x50] sm:$0xf] %vm2821_vm3, %v3153_v36  ;;  %v3156_v24 = vpack.c.bf16 %v2684_v33, %v2684_v33  ;;  %v2682_v40 = vmax.f32 %v2650_v62, 0.0  ;;  %v2614_v9 = vadd.f32 %v2559_v41, %v2394_v63  ;;  %v2397_v21 = vadd.f32 %v3610_v22, %v2174_v37 }
 0x1f9   : > { %v3649_v32 = vpop.f32.mrf.mxu0  ;;  %v2655_v23 = vadd.f32 %v4981_v18, %v2616_v53  ;;  %v2342_v5 = vpop.f32.mrf.mxu1  ;;  %v2178_v41 = vadd.f32 %v5371_v0, %v1965_v55 }
 0x1fa   : > { %2845 = vst.msk [vmem:[%s5001_s6 + $0x5c] sm:$0xf] %vm2821_vm3, %v3156_v24  ;;  %v3154_v13 = vpack.c.bf16 %v2682_v40, %v2682_v40  ;;  %v2653_v15 = vadd.f32 %v4981_v18, %v2614_v9  ;;  %v2617_v57 = vadd.f32 %v3646_v51, %v2397_v21  ;;  %v2395_v52 = vadd.f32 %v2342_v5, %v2172_v31 }
 0x1fb   : > { %v2687_v42 = vmax.f32 %v2655_v23, 0.0  ;;  %v3613_v27 = vpop.f32.mrf.mxu1  ;;  %v2575_v12 = vpop.f32.mrf.mxu0 }
 0x1fc   : > { %2843 = vst.msk [vmem:[%s5001_s6 + $0x54] sm:$0xf] %vm2821_vm3, %v3154_v13  ;;  %v2685_v35 = vmax.f32 %v2653_v15, 0.0  ;;  %v2656_v17 = vadd.f32 %v4981_v18, %v2617_v57  ;;  %v2615_v25 = vadd.f32 %v2562_v16, %v2395_v52  ;;  %v2400_v3 = vadd.f32 %v3613_v27, %v2177_v60 }
 0x1fd   : > { %v3159_v34 = vpack.c.bf16 %v2687_v42, %v2687_v42  ;;  %v2355_v50 = vpop.f32.mrf.mxu1  ;;  %v3650_v7 = vpop.f32.mrf.mxu0 }
 0x1fe   : > { %v3157_v30 = vpack.c.bf16 %v2685_v35, %v2685_v35  ;;  %v2688_v48 = vmax.f32 %v2656_v17, 0.0  ;;  %v2654_v49 = vadd.f32 %v4981_v18, %v2615_v25  ;;  %v2620_v1 = vadd.f32 %v3649_v32, %v2400_v3 }
 0x1ff   : > { %2848 = vst.msk [vmem:[%s5001_s6 + $0x68] sm:$0xf] %vm2821_vm3, %v3159_v34  ;;  %v2398_v59 = vadd.f32 %v2355_v50, %v2175_v44  ;;  %v3614_v61 = vpop.f32.mrf.mxu1  ;;  %v2578_v33 = vpop.f32.mrf.mxu0 }
 0x200   : > { %2846 = vst.msk [vmem:[%s5001_s6 + $0x60] sm:$0xf] %vm2821_vm3, %v3157_v30  ;;  %v3160_v54 = vpack.c.bf16 %v2688_v48, %v2688_v48  ;;  %v2686_v26 = vmax.f32 %v2654_v49, 0.0  ;;  %v2659_v51 = vadd.f32 %v4981_v18, %v2620_v1  ;;  %v2401_v19 = vadd.f32 %v3614_v61, %v2178_v41 }
 0x201   : > { %v2618_v37 = vadd.f32 %v2575_v12, %v2398_v59  ;;  %v2358_v10 = vpop.f32.mrf.mxu1 }
 0x202   : > { %2849 = vst.msk [vmem:[%s5001_s6 + $0x6c] sm:$0xf] %vm2821_vm3, %v3160_v54  ;;  %v3158_v29 = vpack.c.bf16 %v2686_v26, %v2686_v26  ;;  %v2691_v8 = vmax.f32 %v2659_v51, 0.0  ;;  %v2621_v58 = vadd.f32 %v3650_v7, %v2401_v19  ;;  %v2399_v47 = vadd.f32 %v2358_v10, %v2176_v45 }
 0x203   : > { %v2657_v36 = vadd.f32 %v4981_v18, %v2618_v37 }
 0x204   : > { %2847 = vst.msk [vmem:[%s5001_s6 + $0x64] sm:$0xf] %vm2821_vm3, %v3158_v29  ;;  %v3163_v62 = vpack.c.bf16 %v2691_v8, %v2691_v8  ;;  %v2660_v63 = vadd.f32 %v4981_v18, %v2621_v58  ;;  %v2619_v16 = vadd.f32 %v2578_v33, %v2399_v47 }
 0x205   : > { %v2689_v38 = vmax.f32 %v2657_v36, 0.0 }
 0x206   : > { %2852 = vst.msk [vmem:[%s5001_s6 + $0x78] sm:$0xf] %vm2821_vm3, %v3163_v62  ;;  %v2692_v31 = vmax.f32 %v2660_v63, 0.0  ;;  %v2658_v53 = vadd.f32 %v4981_v18, %v2619_v16 }
 0x207   : > { %v3161_v22 = vpack.c.bf16 %v2689_v38, %v2689_v38 }
 0x208   : > { %v3164_v24 = vpack.c.bf16 %v2692_v31, %v2692_v31  ;;  %v2690_v40 = vmax.f32 %v2658_v53, 0.0 }
 0x209   : > { %2850 = vst.msk [vmem:[%s5001_s6 + $0x70] sm:$0xf] %vm2821_vm3, %v3161_v22 }
 0x20a   : > { %2853 = vst.msk [vmem:[%s5001_s6 + $0x7c] sm:$0xf] %vm2821_vm3, %v3164_v24  ;;  %v3162_v9 = vpack.c.bf16 %v2690_v40, %v2690_v40 }
 0x20c   : > { %2851 = vst.msk [vmem:[%s5001_s6 + $0x74] sm:$0xf] %vm2821_vm3, %v3162_v9 }
 0x20d PF: > { %s13_s12 = sadd.s32 1, %s3724_s12  }
 0x20e   : > { %p10_p4 = scmp.ge.s32.totalorder %s13_s12, 4  }
 0x210   :  { %12 = sbr.rel (!%p10_p4) target bundleno = 1 (0x1), region = 62 }

// kernel: fwd.6
= control target key start
LH: loop header
LB: loop body
LE: loop exit
PB: predicated region body
PF: predicated region fallthrough
CT: control target
= control target key end

     0   :  { %s3988_s15 = smov 0   ;;  %s5560_s0 = inlined_call_operand.vmem [shape: bf16[2,18,18,32], index: 0, kind: input, shape index: {}]   ;;  %s5561_s1 = inlined_call_operand.vmem [shape: bf16[288,32], index: 1, kind: input, shape index: {}]   ;;  %s5562_s2 = inlined_call_operand.vmem [shape: f32[1,32], index: 2, kind: input, shape index: {}]   ;;  %s5563_s3 = inlined_call_operand.vmem [shape: bf16[2,16,16,32], index: 3, kind: input, shape index: {}]   ;;  %s5564_s4 = inlined_call_operand.vmem [shape: bf16[2,16,16,32], index: 4, kind: output, shape index: {}]  }
   0x1 LB: > { %s3064_s16 = sadd.s32 4294967295, %s3961_s15   ;;  %p3068_p0 = scmp.ge.s32.totalorder %s3961_s15, 1  ;;  %s3961_s15 = sphi %s3988_s15, %s14_s15  }
   0x2   : > { %p172_p1 = scmp.lt.s32.totalorder %s3961_s15, 3 }
   0x4   : > { %p173_p2 = pnand %p3068_p0, %p172_p1 }
   0x6   : > { %176 = sbr.rel (%p173_p2) target bundleno = 531 (0x213), region = 36 }
   0xb   : > { %v3901_v0 = vld [vmem:[%s5561_s1 + $0x18] sm:$0xff]   ;;  %p203_p3 = scmp.lt.s32.totalorder %s3064_s16, 1  ;;  %v3902_v1 = vld [vmem:[%s5561_s1 + $0x10] sm:$0xff]   ;;  %v4007_v2 = vld [vmem:[%s5561_s1 + $0x8] sm:$0xff]   ;;  %vm395_vm0 = vcmask 1046528   ;;  %vm540_vm1 = vcmask 261120  }
   0xc   : > { %3888 = vmatprep.subr.bf16.mxu1 %v3901_v0  ;;  %3564 = vmatprep.subr.bf16.mxu0 %v3901_v0  ;;  %v4013_v3 = vld [vmem:[%s5561_s1 + $0x28] sm:$0xff]   ;;  %v3907_v54 = vld [vmem:[%s5561_s1 + $0x20] sm:$0xff]   ;;  %vm971_vm2 = vcmask 1045504   ;;  %vm2964_vm3 = vcmask 257024  }
   0xd   : > { %s5811_s16 = smov (!%p203_p3, %s3064_s16), 1  ;;  %3890 = vmatpush3.bf16.msra.mxu1 %v3901_v0  ;;  %3565 = vmatpush3.bf16.msra.mxu0 %v3901_v0 }
   0xe   : > { %3889 = vmatprep.subr.bf16.mxu1 %v3902_v1  ;;  %3566 = vmatprep.subr.bf16.mxu0 %v3902_v1  ;;  %s3892_s23 = smul.u32 216, %s5811_s16 }
  0x10   : > { %s4018_s28 = scalar_lea.vmem %s5560_s0, %s3892_s23 }
  0x11   : > { %3891 = vmatpush3.bf16.msra.mxu1 %v3902_v1  ;;  %3567 = vmatpush3.bf16.msra.mxu0 %v3902_v1  ;;  %v4021_v4 = vld [vmem:[%s4018_s28] sm:$0xff]   ;;  %v221_v5 = vld [vmem:[%s4018_s28 + $0x8] sm:$0x1]  ;;  %v4035_v12 = vld [vmem:[%s4018_s28 + $0xc] sm:$0xff]  }
  0x12   : > { %v4025_v6 = vld [vmem:[%s4018_s28 + $0x60] sm:$0xff]   ;;  %v273_v7 = vunpack.c.l.bf16 %v4021_v4  ;;  %v274_v8 = vunpack.c.h.bf16 %v4021_v4  ;;  %v275_v9 = vunpack.c.l.bf16 %v221_v5  ;;  %v4030_v10 = vld [vmem:[%s4018_s28 + $0x68] sm:$0x1]  ;;  %3600 = vmatprep.subr.bf16.mxu1 %v4007_v2  ;;  %3636 = vmatprep.subr.bf16.mxu0 %v4013_v3  ;;  %v4041_v15 = vld [vmem:[%s4018_s28 + $0x14] sm:$0x1]  ;;  %v276_v16 = vunpack.c.l.bf16 %v4035_v12 }
  0x13   : > { %v5579_v11 = vunpack.c.l.bf16 %v4025_v6  ;;  %v5578_v13 = vunpack.c.h.bf16 %v4025_v6  ;;  %v5574_v14 = vunpack.c.l.bf16 %v4030_v10  ;;  %v277_v20 = vunpack.c.h.bf16 %v4035_v12  ;;  %v4057_v28 = vld [vmem:[%s4018_s28 + $0x6c] sm:$0xff]   ;;  %v4063_v33 = vld [vmem:[%s4018_s28 + $0x74] sm:$0x1]  ;;  %v4071_v38 = vld [vmem:[%s4018_s28 + $0x18] sm:$0xff]  }
  0x14   : > { %v396_v17 = vrot.slane %v273_v7, 1  ;;  %v397_v18 = vrot.slane %v274_v8, 1  ;;  %v399_v19 = vrot.slane %v275_v9, 1  ;;  %v4045_v21 = vrot.slane %v273_v7, 2  ;;  %v4082_v43 = vld [vmem:[%s4018_s28 + $0x20] sm:$0x1] }
  0x15   : > { %v436_v22 = vrot.slane %v5579_v11, 1  ;;  %v437_v23 = vrot.slane %v5578_v13, 1  ;;  %v439_v26 = vrot.slane %v5574_v14, 1  ;;  %v5599_v27 = vunpack.c.l.bf16 %v4041_v15  ;;  %v4085_v44 = vld [vmem:[%s4018_s28 + $0x78] sm:$0xff]   ;;  %v4092_v49 = vld [vmem:[%s4018_s28 + $0x80] sm:$0x1] }
  0x16   : > { %v398_v24 = vsel %vm395_vm0, %v396_v17, %v397_v18  ;;  %v400_v25 = vsel %vm395_vm0, %v397_v18, %v399_v19  ;;  %v4059_v30 = vrot.slane %v274_v8, 2  ;;  %v401_v32 = vrot.slane %v276_v16, 1  ;;  %v4112_v59 = vld [vmem:[%s4018_s28 + $0x24] sm:$0xff]   ;;  %v4123_v0 = vld [vmem:[%s4018_s28 + $0x2c] sm:$0x1]  ;;  %v4142_v18 = vld [vmem:[%s4018_s28 + $0x30] sm:$0xff]  }
  0x17   : > { %v508_v29 = vpack.c.bf16 %v400_v25, %v398_v24  ;;  %v438_v31 = vsel %vm395_vm0, %v436_v22, %v437_v23  ;;  %v4065_v34 = vrot.slane %v275_v9, 2  ;;  %v440_v35 = vsel %vm395_vm0, %v437_v23, %v439_v26  ;;  %v3906_v1 = vld [vmem:[%s5561_s1] sm:$0xff]   ;;  %v4139_v17 = vld [vmem:[%s4018_s28 + $0x8c] sm:$0x1]  ;;  %v4152_v23 = vld [vmem:[%s4018_s28 + $0x38] sm:$0x1] }
  0x18   : > { %v402_v36 = vrot.slane %v277_v20, 1  ;;  %v404_v37 = vrot.slane %v5599_v27, 1  ;;  %v4074_v39 = vpack.c.bf16 %v440_v35, %v438_v31  ;;  %v4076_v40 = vrot.slane %v276_v16, 2  ;;  %v4136_v16 = vld [vmem:[%s4018_s28 + $0x84] sm:$0xff]   ;;  %v4268_v13 = vld [vmem:[%s4018_s28 + $0x50] sm:$0x1] }
  0x19   : > { %3568 = vmatprep.mubr.msk.bf16.mxu0 %vm540_vm1, %v508_v29  ;;  %v4078_v41 = vrot.slane %v277_v20, 2  ;;  %v5573_v42 = vunpack.c.l.bf16 %v4057_v28  ;;  %v5572_v47 = vunpack.c.h.bf16 %v4057_v28  ;;  %v5571_v48 = vunpack.c.l.bf16 %v4063_v33  ;;  %v4161_v31 = vld [vmem:[%s5561_s1 + $0x48] sm:$0xff]  }
  0x1a   : > { %v403_v45 = vsel %vm395_vm0, %v401_v32, %v402_v36  ;;  %v405_v46 = vsel %vm395_vm0, %v402_v36, %v404_v37  ;;  %3584 = vmatprep.mubr.msk.bf16.mxu1 %vm540_vm1, %v4074_v39  ;;  %v5598_v52 = vunpack.c.l.bf16 %v4071_v38  ;;  %v5596_v53 = vunpack.c.h.bf16 %v4071_v38  ;;  %v4271_v11 = vld [vmem:[%s4018_s28 + $0xa8] sm:$0xff]  }
  0x1b   : > { %v4096_v50 = vpack.c.bf16 %v405_v46, %v403_v45  ;;  %v441_v51 = vrot.slane %v5573_v42, 1  ;;  %v442_v55 = vrot.slane %v5572_v47, 1  ;;  %v444_v56 = vrot.slane %v5571_v48, 1  ;;  %v4171_v45 = vld [vmem:[%s4018_s28 + $0x90] sm:$0xff]  }
  0x1c   : > { %v5592_v57 = vunpack.c.l.bf16 %v4082_v43  ;;  %v5567_v58 = vunpack.c.l.bf16 %v4085_v44  ;;  %v406_v60 = vrot.slane %v5598_v52, 1  ;;  %v407_v61 = vrot.slane %v5596_v53, 1  ;;  %v4333_v53 = vld [vmem:[%s4018_s28 + $0xbc] sm:$0x1] }
  0x1d   : > { %3569 = vmatmul.mubr.msk.bf16.vlgmr.msra.gmra.mxu0 %vm540_vm1, %v4096_v50  ;;  %v5566_v62 = vunpack.c.h.bf16 %v4085_v44  ;;  %v5565_v63 = vunpack.c.l.bf16 %v4092_v49  ;;  %v443_v5 = vsel %vm395_vm0, %v441_v51, %v442_v55  ;;  %v445_v7 = vsel %vm395_vm0, %v442_v55, %v444_v56 }
  0x1e   : > { %3637 = vmatpush3.bf16.msra.mxu0 %v4013_v3  ;;  %v409_v8 = vrot.slane %v5592_v57, 1  ;;  %v446_v9 = vrot.slane %v5567_v58, 1  ;;  %v4144_v19 = vpack.c.bf16 %v445_v7, %v443_v5  ;;  %v408_v20 = vsel %vm395_vm0, %v406_v60, %v407_v61  ;;  %v4183_v60 = vld [vmem:[%s4018_s28 + $0x98] sm:$0x1]  ;;  %v4228_v58 = vld [vmem:[%s4018_s28 + $0xa4] sm:$0x1] }
  0x1f   : > { %v447_v3 = vrot.slane %v5566_v62, 1  ;;  %v449_v22 = vrot.slane %v5565_v63, 1  ;;  %3638 = vmatprep.subr.bf16.mxu0 %v3907_v54  ;;  %v5591_v25 = vunpack.c.l.bf16 %v4112_v59  ;;  %v5590_v26 = vunpack.c.h.bf16 %v4112_v59  ;;  %v4306_v57 = vld [vmem:[%s4018_s28 + $0x5c] sm:$0x1] }
  0x20   : > { %v410_v24 = vsel %vm395_vm0, %v407_v61, %v409_v8  ;;  %v5589_v29 = vunpack.c.l.bf16 %v4123_v0  ;;  %3585 = vmatmul.mubr.msk.bf16.vlgmr.msra.gmra.mxu1 %vm540_vm1, %v4144_v19  ;;  %v5570_v37 = vunpack.c.l.bf16 %v4136_v16  ;;  %v4186_v61 = vld [vmem:[%s4018_s28 + $0x3c] sm:$0xff]   ;;  %v5568_v5 = vunpack.c.l.bf16 %v4139_v17 }
  0x21   : > { %v4165_v32 = vpack.c.bf16 %v410_v24, %v408_v20  ;;  %v448_v35 = vsel %vm395_vm0, %v446_v9, %v447_v3  ;;  %v450_v36 = vsel %vm395_vm0, %v447_v3, %v449_v22  ;;  %3601 = vmatpush3.bf16.msra.mxu1 %v4007_v2  ;;  %v411_v51 = vrot.slane %v5591_v25, 1  ;;  %v4198_v9 = vld [vmem:[%s5561_s1 + $0x38] sm:$0xff]  }
  0x22   : > { %v4174_v46 = vpack.c.bf16 %v450_v36, %v448_v35  ;;  %v412_v55 = vrot.slane %v5590_v26, 1  ;;  %v414_v56 = vrot.slane %v5589_v29, 1  ;;  %3639 = vmatpush3.bf16.msra.mxu0 %v3907_v54  ;;  %v5569_v2 = vunpack.c.h.bf16 %v4136_v16  ;;  %3602 = vmatprep.subr.bf16.mxu1 %v3906_v1 }
  0x23   : > { %3572 = vmatprep.mubr.msk.bf16.mxu0 %vm540_vm1, %v4165_v32  ;;  %v451_v7 = vrot.slane %v5570_v37, 1  ;;  %v5587_v8 = vunpack.c.l.bf16 %v4142_v18  ;;  %v5583_v3 = vunpack.c.h.bf16 %v4142_v18  ;;  %v5581_v22 = vunpack.c.l.bf16 %v4152_v23  ;;  %3708 = vmatprep.subr.bf16.mxu0 %v4161_v31 }
  0x24   : > { %3588 = vmatprep.mubr.msk.bf16.mxu1 %vm540_vm1, %v4174_v46  ;;  %v413_v54 = vsel %vm395_vm0, %v411_v51, %v412_v55  ;;  %v415_v20 = vsel %vm395_vm0, %v412_v55, %v414_v56  ;;  %v452_v35 = vrot.slane %v5569_v2, 1  ;;  %v454_v36 = vrot.slane %v5568_v5, 1  ;;  %v4216_v51 = vld [vmem:[%s4018_s28 + $0x44] sm:$0x1]  ;;  %v4219_v55 = vld [vmem:[%s4018_s28 + $0x9c] sm:$0xff]  }
  0x25   : > { %v4207_v24 = vpack.c.bf16 %v415_v20, %v413_v54  ;;  %v416_v63 = vrot.slane %v5587_v8, 1  ;;  %v417_v56 = vrot.slane %v5583_v3, 1  ;;  %v419_v54 = vrot.slane %v5581_v22, 1  ;;  %3603 = vmatpush3.bf16.msra.mxu1 %v3906_v1  ;;  %v4296_v8 = vld [vmem:[%s4018_s28 + $0x54] sm:$0xff]  }
  0x26   : > { %v5577_v20 = vunpack.c.l.bf16 %v4171_v45  ;;  %v5576_v62 = vunpack.c.h.bf16 %v4171_v45  ;;  %v453_v5 = vsel %vm395_vm0, %v451_v7, %v452_v35  ;;  %v455_v2 = vsel %vm395_vm0, %v452_v35, %v454_v36  ;;  %3672 = vmatprep.subr.bf16.mxu1 %v4198_v9 }
  0x27   : > { %3573 = vmatmul.mubr.msk.bf16.gmra.mxu0 %vm540_vm1, %v4207_v24  ;;  %v5575_v37 = vunpack.c.l.bf16 %v4183_v60  ;;  %v5580_v48 = vunpack.c.l.bf16 %v4186_v61  ;;  %v4237_v47 = vpack.c.bf16 %v455_v2, %v453_v5  ;;  %v418_v42 = vsel %vm395_vm0, %v416_v63, %v417_v56 }
  0x28   : > { %v420_v1 = vsel %vm395_vm0, %v417_v56, %v419_v54  ;;  %v456_v14 = vrot.slane %v5577_v20, 1  ;;  %v457_v35 = vrot.slane %v5576_v62, 1  ;;  %v5582_v2 = vunpack.c.h.bf16 %v4186_v61  ;;  %v4258_v54 = vld [vmem:[%s4018_s28 + $0x48] sm:$0xff]  }
  0x29   : > { %v4243_v7 = vpack.c.bf16 %v420_v1, %v418_v42  ;;  %v459_v36 = vrot.slane %v5575_v37, 1  ;;  %3589 = vmatmul.mubr.msk.bf16.gmra.mxu1 %vm540_vm1, %v4237_v47  ;;  %v5586_v63 = vunpack.c.l.bf16 %v4216_v51  ;;  %v421_v5 = vrot.slane %v5580_v48, 1 }
  0x2a   : > { %v5584_v42 = vunpack.c.l.bf16 %v4219_v55  ;;  %v5585_v56 = vunpack.c.h.bf16 %v4219_v55  ;;  %v458_v1 = vsel %vm395_vm0, %v456_v14, %v457_v35  ;;  %v422_v62 = vrot.slane %v5582_v2, 1 }
  0x2b   : > { %3576 = vmatprep.mubr.msk.bf16.mxu0 %vm540_vm1, %v4243_v7  ;;  %v460_v37 = vsel %vm395_vm0, %v457_v35, %v459_v36  ;;  %v5588_v20 = vunpack.c.l.bf16 %v4228_v58  ;;  %v424_v22 = vrot.slane %v5586_v63, 1  ;;  %v5595_v3 = vunpack.c.l.bf16 %v4258_v54 }
  0x2c   : > { %v4273_v48 = vpack.c.bf16 %v460_v37, %v458_v1  ;;  %v461_v14 = vrot.slane %v5584_v42, 1  ;;  %v462_v35 = vrot.slane %v5585_v56, 1  ;;  %v423_v36 = vsel %vm395_vm0, %v421_v5, %v422_v62  ;;  %v4287_v1 = vld [vmem:[%s4018_s28 + $0xb0] sm:$0x1] }
  0x2d   : > { %v464_v2 = vrot.slane %v5588_v20, 1  ;;  %v5594_v37 = vunpack.c.h.bf16 %v4258_v54  ;;  %v425_v42 = vsel %vm395_vm0, %v422_v62, %v424_v22  ;;  %v5593_v63 = vunpack.c.l.bf16 %v4268_v13 }
  0x2e   : > { %3592 = vmatprep.mubr.msk.bf16.mxu1 %vm540_vm1, %v4273_v48  ;;  %v463_v56 = vsel %vm395_vm0, %v461_v14, %v462_v35  ;;  %v5597_v5 = vunpack.c.l.bf16 %v4271_v11  ;;  %v4298_v20 = vpack.c.bf16 %v425_v42, %v423_v36  ;;  %v426_v26 = vrot.slane %v5595_v3, 1  ;;  %v4315_v36 = vld [vmem:[%s4018_s28 + $0xb4] sm:$0xff]  }
  0x2f   : > { %v465_v29 = vsel %vm395_vm0, %v462_v35, %v464_v2  ;;  %v427_v25 = vrot.slane %v5594_v37, 1  ;;  %v429_v22 = vrot.slane %v5593_v63, 1  ;;  %v5600_v14 = vunpack.c.h.bf16 %v4271_v11 }
  0x30   : > { %v4308_v62 = vpack.c.bf16 %v465_v29, %v463_v56  ;;  %v5601_v42 = vunpack.c.l.bf16 %v4287_v1  ;;  %3577 = vmatmul.mubr.msk.bf16.gmra.mxu0 %vm540_vm1, %v4298_v20  ;;  %v466_v35 = vrot.slane %v5597_v5, 1  ;;  %v5605_v29 = vunpack.c.l.bf16 %v4296_v8 }
  0x31   : > { %v428_v2 = vsel %vm395_vm0, %v426_v26, %v427_v25  ;;  %v5604_v56 = vunpack.c.h.bf16 %v4296_v8  ;;  %v430_v63 = vsel %vm395_vm0, %v427_v25, %v429_v22  ;;  %v467_v37 = vrot.slane %v5600_v14, 1 }
  0x32   : > { %5615 = vst [vmem:[#allocation2_spill] sm:$0xff] %v4308_v62  ;;  %3593 = vmatmul.mubr.msk.bf16.gmra.mxu1 %vm540_vm1, %v4308_v62  ;;  %v469_v3 = vrot.slane %v5601_v42, 1  ;;  %v5606_v26 = vunpack.c.l.bf16 %v4306_v57  ;;  %v4335_v5 = vpack.c.bf16 %v430_v63, %v428_v2  ;;  %v431_v52 = vrot.slane %v5605_v29, 1 }
  0x33   : > { %v432_v27 = vrot.slane %v5604_v56, 1  ;;  %v5608_v25 = vunpack.c.l.bf16 %v4315_v36  ;;  %v468_v22 = vsel %vm395_vm0, %v466_v35, %v467_v37  ;;  %v5607_v62 = vunpack.c.h.bf16 %v4315_v36 }
  0x34   : > { %v470_v14 = vsel %vm395_vm0, %v467_v37, %v469_v3  ;;  %v434_v42 = vrot.slane %v5606_v26, 1  ;;  %3580 = vmatprep.mubr.msk.bf16.mxu0 %vm540_vm1, %v4335_v5  ;;  %v5609_v56 = vunpack.c.l.bf16 %v4333_v53  ;;  %v5616_v35 = vunpack.c.l.bf16 %v4041_v15 }
  0x35   : > { %v4349_v63 = vpack.c.bf16 %v470_v14, %v468_v22  ;;  %v433_v2 = vsel %vm395_vm0, %v431_v52, %v432_v27  ;;  %v471_v29 = vrot.slane %v5608_v25, 1  ;;  %v472_v26 = vrot.slane %v5607_v62, 1 }
  0x36   : > { %v980_v3 = vrot.slane %v5616_v35, 2  ;;  %v435_v37 = vsel %vm395_vm0, %v432_v27, %v434_v42  ;;  %v974_v14 = vsel %vm971_vm2, %v4045_v21, %v4059_v30  ;;  %v474_v22 = vrot.slane %v5609_v56, 1 }
  0x37   : > { %3596 = vmatprep.mubr.msk.bf16.mxu1 %vm540_vm1, %v4349_v63  ;;  %v4365_v52 = vpack.c.bf16 %v435_v37, %v433_v2  ;;  %v976_v15 = vsel %vm971_vm2, %v4059_v30, %v4065_v34  ;;  %v473_v27 = vsel %vm395_vm0, %v471_v29, %v472_v26  ;;  %v5617_v35 = vunpack.c.l.bf16 %v4071_v38 }
  0x38   : > { %v1084_v42 = vpack.c.bf16 %v976_v15, %v974_v14  ;;  %v475_v21 = vsel %vm395_vm0, %v472_v26, %v474_v22  ;;  %v5618_v2 = vunpack.c.h.bf16 %v4071_v38  ;;  %v979_v30 = vsel %vm971_vm2, %v4076_v40, %v4078_v41 }
  0x39   : > { %3581 = vmatmul.mubr.msk.bf16.gmra.mxu0 %vm540_vm1, %v4365_v52  ;;  %v982_v62 = vrot.slane %v5617_v35, 2  ;;  %v4380_v25 = vpack.c.bf16 %v475_v21, %v473_v27  ;;  %v981_v34 = vsel %vm971_vm2, %v4078_v41, %v980_v3  ;;  %v5619_v29 = vunpack.c.l.bf16 %v4082_v43 }
  0x3a   : > { %v983_v37 = vrot.slane %v5618_v2, 2  ;;  %3640 = vmatprep.mubr.msk.bf16.mxu0 %vm540_vm1, %v1084_v42  ;;  %v5620_v15 = vunpack.c.l.bf16 %v4112_v59  ;;  %v5621_v42 = vunpack.c.h.bf16 %v4112_v59  ;;  %v5622_v40 = vunpack.c.l.bf16 %v4123_v0  ;;  %v3920_v0 = vld [vmem:[%s5561_s1 + $0x40] sm:$0xff]  }
  0x3b   : > { %v985_v26 = vrot.slane %v5619_v29, 2  ;;  %3597 = vmatmul.mubr.msk.bf16.gmra.mxu1 %vm540_vm1, %v4380_v25  ;;  %v4402_v41 = vpack.c.bf16 %v981_v34, %v979_v30  ;;  %v5623_v43 = vunpack.c.l.bf16 %v4142_v18  ;;  %v5624_v3 = vunpack.c.h.bf16 %v4142_v18 }
  0x3c   : > { %v984_v14 = vsel %vm971_vm2, %v982_v62, %v983_v37  ;;  %v987_v27 = vrot.slane %v5620_v15, 2  ;;  %v988_v21 = vrot.slane %v5621_v42, 2  ;;  %v990_v35 = vrot.slane %v5622_v40, 2  ;;  %3604 = vmatprep.mubr.msk.bf16.mxu1 %vm540_vm1, %v4021_v4 }
  0x3d   : > { %v986_v22 = vsel %vm971_vm2, %v983_v37, %v985_v26  ;;  %v992_v62 = vrot.slane %v5623_v43, 2  ;;  %v993_v2 = vrot.slane %v5624_v3, 2  ;;  %v5625_v37 = vunpack.c.l.bf16 %v4152_v23  ;;  %v3918_v23 = vld [vmem:[%s5561_s1 + $0x30] sm:$0xff]  }
  0x3e   : > { %v4410_v26 = vpack.c.bf16 %v986_v22, %v984_v14  ;;  %v989_v15 = vsel %vm971_vm2, %v987_v27, %v988_v21  ;;  %v991_v4 = vsel %vm971_vm2, %v988_v21, %v990_v35  ;;  %v5626_v22 = vunpack.c.l.bf16 %v4186_v61 }
  0x3f   : > { %v995_v29 = vrot.slane %v5625_v37, 2  ;;  %v994_v30 = vsel %vm971_vm2, %v992_v62, %v993_v2  ;;  %v4427_v14 = vpack.c.bf16 %v991_v4, %v989_v15  ;;  %v5627_v42 = vunpack.c.l.bf16 %v4025_v6 }
  0x40   : > { %v997_v27 = vrot.slane %v5626_v22, 2  ;;  %v5628_v35 = vunpack.c.h.bf16 %v4186_v61  ;;  %v5629_v62 = vunpack.c.h.bf16 %v4025_v6  ;;  %v5632_v4 = vunpack.c.l.bf16 %v4057_v28 }
  0x41   : > { %3641 = vmatmul.mubr.msk.bf16.vlgmr.msra.gmra.mxu0 %vm540_vm1, %v4402_v41  ;;  %v996_v34 = vsel %vm971_vm2, %v993_v2, %v995_v29  ;;  %v1012_v21 = vrot.slane %v5627_v42, 2  ;;  %v5630_v2 = vunpack.c.l.bf16 %v4030_v10  ;;  %v5631_v29 = vunpack.c.l.bf16 %v4216_v51 }
  0x42   : > { %3709 = vmatpush3.bf16.msra.mxu0 %v4161_v31  ;;  %3644 = vmatprep.mubr.msk.bf16.mxu0 %vm540_vm1, %v4410_v26  ;;  %v4436_v31 = vld [vmem:[%s5561_s1 + $0x68] sm:$0xff]   ;;  %v4440_v40 = vpack.c.bf16 %v996_v34, %v994_v30  ;;  %v998_v43 = vrot.slane %v5628_v35, 2  ;;  %v1013_v3 = vrot.slane %v5629_v62, 2  ;;  %v1017_v30 = vrot.slane %v5632_v4, 2 }
  0x43   : > { %3710 = vmatprep.subr.bf16.mxu0 %v3920_v0  ;;  %3605 = vmatmul.mubr.msk.bf16.vlgmr.msra.gmra.mxu1 %vm540_vm1, %v4035_v12  ;;  %v1015_v37 = vrot.slane %v5630_v2, 2  ;;  %v1000_v15 = vrot.slane %v5631_v29, 2  ;;  %v5633_v34 = vunpack.c.h.bf16 %v4057_v28  ;;  %v5634_v42 = vunpack.c.l.bf16 %v4063_v33  ;;  %v4468_v29 = vld [vmem:[%s5561_s1 + $0x58] sm:$0xff]  }
  0x44   : > { %3673 = vmatpush3.bf16.msra.mxu1 %v4198_v9  ;;  %3608 = vmatprep.mubr.msk.bf16.mxu1 %vm540_vm1, %v4071_v38  ;;  %v5635_v10 = vunpack.c.l.bf16 %v4258_v54  ;;  %v5636_v9 = vunpack.c.h.bf16 %v4258_v54  ;;  %v1014_v56 = vsel %vm971_vm2, %v1012_v21, %v1013_v3  ;;  %v5637_v33 = vunpack.c.l.bf16 %v4268_v13 }
  0x45   : > { %v1018_v22 = vrot.slane %v5633_v34, 2  ;;  %v1020_v35 = vrot.slane %v5634_v42, 2  ;;  %v1016_v51 = vsel %vm971_vm2, %v1013_v3, %v1015_v37  ;;  %3674 = vmatprep.subr.bf16.mxu1 %v3918_v23  ;;  %v5639_v13 = vunpack.c.h.bf16 %v4136_v16 }
  0x46   : > { %v1002_v62 = vrot.slane %v5635_v10, 2  ;;  %v1003_v2 = vrot.slane %v5636_v9, 2  ;;  %3711 = vmatpush3.bf16.msra.mxu0 %v3920_v0  ;;  %v1005_v4 = vrot.slane %v5637_v33, 2  ;;  %v4472_v34 = vpack.c.bf16 %v1016_v51, %v1014_v56 }
  0x47   : > { %v1019_v42 = vsel %vm971_vm2, %v1017_v30, %v1018_v22  ;;  %v1021_v10 = vsel %vm971_vm2, %v1018_v22, %v1020_v35  ;;  %3780 = vmatprep.subr.bf16.mxu0 %v4436_v31  ;;  %v5638_v0 = vunpack.c.l.bf16 %v4136_v16  ;;  %v1028_v37 = vrot.slane %v5639_v13, 2 }
  0x48   : > { %v4477_v21 = vpack.c.bf16 %v1021_v10, %v1019_v42  ;;  %3675 = vmatpush3.bf16.msra.mxu1 %v3918_v23  ;;  %v5640_v56 = vunpack.c.l.bf16 %v4139_v17  ;;  %v999_v30 = vsel %vm971_vm2, %v997_v27, %v998_v43  ;;  %v1001_v22 = vsel %vm971_vm2, %v998_v43, %v1000_v15 }
  0x49   : > { %v1027_v3 = vrot.slane %v5638_v0, 2  ;;  %3645 = vmatmul.mubr.msk.bf16.gmra.mxu0 %vm540_vm1, %v4427_v14  ;;  %3744 = vmatprep.subr.bf16.mxu1 %v4468_v29  ;;  %v1004_v35 = vsel %vm971_vm2, %v1002_v62, %v1003_v2  ;;  %v1006_v51 = vsel %vm971_vm2, %v1003_v2, %v1005_v4  ;;  %v5641_v42 = vunpack.c.l.bf16 %v4219_v55 }
  0x4a   : > { %v1030_v9 = vrot.slane %v5640_v56, 2  ;;  %3648 = vmatprep.mubr.msk.bf16.mxu0 %vm540_vm1, %v4440_v40  ;;  %v4504_v43 = vpack.c.bf16 %v1001_v22, %v999_v30  ;;  %v5642_v15 = vunpack.c.h.bf16 %v4219_v55  ;;  %v5643_v2 = vunpack.c.l.bf16 %v4228_v58 }
  0x4b   : > { %v1029_v23 = vsel %vm971_vm2, %v1027_v3, %v1028_v37  ;;  %3609 = vmatmul.mubr.msk.bf16.gmra.mxu1 %vm540_vm1, %v4112_v59  ;;  %v1037_v27 = vrot.slane %v5641_v42, 2  ;;  %v4510_v10 = vpack.c.bf16 %v1006_v51, %v1004_v35  ;;  %v5644_v0 = vunpack.c.l.bf16 %v4296_v8 }
  0x4c   : > { %v1031_v33 = vsel %vm971_vm2, %v1028_v37, %v1030_v9  ;;  %3612 = vmatprep.mubr.msk.bf16.mxu1 %vm540_vm1, %v4142_v18  ;;  %v1038_v62 = vrot.slane %v5642_v15, 2  ;;  %v1040_v4 = vrot.slane %v5643_v2, 2  ;;  %v5645_v13 = vunpack.c.h.bf16 %v4296_v8 }
  0x4d   : > { %v4498_v17 = vpack.c.bf16 %v1031_v33, %v1029_v23  ;;  %v1007_v3 = vrot.slane %v5644_v0, 2  ;;  %v5646_v56 = vunpack.c.l.bf16 %v4306_v57  ;;  %v5647_v51 = vunpack.c.l.bf16 %v4085_v44 }
  0x4e   : > { %v1008_v37 = vrot.slane %v5645_v13, 2  ;;  %v1039_v30 = vsel %vm971_vm2, %v1037_v27, %v1038_v62  ;;  %v1041_v22 = vsel %vm971_vm2, %v1038_v62, %v1040_v4  ;;  %v5648_v42 = vunpack.c.h.bf16 %v4085_v44 }
  0x4f   : > { %v1010_v9 = vrot.slane %v5646_v56, 2  ;;  %v4520_v23 = vpack.c.bf16 %v1041_v22, %v1039_v30  ;;  %v1022_v33 = vrot.slane %v5647_v51, 2  ;;  %v5649_v15 = vunpack.c.l.bf16 %v4092_v49 }
  0x50   : > { %v1009_v58 = vsel %vm971_vm2, %v1007_v3, %v1008_v37  ;;  %v1023_v27 = vrot.slane %v5648_v42, 2  ;;  %v5650_v49 = vunpack.c.l.bf16 %v4171_v45  ;;  %v5651_v13 = vunpack.c.h.bf16 %v4171_v45 }
  0x51   : > { %3649 = vmatmul.mubr.msk.bf16.gmra.mxu0 %vm540_vm1, %v4504_v43  ;;  %v1011_v35 = vsel %vm971_vm2, %v1008_v37, %v1010_v9  ;;  %v1025_v62 = vrot.slane %v5649_v15, 2  ;;  %v5652_v56 = vunpack.c.l.bf16 %v4183_v60  ;;  %v5653_v60 = vunpack.c.l.bf16 %v4271_v11 }
  0x52   : > { %3652 = vmatprep.mubr.msk.bf16.mxu0 %vm540_vm1, %v4510_v10  ;;  %v4532_v57 = vpack.c.bf16 %v1011_v35, %v1009_v58  ;;  %v1024_v2 = vsel %vm971_vm2, %v1022_v33, %v1023_v27  ;;  %v1032_v3 = vrot.slane %v5650_v49, 2  ;;  %v1033_v37 = vrot.slane %v5651_v13, 2 }
  0x53   : > { %3613 = vmatmul.mubr.msk.bf16.gmra.mxu1 %vm540_vm1, %v4186_v61  ;;  %v1026_v4 = vsel %vm971_vm2, %v1023_v27, %v1025_v62  ;;  %v1035_v9 = vrot.slane %v5652_v56, 2  ;;  %v1042_v35 = vrot.slane %v5653_v60, 2  ;;  %v5654_v51 = vunpack.c.h.bf16 %v4271_v11  ;;  %v4595_v56 = vld [vmem:[%s4018_s28 + $0xc0] sm:$0xff]  }
  0x54   : > { %3616 = vmatprep.mubr.msk.bf16.mxu1 %vm540_vm1, %v4258_v54  ;;  %v4550_v0 = vpack.c.bf16 %v1026_v4, %v1024_v2  ;;  %v1034_v30 = vsel %vm971_vm2, %v1032_v3, %v1033_v37  ;;  %v5655_v42 = vunpack.c.l.bf16 %v4287_v1  ;;  %v5656_v1 = vunpack.c.l.bf16 %v4315_v36 }
  0x55   : > { %v1036_v22 = vsel %vm971_vm2, %v1033_v37, %v1035_v9  ;;  %v1043_v33 = vrot.slane %v5654_v51, 2  ;;  %v5657_v49 = vunpack.c.h.bf16 %v4315_v36  ;;  %v5658_v13 = vunpack.c.l.bf16 %v4333_v53 }
  0x56   : > { %v4568_v58 = vpack.c.bf16 %v1036_v22, %v1034_v30  ;;  %v1045_v27 = vrot.slane %v5655_v42, 2  ;;  %v1047_v4 = vrot.slane %v5656_v1, 2  ;;  %v269_v22 = vld [vmem:[%s4018_s28 + $0xc8] sm:$0x1]  ;;  %v321_v60 = vunpack.c.l.bf16 %v4595_v56 }
  0x57   : > { %v1044_v15 = vsel %vm971_vm2, %v1042_v35, %v1043_v33  ;;  %v1048_v3 = vrot.slane %v5657_v49, 2  ;;  %v1050_v37 = vrot.slane %v5658_v13, 2  ;;  %v322_v35 = vunpack.c.h.bf16 %v4595_v56 }
  0x58   : > { %v1046_v62 = vsel %vm971_vm2, %v1043_v33, %v1045_v27  ;;  %v1793_v51 = vrot.slane %v321_v60, 2  ;;  %v323_v42 = vunpack.c.l.bf16 %v269_v22  ;;  %v1573_v49 = vrot.slane %v321_v60, 1  ;;  %v3935_v22 = vld [vmem:[%s5561_s1 + $0x80] sm:$0xff]  }
  0x59   : > { %3653 = vmatmul.mubr.msk.bf16.gmra.mxu0 %vm540_vm1, %v4532_v57  ;;  %v4586_v2 = vpack.c.bf16 %v1046_v62, %v1044_v15  ;;  %v1049_v9 = vsel %vm971_vm2, %v1047_v4, %v1048_v3  ;;  %v1051_v30 = vsel %vm971_vm2, %v1048_v3, %v1050_v37  ;;  %v1794_v33 = vrot.slane %v322_v35, 2  ;;  %v3930_v4 = vld [vmem:[%s5561_s1 + $0x60] sm:$0xff]  }
  0x5a   : > { %3656 = vmatprep.mubr.msk.bf16.mxu0 %vm540_vm1, %v4472_v34  ;;  %v4610_v53 = vpack.c.bf16 %v1051_v30, %v1049_v9  ;;  %v1796_v27 = vrot.slane %v323_v42, 2  ;;  %v1574_v3 = vrot.slane %v322_v35, 1  ;;  %v1576_v13 = vrot.slane %v323_v42, 1 }
  0x5b   : > { %3617 = vmatmul.mubr.msk.bf16.gmra.mxu1 %vm540_vm1, %v4296_v8  ;;  %v1795_v15 = vsel %vm971_vm2, %v1793_v51, %v1794_v33 }
  0x5c   : > { %3620 = vmatprep.mubr.msk.bf16.mxu1 %vm540_vm1, %v4025_v6  ;;  %v1797_v62 = vsel %vm971_vm2, %v1794_v33, %v1796_v27  ;;  %v1575_v37 = vsel %vm395_vm0, %v1573_v49, %v1574_v3  ;;  %v1577_v9 = vsel %vm395_vm0, %v1574_v3, %v1576_v13  ;;  %v4795_v27 = vld [vmem:[%s4018_s28 + $0xcc] sm:$0xff]  }
  0x5d   : > { %v4618_v1 = vpack.c.bf16 %v1797_v62, %v1795_v15  ;;  %v4696_v30 = vpack.c.bf16 %v1577_v9, %v1575_v37 }
  0x61   : > { %3657 = vmatmul.mubr.msk.bf16.gmra.mxu0 %vm540_vm1, %v4477_v21 }
  0x62   : > { %3660 = vmatprep.mubr.msk.bf16.mxu0 %vm540_vm1, %v4550_v0 }
  0x63   : > { %3621 = vmatmul.mubr.msk.bf16.gmra.mxu1 %vm540_vm1, %v4057_v28 }
  0x64   : > { %3624 = vmatprep.mubr.msk.bf16.mxu1 %vm540_vm1, %v4085_v44 }
  0x69   : > { %3661 = vmatmul.mubr.msk.bf16.gmra.mxu0 %vm540_vm1, %v4498_v17 }
  0x6a   : > { %3664 = vmatprep.mubr.msk.bf16.mxu0 %vm540_vm1, %v4568_v58 }
  0x6b   : > { %3625 = vmatmul.mubr.msk.bf16.gmra.mxu1 %vm540_vm1, %v4136_v16 }
  0x6c   : > { %3628 = vmatprep.mubr.msk.bf16.mxu1 %vm540_vm1, %v4171_v45 }
  0x71   : > { %3665 = vmatmul.mubr.msk.bf16.gmra.mxu0 %vm540_vm1, %v4520_v23 }
  0x72   : > { %3668 = vmatprep.mubr.msk.bf16.mxu0 %vm540_vm1, %v4586_v2 }
  0x73   : > { %3629 = vmatmul.mubr.msk.bf16.gmra.mxu1 %vm540_vm1, %v4219_v55 }
  0x74   : > { %3632 = vmatprep.mubr.msk.bf16.mxu1 %vm540_vm1, %v4271_v11 }
  0x79   : > { %3669 = vmatmul.mubr.msk.bf16.gmra.mxu0 %vm540_vm1, %v4610_v53 }
  0x7a   : > { %3712 = vmatprep.mubr.msk.bf16.mxu0 %vm540_vm1, %v4096_v50  ;;  %v3929_v50 = vld [vmem:[%s5561_s1 + $0x50] sm:$0xff]  }
  0x7b   : > { %3633 = vmatmul.mubr.msk.bf16.gmra.mxu1 %vm540_vm1, %v4315_v36 }
  0x7c   : > { %3676 = vmatprep.mubr.msk.bf16.mxu1 %vm540_vm1, %v4035_v12  ;;  %v3933_v12 = vld [vmem:[%s5561_s1 + $0x88] sm:$0xff]  }
  0x81   : > { %3713 = vmatmul.mubr.msk.bf16.vlgmr.msra.gmra.mxu0 %vm540_vm1, %v4165_v32 }
  0x82   : > { %3781 = vmatpush3.bf16.msra.mxu0 %v4436_v31  ;;  %3716 = vmatprep.mubr.msk.bf16.mxu0 %vm540_vm1, %v4207_v24  ;;  %v3932_v31 = vld [vmem:[%s5561_s1 + $0x78] sm:$0xff]  }
  0x83   : > { %3782 = vmatprep.subr.bf16.mxu0 %v3930_v4  ;;  %3677 = vmatmul.mubr.msk.bf16.vlgmr.msra.gmra.mxu1 %vm540_vm1, %v4071_v38 }
  0x84   : > { %3745 = vmatpush3.bf16.msra.mxu1 %v4468_v29  ;;  %3680 = vmatprep.mubr.msk.bf16.mxu1 %vm540_vm1, %v4112_v59  ;;  %v5659_v29 = vld [vmem:[#allocation2_spill] sm:$0xff] }
  0x85   : > { %3746 = vmatprep.subr.bf16.mxu1 %v3929_v50  ;;  %5660 = vst [vmem:[#allocation2_spill] sm:$0xff] %v4696_v30 }
  0x86   : > { %3783 = vmatpush3.bf16.msra.mxu0 %v3930_v4 }
  0x87   : > { %3852 = vmatprep.subr.bf16.mxu0 %v3933_v12 }
  0x88   : > { %3747 = vmatpush3.bf16.msra.mxu1 %v3929_v50 }
  0x89   : > { %3717 = vmatmul.mubr.msk.bf16.gmra.mxu0 %vm540_vm1, %v4243_v7  ;;  %3816 = vmatprep.subr.bf16.mxu1 %v3932_v31 }
  0x8a   : > { %3720 = vmatprep.mubr.msk.bf16.mxu0 %vm540_vm1, %v4298_v20 }
  0x8b   : > { %3681 = vmatmul.mubr.msk.bf16.gmra.mxu1 %vm540_vm1, %v4142_v18 }
  0x8c   : > { %3684 = vmatprep.mubr.msk.bf16.mxu1 %vm540_vm1, %v4186_v61 }
  0x91   : > { %3721 = vmatmul.mubr.msk.bf16.gmra.mxu0 %vm540_vm1, %v4335_v5 }
  0x92   : > { %3724 = vmatprep.mubr.msk.bf16.mxu0 %vm540_vm1, %v4365_v52 }
  0x93   : > { %3685 = vmatmul.mubr.msk.bf16.gmra.mxu1 %vm540_vm1, %v4258_v54 }
  0x94   : > { %3688 = vmatprep.mubr.msk.bf16.mxu1 %vm540_vm1, %v4296_v8 }
  0x99   : > { %3725 = vmatmul.mubr.msk.bf16.gmra.mxu0 %vm540_vm1, %v4074_v39 }
  0x9a   : > { %3728 = vmatprep.mubr.msk.bf16.mxu0 %vm540_vm1, %v4144_v19 }
  0x9b   : > { %3689 = vmatmul.mubr.msk.bf16.gmra.mxu1 %vm540_vm1, %v4025_v6 }
  0x9c   : > { %3692 = vmatprep.mubr.msk.bf16.mxu1 %vm540_vm1, %v4057_v28 }
  0xa1   : > { %3729 = vmatmul.mubr.msk.bf16.gmra.mxu0 %vm540_vm1, %v4174_v46 }
  0xa2   : > { %3732 = vmatprep.mubr.msk.bf16.mxu0 %vm540_vm1, %v4237_v47 }
  0xa3   : > { %3693 = vmatmul.mubr.msk.bf16.gmra.mxu1 %vm540_vm1, %v4085_v44 }
  0xa4   : > { %3696 = vmatprep.mubr.msk.bf16.mxu1 %vm540_vm1, %v4136_v16 }
  0xa9   : > { %3733 = vmatmul.mubr.msk.bf16.gmra.mxu0 %vm540_vm1, %v4273_v48 }
  0xaa   : > { %3736 = vmatprep.mubr.msk.bf16.mxu0 %vm540_vm1, %v5659_v29 }
  0xab   : > { %3697 = vmatmul.mubr.msk.bf16.gmra.mxu1 %vm540_vm1, %v4171_v45 }
  0xac   : > { %3700 = vmatprep.mubr.msk.bf16.mxu1 %vm540_vm1, %v4219_v55 }
  0xb1   : > { %3737 = vmatmul.mubr.msk.bf16.gmra.mxu0 %vm540_vm1, %v4349_v63 }
  0xb2   : > { %3740 = vmatprep.mubr.msk.bf16.mxu0 %vm540_vm1, %v4380_v25 }
  0xb3   : > { %3701 = vmatmul.mubr.msk.bf16.gmra.mxu1 %vm540_vm1, %v4271_v11 }
  0xb4   : > { %3704 = vmatprep.mubr.msk.bf16.mxu1 %vm540_vm1, %v4315_v36 }
  0xb9   : > { %3741 = vmatmul.mubr.msk.bf16.gmra.mxu0 %vm540_vm1, %v4696_v30 }
  0xba   : > { %3784 = vmatprep.mubr.msk.bf16.mxu0 %vm540_vm1, %v4071_v38  ;;  %v3934_v38 = vld [vmem:[%s5561_s1 + $0x70] sm:$0xff]  }
  0xbb   : > { %3705 = vmatmul.mubr.msk.bf16.gmra.mxu1 %vm540_vm1, %v4595_v56 }
  0xbc   : > { %3748 = vmatprep.mubr.msk.bf16.mxu1 %vm540_vm1, %v4402_v41 }
  0xc1   : > { %3785 = vmatmul.mubr.msk.bf16.vlgmr.msra.gmra.mxu0 %vm540_vm1, %v4112_v59 }
  0xc2   : > { %3853 = vmatpush3.bf16.msra.mxu0 %v3933_v12  ;;  %3788 = vmatprep.mubr.msk.bf16.mxu0 %vm540_vm1, %v4142_v18 }
  0xc3   : > { %3854 = vmatprep.subr.bf16.mxu0 %v3935_v22  ;;  %3749 = vmatmul.mubr.msk.bf16.vlgmr.msra.gmra.mxu1 %vm540_vm1, %v4410_v26 }
  0xc4   : > { %3817 = vmatpush3.bf16.msra.mxu1 %v3932_v31  ;;  %3752 = vmatprep.mubr.msk.bf16.mxu1 %vm540_vm1, %v4427_v14 }
  0xc5   : > { %3818 = vmatprep.subr.bf16.mxu1 %v3934_v38 }
  0xc6   : > { %3855 = vmatpush3.bf16.msra.mxu0 %v3935_v22 }
  0xc8   : > { %3819 = vmatpush3.bf16.msra.mxu1 %v3934_v38 }
  0xc9   : > { %3789 = vmatmul.mubr.msk.bf16.gmra.mxu0 %vm540_vm1, %v4186_v61 }
  0xca   : > { %3792 = vmatprep.mubr.msk.bf16.mxu0 %vm540_vm1, %v4258_v54 }
  0xcb   : > { %3753 = vmatmul.mubr.msk.bf16.gmra.mxu1 %vm540_vm1, %v4440_v40 }
  0xcc   : > { %3756 = vmatprep.mubr.msk.bf16.mxu1 %vm540_vm1, %v4504_v43 }
  0xd1   : > { %3793 = vmatmul.mubr.msk.bf16.gmra.mxu0 %vm540_vm1, %v4296_v8 }
  0xd2   : > { %3796 = vmatprep.mubr.msk.bf16.mxu0 %vm540_vm1, %v4025_v6 }
  0xd3   : > { %3757 = vmatmul.mubr.msk.bf16.gmra.mxu1 %vm540_vm1, %v4510_v10 }
  0xd4   : > { %3760 = vmatprep.mubr.msk.bf16.mxu1 %vm540_vm1, %v4532_v57 }
  0xd9   : > { %3797 = vmatmul.mubr.msk.bf16.gmra.mxu0 %vm540_vm1, %v4057_v28 }
  0xda   : > { %3800 = vmatprep.mubr.msk.bf16.mxu0 %vm540_vm1, %v4085_v44 }
  0xdb   : > { %3761 = vmatmul.mubr.msk.bf16.gmra.mxu1 %vm540_vm1, %v4472_v34 }
  0xdc   : > { %3764 = vmatprep.mubr.msk.bf16.mxu1 %vm540_vm1, %v4477_v21 }
  0xdd   : > { %v3570_v59 = vpop.f32.mrf.mxu0 }
  0xdf   : > { %v623_v6 = vpop.f32.mrf.mxu0 }
  0xe0   : > { %v4744_v18 = vpop.f32.mrf.mxu1 }
  0xe1   : > { %3801 = vmatmul.mubr.msk.bf16.gmra.mxu0 %vm540_vm1, %v4136_v16  ;;  %v3571_v61 = vpop.f32.mrf.mxu0 }
  0xe2   : > { %3804 = vmatprep.mubr.msk.bf16.mxu0 %vm540_vm1, %v4171_v45  ;;  %v4750_v28 = vpop.f32.mrf.mxu1 }
  0xe3   : > { %v4752_v44 = vpop.f32.mrf.mxu0  ;;  %3765 = vmatmul.mubr.msk.bf16.gmra.mxu1 %vm540_vm1, %v4550_v0 }
  0xe4   : > { %v4756_v8 = vpop.f32.mrf.mxu1  ;;  %3768 = vmatprep.mubr.msk.bf16.mxu1 %vm540_vm1, %v4498_v17 }
  0xe6   : > { %v4760_v54 = vpop.f32.mrf.mxu1 }
  0xe7   : > { %v4762_v41 = vpop.f32.mrf.mxu0 }
  0xe9   : > { %3805 = vmatmul.mubr.msk.bf16.gmra.mxu0 %vm540_vm1, %v4219_v55  ;;  %v4766_v16 = vpop.f32.mrf.mxu0  ;;  %v4768_v45 = vpop.f32.mrf.mxu1 }
  0xea   : > { %3808 = vmatprep.mubr.msk.bf16.mxu0 %vm540_vm1, %v4271_v11 }
  0xeb   : > { %v4772_v60 = vpop.f32.mrf.mxu0  ;;  %3769 = vmatmul.mubr.msk.bf16.gmra.mxu1 %vm540_vm1, %v4568_v58  ;;  %v4776_v35 = vpop.f32.mrf.mxu1 }
  0xec   : > { %3772 = vmatprep.mubr.msk.bf16.mxu1 %vm540_vm1, %v4520_v23 }
  0xed   : > { %v4778_v51 = vpop.f32.mrf.mxu0  ;;  %v4782_v55 = vpop.f32.mrf.mxu1 }
  0xef   : > { %v4784_v33 = vpop.f32.mrf.mxu1 }
  0xf0   : > { %v4786_v42 = vpop.f32.mrf.mxu0 }
  0xf1   : > { %3809 = vmatmul.mubr.msk.bf16.gmra.mxu0 %vm540_vm1, %v4315_v36 }
  0xf2   : > { %v4790_v11 = vpop.f32.mrf.mxu1  ;;  %3812 = vmatprep.mubr.msk.bf16.mxu0 %vm540_vm1, %v4595_v56  ;;  %v4797_v15 = vpop.f32.mrf.mxu0 }
  0xf3   : > { %5661 = vst [vmem:[#allocation3_spill] sm:$0xff] %v4790_v11  ;;  %3773 = vmatmul.mubr.msk.bf16.gmra.mxu1 %vm540_vm1, %v4586_v2 }
  0xf4   : > { %v4801_v62 = vpop.f32.mrf.mxu1  ;;  %v4803_v4 = vpop.f32.mrf.mxu0  ;;  %3776 = vmatprep.mubr.msk.bf16.mxu1 %vm540_vm1, %v4610_v53 }
  0xf5   : > { %5662 = vst [vmem:[#allocation4_spill] sm:$0xff] %v4801_v62 }
  0xf6   : > { %v4807_v36 = vpop.f32.mrf.mxu1  ;;  %v4809_v50 = vpop.f32.mrf.mxu0 }
  0xf7   : > { %5663 = vst [vmem:[#allocation5_spill] sm:$0xff] %v4807_v36 }
  0xf8   : > { %v4811_v12 = vpop.f32.mrf.mxu1 }
  0xf9   : > { %5664 = vst [vmem:[#allocation6_spill] sm:$0xff] %v4811_v12  ;;  %v4813_v56 = vpop.f32.mrf.mxu0  ;;  %3813 = vmatmul.mubr.msk.bf16.gmra.mxu0 %vm540_vm1, %v4795_v27 }
  0xfa   : > { %3856 = vmatprep.mubr.msk.bf16.mxu0 %vm540_vm1, %v4410_v26 }
  0xfb   : > { %v4819_v31 = vpop.f32.mrf.mxu0  ;;  %v4821_v49 = vpop.f32.mrf.mxu1  ;;  %3777 = vmatmul.mubr.msk.bf16.gmra.mxu1 %vm540_vm1, %v4618_v1 }
  0xfc   : > { %5665 = vst [vmem:[#allocation7_spill] sm:$0xff] %v4821_v49  ;;  %3820 = vmatprep.mubr.msk.bf16.mxu1 %vm540_vm1, %v4165_v32 }
  0xfd   : > { %v4825_v3 = vpop.f32.mrf.mxu0  ;;  %v4829_v13 = vpop.f32.mrf.mxu1 }
  0xfe   : > { %5666 = vst [vmem:[#allocation8_spill] sm:$0xff] %v4829_v13 }
  0xff   : > { %v4831_v37 = vpop.f32.mrf.mxu0  ;;  %v4833_v9 = vpop.f32.mrf.mxu1 }
 0x100   : > { %5667 = vst [vmem:[#allocation9_spill] sm:$0xff] %v4833_v9 }
 0x101   : > { %v3642_v22 = vpop.f32.mrf.mxu0  ;;  %3857 = vmatmul.mubr.msk.bf16.vlgmr.msra.gmra.mxu0 %vm540_vm1, %v4427_v14  ;;  %v4837_v26 = vpop.f32.mrf.mxu1 }
 0x102   : > { %5668 = vst [vmem:[#allocation10_spill] sm:$0xff] %v4837_v26  ;;  %3860 = vmatprep.mubr.msk.bf16.mxu0 %vm540_vm1, %v4440_v40 }
 0x103   : > { %v1198_v38 = vpop.f32.mrf.mxu0  ;;  %v3606_v49 = vpop.f32.mrf.mxu1  ;;  %3821 = vmatmul.mubr.msk.bf16.vlgmr.msra.gmra.mxu1 %vm540_vm1, %v4207_v24 }
 0x104   : > { %v853_v32 = vadd.f32 %v3606_v49, %v3570_v59  ;;  %3824 = vmatprep.mubr.msk.bf16.mxu1 %vm540_vm1, %v4243_v7 }
 0x105   : > { %v3643_v13 = vpop.f32.mrf.mxu0  ;;  %v844_v9 = vpop.f32.mrf.mxu1 }
 0x106   : > { %v4845_v12 = vadd.f32 %v3642_v22, %v853_v32  ;;  %v845_v36 = vadd.f32 %v844_v9, %v623_v6 }
 0x107   : > { %v1201_v14 = vpop.f32.mrf.mxu0  ;;  %v3607_v62 = vpop.f32.mrf.mxu1 }
 0x108   : > { %v4847_v26 = vadd.f32 %v1198_v38, %v845_v36  ;;  %v856_v30 = vadd.f32 %v3607_v62, %v3571_v61 }
 0x109   : > { %v3646_v40 = vpop.f32.mrf.mxu0  ;;  %3861 = vmatmul.mubr.msk.bf16.gmra.mxu0 %vm540_vm1, %v4504_v43  ;;  %v847_v11 = vpop.f32.mrf.mxu1 }
 0x10a   : > { %3864 = vmatprep.mubr.msk.bf16.mxu0 %vm540_vm1, %v4510_v10  ;;  %v4853_v24 = vadd.f32 %v3643_v13, %v856_v30  ;;  %v848_v7 = vadd.f32 %v847_v11, %v4752_v44 }
 0x10b   : > { %v1214_v59 = vpop.f32.mrf.mxu0  ;;  %v3610_v49 = vpop.f32.mrf.mxu1  ;;  %3825 = vmatmul.mubr.msk.bf16.gmra.mxu1 %vm540_vm1, %v4298_v20 }
 0x10c   : > { %v4858_v6 = vadd.f32 %v1201_v14, %v848_v7  ;;  %v869_v61 = vadd.f32 %v3610_v49, %v4762_v41  ;;  %3828 = vmatprep.mubr.msk.bf16.mxu1 %vm540_vm1, %v4335_v5 }
 0x10d   : > { %v3647_v62 = vpop.f32.mrf.mxu0  ;;  %v860_v43 = vpop.f32.mrf.mxu1 }
 0x10e   : > { %v4863_v36 = vadd.f32 %v3646_v40, %v869_v61  ;;  %v861_v10 = vadd.f32 %v860_v43, %v4766_v16 }
 0x10f   : > { %v1217_v30 = vpop.f32.mrf.mxu0  ;;  %v3611_v44 = vpop.f32.mrf.mxu1 }
 0x110   : > { %v4866_v11 = vadd.f32 %v1214_v59, %v861_v10  ;;  %v872_v13 = vadd.f32 %v3611_v44, %v4772_v60 }
 0x111   : > { %v3650_v20 = vpop.f32.mrf.mxu0  ;;  %3865 = vmatmul.mubr.msk.bf16.gmra.mxu0 %vm540_vm1, %v4532_v57  ;;  %v863_v41 = vpop.f32.mrf.mxu1 }
 0x112   : > { %3868 = vmatprep.mubr.msk.bf16.mxu0 %vm540_vm1, %v4472_v34  ;;  %v4873_v5 = vadd.f32 %v3647_v62, %v872_v13  ;;  %v864_v9 = vadd.f32 %v863_v41, %v4778_v51 }
 0x113   : > { %v1230_v22 = vpop.f32.mrf.mxu0  ;;  %v3614_v16 = vpop.f32.mrf.mxu1  ;;  %3829 = vmatmul.mubr.msk.bf16.gmra.mxu1 %vm540_vm1, %v4365_v52 }
 0x114   : > { %v4878_v38 = vadd.f32 %v1217_v30, %v864_v9  ;;  %v885_v60 = vadd.f32 %v3614_v16, %v4786_v42  ;;  %3832 = vmatprep.mubr.msk.bf16.mxu1 %vm540_vm1, %v4074_v39 }
 0x115   : > { %v3651_v32 = vpop.f32.mrf.mxu0  ;;  %v876_v57 = vpop.f32.mrf.mxu1 }
 0x116   : > { %v4883_v14 = vadd.f32 %v3650_v20, %v885_v60  ;;  %v877_v34 = vadd.f32 %v876_v57, %v4797_v15 }
 0x117   : > { %v1233_v40 = vpop.f32.mrf.mxu0  ;;  %v3615_v51 = vpop.f32.mrf.mxu1 }
 0x118   : > { %v4886_v7 = vadd.f32 %v1230_v22, %v877_v34  ;;  %v888_v59 = vadd.f32 %v3615_v51, %v4803_v4 }
 0x119   : > { %v3654_v52 = vpop.f32.mrf.mxu0  ;;  %3869 = vmatmul.mubr.msk.bf16.gmra.mxu0 %vm540_vm1, %v4477_v21  ;;  %v879_v42 = vpop.f32.mrf.mxu1 }
 0x11a   : > { %3872 = vmatprep.mubr.msk.bf16.mxu0 %vm540_vm1, %v4550_v0  ;;  %v4893_v39 = vadd.f32 %v3651_v32, %v888_v59  ;;  %v880_v49 = vadd.f32 %v879_v42, %v4809_v50 }
 0x11b   : > { %v1246_v61 = vpop.f32.mrf.mxu0  ;;  %v3618_v15 = vpop.f32.mrf.mxu1  ;;  %3833 = vmatmul.mubr.msk.bf16.gmra.mxu1 %vm540_vm1, %v4144_v19 }
 0x11c   : > { %v4898_v62 = vadd.f32 %v1233_v40, %v880_v49  ;;  %v901_v4 = vadd.f32 %v3618_v15, %v4813_v56  ;;  %3836 = vmatprep.mubr.msk.bf16.mxu1 %vm540_vm1, %v4174_v46 }
 0x11d   : > { %v3655_v43 = vpop.f32.mrf.mxu0  ;;  %v892_v21 = vpop.f32.mrf.mxu1 }
 0x11e   : > { %v4903_v10 = vadd.f32 %v3654_v52, %v901_v4  ;;  %v893_v0 = vadd.f32 %v892_v21, %v4819_v31 }
 0x11f   : > { %v1249_v30 = vpop.f32.mrf.mxu0  ;;  %v3619_v50 = vpop.f32.mrf.mxu1 }
 0x120   : > { %v4906_v44 = vadd.f32 %v1246_v61, %v893_v0  ;;  %v904_v13 = vadd.f32 %v3619_v50, %v4825_v3 }
 0x121   : > { %v3658_v19 = vpop.f32.mrf.mxu0  ;;  %3873 = vmatmul.mubr.msk.bf16.gmra.mxu0 %vm540_vm1, %v4498_v17  ;;  %v895_v56 = vpop.f32.mrf.mxu1 }
 0x122   : > { %3876 = vmatprep.mubr.msk.bf16.mxu0 %vm540_vm1, %v4568_v58  ;;  %v4913_v46 = vadd.f32 %v3655_v43, %v904_v13  ;;  %v896_v20 = vadd.f32 %v895_v56, %v4831_v37  ;;  %v272_v37 = vld [vmem:[%s4018_s28 + $0xd4] sm:$0x1]  ;;  %s3289_s28 = sshll.u32 %s5811_s16, 7 }
 0x123   : > { %v1262_v31 = vpop.f32.mrf.mxu0  ;;  %v3622_v41 = vpop.f32.mrf.mxu1  ;;  %3837 = vmatmul.mubr.msk.bf16.gmra.mxu1 %vm540_vm1, %v4237_v47  ;;  %s5211_s10 = scalar_lea.vmem %s5563_s3, %s3289_s28  ;;  %s5338_s17 = scalar_lea.vmem %s5564_s4, %s3289_s28 }
 0x124   : > { %v4918_v9 = vadd.f32 %v1249_v30, %v896_v20  ;;  %v917_v3 = vadd.f32 %v3622_v41, %v4744_v18  ;;  %3840 = vmatprep.mubr.msk.bf16.mxu1 %vm540_vm1, %v4273_v48  ;;  %v324_v18 = vunpack.c.l.bf16 %v4795_v27  ;;  %v325_v48 = vunpack.c.h.bf16 %v4795_v27 }
 0x125   : > { %v3659_v22 = vpop.f32.mrf.mxu0  ;;  %v908_v17 = vpop.f32.mrf.mxu1 }
 0x126   : > { %v4923_v16 = vadd.f32 %v3658_v19, %v917_v3  ;;  %v909_v58 = vadd.f32 %v908_v17, %v4750_v28  ;;  %v326_v28 = vunpack.c.l.bf16 %v272_v37  ;;  %v2449_v27 = vrot.slane %v324_v18, 2  ;;  %v5669_v3 = vld [vmem:[#allocation3_spill] sm:$0xff]  ;;  %v5670_v17 = vld [vmem:[#allocation2_spill] sm:$0xff] }
 0x127   : > { %v1265_v60 = vpop.f32.mrf.mxu0  ;;  %v3623_v32 = vpop.f32.mrf.mxu1  ;;  %v2229_v21 = vrot.slane %v324_v18, 1  ;;  %v2230_v0 = vrot.slane %v325_v48, 1 }
 0x128   : > { %v4927_v57 = vadd.f32 %v1262_v31, %v909_v58  ;;  %v920_v47 = vadd.f32 %v3623_v32, %v4756_v8  ;;  %v2452_v15 = vrot.slane %v326_v28, 2  ;;  %v5671_v32 = vld [vmem:[#allocation4_spill] sm:$0xff] }
 0x129   : > { %v3662_v34 = vpop.f32.mrf.mxu0  ;;  %3877 = vmatmul.mubr.msk.bf16.gmra.mxu0 %vm540_vm1, %v4520_v23  ;;  %v911_v40 = vpop.f32.mrf.mxu1 }
 0x12a   : > { %3880 = vmatprep.mubr.msk.bf16.mxu0 %vm540_vm1, %v4586_v2  ;;  %v4936_v51 = vadd.f32 %v3659_v22, %v920_v47  ;;  %v912_v59 = vadd.f32 %v911_v40, %v4760_v54  ;;  %v2450_v2 = vrot.slane %v325_v48, 2  ;;  %v5672_v40 = vld [vmem:[#allocation5_spill] sm:$0xff] }
 0x12b   : > { %v1278_v52 = vpop.f32.mrf.mxu0  ;;  %v3626_v42 = vpop.f32.mrf.mxu1  ;;  %3841 = vmatmul.mubr.msk.bf16.gmra.mxu1 %vm540_vm1, %v5659_v29 }
 0x12c   : > { %v4941_v8 = vadd.f32 %v1265_v60, %v912_v59  ;;  %v933_v23 = vadd.f32 %v3626_v42, %v4768_v45  ;;  %3844 = vmatprep.mubr.msk.bf16.mxu1 %vm540_vm1, %v4349_v63  ;;  %v2232_v63 = vrot.slane %v326_v28, 1  ;;  %v2451_v19 = vsel %vm971_vm2, %v2449_v27, %v2450_v2 }
 0x12d   : > { %v3663_v49 = vpop.f32.mrf.mxu0  ;;  %v924_v61 = vpop.f32.mrf.mxu1 }
 0x12e   : > { %v4946_v4 = vadd.f32 %v3662_v34, %v933_v23  ;;  %v925_v54 = vadd.f32 %v924_v61, %v4776_v35  ;;  %v2453_v35 = vsel %vm971_vm2, %v2450_v2, %v2452_v15  ;;  %v2233_v58 = vsel %vm395_vm0, %v2230_v0, %v2232_v63  ;;  %v5673_v23 = vld [vmem:[#allocation6_spill] sm:$0xff]  ;;  %v5674_v15 = vld [vmem:[#allocation7_spill] sm:$0xff] }
 0x12f   : > { %v1281_v43 = vpop.f32.mrf.mxu0  ;;  %v3627_v29 = vpop.f32.mrf.mxu1  ;;  %v2456_v60 = vpack.c.bf16 %v2453_v35, %v2451_v19  ;;  %v5676_v19 = vld [vmem:[#allocation9_spill] sm:$0xff] }
 0x130   : > { %v4949_v30 = vadd.f32 %v1278_v52, %v925_v54  ;;  %v936_v45 = vadd.f32 %v3627_v29, %v4782_v55  ;;  %v5675_v29 = vld [vmem:[#allocation8_spill] sm:$0xff] }
 0x131   : > { %v3666_v50 = vpop.f32.mrf.mxu0  ;;  %3881 = vmatmul.mubr.msk.bf16.gmra.mxu0 %vm540_vm1, %v4610_v53  ;;  %v927_v13 = vpop.f32.mrf.mxu1  ;;  %v2231_v53 = vsel %vm395_vm0, %v2229_v21, %v2230_v0 }
 0x132   : > { %3884 = vmatprep.mubr.msk.bf16.mxu0 %vm540_vm1, %v4618_v1  ;;  %v4958_v56 = vadd.f32 %v3663_v49, %v936_v45  ;;  %v928_v20 = vadd.f32 %v927_v13, %v4784_v33  ;;  %v2236_v18 = vpack.c.bf16 %v2233_v58, %v2231_v53  ;;  %v5677_v53 = vld [vmem:[#allocation10_spill] sm:$0xff] }
 0x133   : > { %v1294_v31 = vpop.f32.mrf.mxu0  ;;  %v3630_v41 = vpop.f32.mrf.mxu1  ;;  %3845 = vmatmul.mubr.msk.bf16.gmra.mxu1 %vm540_vm1, %v4380_v25 }
 0x134   : > { %v4964_v55 = vadd.f32 %v1281_v43, %v928_v20  ;;  %v949_v22 = vadd.f32 %v3630_v41, %v5669_v3  ;;  %3848 = vmatprep.mubr.msk.bf16.mxu1 %vm540_vm1, %v5670_v17 }
 0x135   : > { %v3667_v1 = vpop.f32.mrf.mxu0  ;;  %v940_v37 = vpop.f32.mrf.mxu1 }
 0x136   : > { %v4970_v33 = vadd.f32 %v3666_v50, %v949_v22  ;;  %v941_v47 = vadd.f32 %v940_v37, %v5671_v32 }
 0x137   : > { %v1297_v34 = vpop.f32.mrf.mxu0  ;;  %v3631_v25 = vpop.f32.mrf.mxu1 }
 0x138   : > { %v4973_v48 = vadd.f32 %v1294_v31, %v941_v47  ;;  %v952_v28 = vadd.f32 %v3631_v25, %v5672_v40 }
 0x139   : > { %v3670_v59 = vpop.f32.mrf.mxu0  ;;  %3885 = vmatmul.mubr.msk.bf16.gmra.mxu0 %vm540_vm1, %v2456_v60  ;;  %v943_v52 = vpop.f32.mrf.mxu1 }
 0x13a   : > { %v4977_v42 = vadd.f32 %v3667_v1, %v952_v28  ;;  %v944_v49 = vadd.f32 %v943_v52, %v5673_v23 }
 0x13b   : > { %v1310_v27 = vpop.f32.mrf.mxu0  ;;  %v3634_v2 = vpop.f32.mrf.mxu1  ;;  %3849 = vmatmul.mubr.msk.bf16.gmra.mxu1 %vm540_vm1, %v2236_v18 }
 0x13c   : > { %v4981_v61 = vadd.f32 %v1297_v34, %v944_v49  ;;  %v965_v54 = vadd.f32 %v3634_v2, %v5674_v15 }
 0x13d   : > { %v3671_v43 = vpop.f32.mrf.mxu0  ;;  %v956_v21 = vpop.f32.mrf.mxu1 }
 0x13e   : > { %v4984_v0 = vadd.f32 %v3670_v59, %v965_v54  ;;  %v957_v45 = vadd.f32 %v956_v21, %v5675_v29 }
 0x13f   : > { %v1313_v50 = vpop.f32.mrf.mxu0  ;;  %v3635_v63 = vpop.f32.mrf.mxu1 }
 0x140   : > { %v4987_v13 = vadd.f32 %v1310_v27, %v957_v45  ;;  %v968_v35 = vadd.f32 %v3635_v63, %v5676_v19 }
 0x141   : > { %v3714_v20 = vpop.f32.mrf.mxu0  ;;  %v959_v31 = vpop.f32.mrf.mxu1 }
 0x142   : > { %v4990_v41 = vadd.f32 %v3671_v43, %v968_v35  ;;  %v960_v3 = vadd.f32 %v959_v31, %v5677_v53 }
 0x143   : > { %v1634_v22 = vpop.f32.mrf.mxu0  ;;  %v3678_v1 = vpop.f32.mrf.mxu1 }
 0x144   : > { %v4993_v17 = vadd.f32 %v1313_v50, %v960_v3  ;;  %v1540_v58 = vadd.f32 %v3678_v1, %v4845_v12 }
 0x145   : > { %v3715_v60 = vpop.f32.mrf.mxu0  ;;  %v1411_v37 = vpop.f32.mrf.mxu1 }
 0x146   : > { %v4996_v32 = vadd.f32 %v3714_v20, %v1540_v58  ;;  %v1538_v47 = vadd.f32 %v1411_v37, %v4847_v26 }
 0x147   : > { %v1637_v34 = vpop.f32.mrf.mxu0  ;;  %v3679_v25 = vpop.f32.mrf.mxu1 }
 0x148   : > { %v4999_v18 = vadd.f32 %v1634_v22, %v1538_v47  ;;  %v1541_v40 = vadd.f32 %v3679_v25, %v4853_v24 }
 0x149   : > { %v3718_v28 = vpop.f32.mrf.mxu0  ;;  %v1414_v59 = vpop.f32.mrf.mxu1 }
 0x14a   : > { %v5002_v52 = vadd.f32 %v3715_v60, %v1541_v40  ;;  %v1539_v23 = vadd.f32 %v1414_v59, %v4858_v6 }
 0x14b   : > { %v1650_v49 = vpop.f32.mrf.mxu0  ;;  %v3682_v12 = vpop.f32.mrf.mxu1 }
 0x14c   : > { %v5005_v27 = vadd.f32 %v1637_v34, %v1539_v23  ;;  %v1544_v2 = vadd.f32 %v3682_v12, %v4863_v36 }
 0x14d   : > { %v3719_v15 = vpop.f32.mrf.mxu0  ;;  %v1427_v26 = vpop.f32.mrf.mxu1 }
 0x14e   : > { %v5008_v54 = vadd.f32 %v3718_v28, %v1544_v2  ;;  %v1542_v43 = vadd.f32 %v1427_v26, %v4866_v11 }
 0x14f   : > { %v1653_v21 = vpop.f32.mrf.mxu0  ;;  %v3683_v24 = vpop.f32.mrf.mxu1 }
 0x150   : > { %v5011_v29 = vadd.f32 %v1650_v49, %v1542_v43  ;;  %v1545_v45 = vadd.f32 %v3683_v24, %v4873_v5 }
 0x151   : > { %v3722_v50 = vpop.f32.mrf.mxu0  ;;  %v1430_v6 = vpop.f32.mrf.mxu1 }
 0x152   : > { %v5014_v63 = vadd.f32 %v3719_v15, %v1545_v45  ;;  %v1543_v19 = vadd.f32 %v1430_v6, %v4878_v38 }
 0x153   : > { %v1666_v35 = vpop.f32.mrf.mxu0  ;;  %v3686_v36 = vpop.f32.mrf.mxu1 }
 0x154   : > { %v5017_v20 = vadd.f32 %v1653_v21, %v1543_v19  ;;  %v1548_v31 = vadd.f32 %v3686_v36, %v4883_v14 }
 0x155   : > { %v3723_v53 = vpop.f32.mrf.mxu0  ;;  %v1443_v11 = vpop.f32.mrf.mxu1 }
 0x156   : > { %v5020_v3 = vadd.f32 %v3722_v50, %v1548_v31  ;;  %v1546_v22 = vadd.f32 %v1443_v11, %v4886_v7 }
 0x157   : > { %v1669_v1 = vpop.f32.mrf.mxu0  ;;  %v3687_v5 = vpop.f32.mrf.mxu1 }
 0x158   : > { %v5023_v58 = vadd.f32 %v1666_v35, %v1546_v22  ;;  %v1549_v60 = vadd.f32 %v3687_v5, %v4893_v39 }
 0x159   : > { %v3726_v37 = vpop.f32.mrf.mxu0  ;;  %v1446_v38 = vpop.f32.mrf.mxu1 }
 0x15a   : > { %v5026_v47 = vadd.f32 %v3723_v53, %v1549_v60  ;;  %v1547_v34 = vadd.f32 %v1446_v38, %v4898_v62 }
 0x15b   : > { %v1682_v25 = vpop.f32.mrf.mxu0  ;;  %v3690_v14 = vpop.f32.mrf.mxu1 }
 0x15c   : > { %v5029_v40 = vadd.f32 %v1669_v1, %v1547_v34  ;;  %v1552_v28 = vadd.f32 %v3690_v14, %v4903_v10 }
 0x15d   : > { %v3727_v59 = vpop.f32.mrf.mxu0  ;;  %v1459_v7 = vpop.f32.mrf.mxu1 }
 0x15e   : > { %v5032_v23 = vadd.f32 %v3726_v37, %v1552_v28  ;;  %v1550_v49 = vadd.f32 %v1459_v7, %v4906_v44 }
 0x15f   : > { %v1685_v12 = vpop.f32.mrf.mxu0  ;;  %v3691_v39 = vpop.f32.mrf.mxu1 }
 0x160   : > { %v5035_v2 = vadd.f32 %v1682_v25, %v1550_v49  ;;  %v1553_v15 = vadd.f32 %v3691_v39, %v4913_v46 }
 0x161   : > { %v3730_v26 = vpop.f32.mrf.mxu0  ;;  %v1462_v62 = vpop.f32.mrf.mxu1 }
 0x162   : > { %v5038_v43 = vadd.f32 %v3727_v59, %v1553_v15  ;;  %v1551_v21 = vadd.f32 %v1462_v62, %v4918_v9 }
 0x163   : > { %v1698_v24 = vpop.f32.mrf.mxu0  ;;  %v3694_v10 = vpop.f32.mrf.mxu1 }
 0x164   : > { %v5041_v45 = vadd.f32 %v1685_v12, %v1551_v21  ;;  %v1556_v50 = vadd.f32 %v3694_v10, %v4923_v16 }
 0x165   : > { %v3731_v6 = vpop.f32.mrf.mxu0  ;;  %v1475_v44 = vpop.f32.mrf.mxu1 }
 0x166   : > { %5678 = vst [vmem:[#allocation3_spill] sm:$0xff] %v5041_v45  ;;  %v5044_v19 = vadd.f32 %v3730_v26, %v1556_v50  ;;  %v1554_v35 = vadd.f32 %v1475_v44, %v4927_v57  ;;  %v5286_v45 = vld [vmem:[%s5211_s10 + $0x50] sm:$0xff]  }
 0x167   : > { %v1701_v36 = vpop.f32.mrf.mxu0  ;;  %v3695_v46 = vpop.f32.mrf.mxu1 }
 0x168   : > { %5679 = vst [vmem:[#allocation2_spill] sm:$0xff] %v5044_v19  ;;  %v5047_v31 = vadd.f32 %v1698_v24, %v1554_v35  ;;  %v1557_v53 = vadd.f32 %v3695_v46, %v4936_v51  ;;  %v5269_v19 = vld [vmem:[%s5211_s10 + $0x48] sm:$0xff]  }
 0x169   : > { %v3734_v11 = vpop.f32.mrf.mxu0  ;;  %v1478_v9 = vpop.f32.mrf.mxu1 }
 0x16a   : > { %5680 = vst [vmem:[#allocation4_spill] sm:$0xff] %v5047_v31  ;;  %v5050_v22 = vadd.f32 %v3731_v6, %v1557_v53  ;;  %v1555_v1 = vadd.f32 %v1478_v9, %v4941_v8  ;;  %v5272_v31 = vld [vmem:[%s5211_s10 + $0x40] sm:$0xff]  }
 0x16b   : > { %v1714_v5 = vpop.f32.mrf.mxu0  ;;  %v3698_v16 = vpop.f32.mrf.mxu1 }
 0x16c   : > { %5681 = vst [vmem:[#allocation5_spill] sm:$0xff] %v5050_v22  ;;  %v5053_v60 = vadd.f32 %v1701_v36, %v1555_v1  ;;  %v1560_v37 = vadd.f32 %v3698_v16, %v4946_v4 }
 0x16d   : > { %v3735_v38 = vpop.f32.mrf.mxu0  ;;  %v1491_v57 = vpop.f32.mrf.mxu1 }
 0x16e   : > { %5682 = vst [vmem:[#allocation6_spill] sm:$0xff] %v5053_v60  ;;  %v5056_v34 = vadd.f32 %v3734_v11, %v1560_v37  ;;  %v1558_v25 = vadd.f32 %v1491_v57, %v4949_v30 }
 0x16f   : > { %v1717_v14 = vpop.f32.mrf.mxu0  ;;  %v3699_v51 = vpop.f32.mrf.mxu1 }
 0x170   : > { %5683 = vst [vmem:[#allocation7_spill] sm:$0xff] %v5056_v34  ;;  %v5059_v28 = vadd.f32 %v1714_v5, %v1558_v25  ;;  %v1561_v59 = vadd.f32 %v3699_v51, %v4958_v56 }
 0x171   : > { %v3738_v7 = vpop.f32.mrf.mxu0  ;;  %v1494_v8 = vpop.f32.mrf.mxu1 }
 0x172   : > { %5684 = vst [vmem:[#allocation8_spill] sm:$0xff] %v5059_v28  ;;  %v5062_v49 = vadd.f32 %v3735_v38, %v1561_v59  ;;  %v1559_v12 = vadd.f32 %v1494_v8, %v4964_v55 }
 0x173   : > { %v1730_v39 = vpop.f32.mrf.mxu0  ;;  %v3702_v4 = vpop.f32.mrf.mxu1 }
 0x174   : > { %5685 = vst [vmem:[#allocation9_spill] sm:$0xff] %v5062_v49  ;;  %v5065_v15 = vadd.f32 %v1717_v14, %v1559_v12  ;;  %v1564_v26 = vadd.f32 %v3702_v4, %v4970_v33 }
 0x175   : > { %v3739_v62 = vpop.f32.mrf.mxu0  ;;  %v1507_v30 = vpop.f32.mrf.mxu1 }
 0x176   : > { %5686 = vst [vmem:[#allocation10_spill] sm:$0xff] %v5065_v15  ;;  %v5068_v21 = vadd.f32 %v3738_v7, %v1564_v26  ;;  %v1562_v24 = vadd.f32 %v1507_v30, %v4973_v48 }
 0x177   : > { %v1733_v10 = vpop.f32.mrf.mxu0  ;;  %v3703_v56 = vpop.f32.mrf.mxu1 }
 0x178   : > { %5687 = vst [vmem:[#allocation11_spill] sm:$0xff] %v5068_v21  ;;  %v5071_v50 = vadd.f32 %v1730_v39, %v1562_v24  ;;  %v1565_v6 = vadd.f32 %v3703_v56, %v4977_v42 }
 0x179   : > { %v3742_v44 = vpop.f32.mrf.mxu0  ;;  %v1510_v55 = vpop.f32.mrf.mxu1 }
 0x17a   : > { %5688 = vst [vmem:[#allocation12_spill] sm:$0xff] %v5071_v50  ;;  %v5074_v35 = vadd.f32 %v3739_v62, %v1565_v6  ;;  %v1563_v36 = vadd.f32 %v1510_v55, %v4981_v61 }
 0x17b   : > { %v1746_v46 = vpop.f32.mrf.mxu0  ;;  %v3706_v33 = vpop.f32.mrf.mxu1 }
 0x17c   : > { %5689 = vst [vmem:[#allocation13_spill] sm:$0xff] %v5074_v35  ;;  %v5077_v53 = vadd.f32 %v1733_v10, %v1563_v36  ;;  %v1568_v11 = vadd.f32 %v3706_v33, %v4984_v0 }
 0x17d   : > { %v3743_v9 = vpop.f32.mrf.mxu0  ;;  %v1523_v48 = vpop.f32.mrf.mxu1 }
 0x17e   : > { %5690 = vst [vmem:[#allocation14_spill] sm:$0xff] %v5077_v53  ;;  %v5080_v1 = vadd.f32 %v3742_v44, %v1568_v11  ;;  %v1566_v5 = vadd.f32 %v1523_v48, %v4987_v13 }
 0x17f   : > { %v1749_v16 = vpop.f32.mrf.mxu0  ;;  %v3707_v42 = vpop.f32.mrf.mxu1 }
 0x180   : > { %5691 = vst [vmem:[#allocation15_spill] sm:$0xff] %v5080_v1  ;;  %v5083_v37 = vadd.f32 %v1746_v46, %v1566_v5  ;;  %v1569_v38 = vadd.f32 %v3707_v42, %v4990_v41 }
 0x181   : > { %v5086_v57 = vpop.f32.mrf.mxu0  ;;  %v1526_v61 = vpop.f32.mrf.mxu1 }
 0x182   : > { %5692 = vst [vmem:[#allocation16_spill] sm:$0xff] %v5083_v37  ;;  %v5088_v25 = vadd.f32 %v3743_v9, %v1569_v38  ;;  %v1567_v14 = vadd.f32 %v1526_v61, %v4993_v17 }
 0x183   : > { %v5091_v0 = vpop.f32.mrf.mxu0  ;;  %v5093_v51 = vpop.f32.mrf.mxu1 }
 0x184   : > { %5693 = vst [vmem:[#allocation17_spill] sm:$0xff] %v5088_v25  ;;  %v5095_v59 = vadd.f32 %v1749_v16, %v1567_v14 }
 0x185   : > { %v5097_v13 = vpop.f32.mrf.mxu0  ;;  %v5099_v7 = vpop.f32.mrf.mxu1 }
 0x186   : > { %5694 = vst [vmem:[#allocation18_spill] sm:$0xff] %v5095_v59 }
 0x187   : > { %v5101_v8 = vpop.f32.mrf.mxu0  ;;  %v5103_v41 = vpop.f32.mrf.mxu1 }
 0x189   : > { %v5105_v12 = vpop.f32.mrf.mxu0  ;;  %v5107_v39 = vpop.f32.mrf.mxu1 }
 0x18b   : > { %v5109_v4 = vpop.f32.mrf.mxu0  ;;  %v5111_v17 = vpop.f32.mrf.mxu1 }
 0x18d   : > { %v5113_v26 = vpop.f32.mrf.mxu0  ;;  %v5115_v62 = vpop.f32.mrf.mxu1 }
 0x18f   : > { %v5117_v30 = vpop.f32.mrf.mxu0  ;;  %v5119_v24 = vpop.f32.mrf.mxu1 }
 0x191   : > { %v5121_v10 = vpop.f32.mrf.mxu0  ;;  %v5123_v56 = vpop.f32.mrf.mxu1 }
 0x193   : > { %v5125_v6 = vpop.f32.mrf.mxu0  ;;  %v5127_v44 = vpop.f32.mrf.mxu1 }
 0x195   : > { %v5129_v55 = vpop.f32.mrf.mxu0  ;;  %v5131_v36 = vpop.f32.mrf.mxu1 }
 0x197   : > { %v5133_v46 = vpop.f32.mrf.mxu0  ;;  %v5135_v33 = vpop.f32.mrf.mxu1 }
 0x199   : > { %v5137_v11 = vpop.f32.mrf.mxu0  ;;  %v5139_v9 = vpop.f32.mrf.mxu1 }
 0x19b   : > { %v5141_v48 = vpop.f32.mrf.mxu0  ;;  %v5143_v5 = vpop.f32.mrf.mxu1 }
 0x19d   : > { %v5145_v16 = vpop.f32.mrf.mxu0  ;;  %v5147_v42 = vpop.f32.mrf.mxu1 }
 0x19e   : > { %5695 = vst [vmem:[#allocation19_spill] sm:$0xff] %v5145_v16 }
 0x19f   : > { %v5149_v38 = vpop.f32.mrf.mxu0  ;;  %v5151_v61 = vpop.f32.mrf.mxu1 }
 0x1a0   : > { %5696 = vst [vmem:[#allocation20_spill] sm:$0xff] %v5149_v38 }
 0x1a1   : > { %v5153_v14 = vpop.f32.mrf.mxu0  ;;  %v5155_v59 = vpop.f32.mrf.mxu1 }
 0x1a2   : > { %5697 = vst [vmem:[#allocation21_spill] sm:$0xff] %v5153_v14  ;;  %5698 = vst [vmem:[#allocation22_spill] sm:$0xff] %v5155_v59  ;;  %v5283_v59 = vld [vmem:[%s5211_s10 + $0x58] sm:$0xff]  }
 0x1a3   : > { %v5157_v25 = vpop.f32.mrf.mxu0  ;;  %v5159_v37 = vpop.f32.mrf.mxu1 }
 0x1a4   : > { %5699 = vst [vmem:[#allocation23_spill] sm:$0xff] %v5157_v25  ;;  %5700 = vst [vmem:[#allocation24_spill] sm:$0xff] %v5159_v37 }
 0x1a5   : > { %v5161_v1 = vpop.f32.mrf.mxu0  ;;  %v5163_v53 = vpop.f32.mrf.mxu1 }
 0x1a6   : > { %5701 = vst [vmem:[#allocation25_spill] sm:$0xff] %v5161_v1  ;;  %5702 = vst [vmem:[#allocation26_spill] sm:$0xff] %v5163_v53  ;;  %v5252_v53 = vld [vmem:[%s5211_s10 + $0x38] sm:$0xff]  }
 0x1a7   : > { %v5165_v35 = vpop.f32.mrf.mxu0  ;;  %v5167_v50 = vpop.f32.mrf.mxu1  ;;  %5730 = vst [vmem:[#allocation54_spill] sm:$0xff] %v5252_v53  ;;  %v5300_v53 = vld [vmem:[%s5211_s10 + $0x68] sm:$0xff]  }
 0x1a8   : > { %5703 = vst [vmem:[#allocation27_spill] sm:$0xff] %v5165_v35  ;;  %5704 = vst [vmem:[#allocation28_spill] sm:$0xff] %v5167_v50 }
 0x1a9   : > { %v5169_v21 = vpop.f32.mrf.mxu0  ;;  %v5171_v15 = vpop.f32.mrf.mxu1 }
 0x1aa   : > { %5705 = vst [vmem:[#allocation29_spill] sm:$0xff] %v5169_v21  ;;  %5706 = vst [vmem:[#allocation30_spill] sm:$0xff] %v5171_v15 }
 0x1ab   : > { %v5173_v49 = vpop.f32.mrf.mxu0  ;;  %v5175_v28 = vpop.f32.mrf.mxu1 }
 0x1ac   : > { %5707 = vst [vmem:[#allocation31_spill] sm:$0xff] %v5173_v49  ;;  %5708 = vst [vmem:[#allocation32_spill] sm:$0xff] %v5175_v28 }
 0x1ad   : > { %v5177_v34 = vpop.f32.mrf.mxu0  ;;  %v5179_v60 = vpop.f32.mrf.mxu1 }
 0x1ae   : > { %5709 = vst [vmem:[#allocation33_spill] sm:$0xff] %v5177_v34  ;;  %5710 = vst [vmem:[#allocation34_spill] sm:$0xff] %v5179_v60  ;;  %v5244_v60 = vld [vmem:[%s5211_s10 + $0x20] sm:$0xff]  }
 0x1af   : > { %v5181_v1 = vpop.f32.mrf.mxu0  ;;  %v5183_v25 = vpop.f32.mrf.mxu1  ;;  %5729 = vst [vmem:[#allocation53_spill] sm:$0xff] %v5244_v60  ;;  %v1987_v60 = vadd.f32 %v5111_v17, %v5008_v54  ;;  %v1988_v54 = vadd.f32 %v5119_v24, %v5014_v63  ;;  %v3378_v24 = vunpack.c.h.bf16 %v5300_v53 }
 0x1b0   : > { %5711 = vst [vmem:[#allocation35_spill] sm:$0xff] %v5181_v1  ;;  %5712 = vst [vmem:[#allocation36_spill] sm:$0xff] %v5183_v25 }
 0x1b1   : > { %v5185_v35 = vpop.f32.mrf.mxu0  ;;  %v5187_v50 = vpop.f32.mrf.mxu1 }
 0x1b2   : > { %5713 = vst [vmem:[#allocation37_spill] sm:$0xff] %v5185_v35  ;;  %5714 = vst [vmem:[#allocation38_spill] sm:$0xff] %v5187_v50  ;;  %v1983_v35 = vadd.f32 %v5093_v51, %v4996_v32  ;;  %v5241_v50 = vld [vmem:[%s5211_s10 + $0x28] sm:$0xff]   ;;  %v1984_v51 = vadd.f32 %v5103_v41, %v5002_v52  ;;  %v1982_v41 = vadd.f32 %v5107_v39, %v5005_v27  ;;  %v3369_v27 = vunpack.c.l.bf16 %v5283_v59 }
 0x1b3   : > { %v5189_v21 = vpop.f32.mrf.mxu0  ;;  %v5191_v15 = vpop.f32.mrf.mxu1 }
 0x1b4   : > { %5715 = vst [vmem:[#allocation39_spill] sm:$0xff] %v5189_v21  ;;  %5716 = vst [vmem:[#allocation40_spill] sm:$0xff] %v5191_v15  ;;  %v5232_v15 = vld [vmem:[%s5211_s10 + $0x18] sm:$0xff]   ;;  %v2196_v32 = vadd.f32 %v5086_v57, %v1983_v35  ;;  %v5291_v35 = vld [vmem:[%s5562_s2] ss:$0 sm:$0xff] }
 0x1b5   : > { %v5193_v49 = vpop.f32.mrf.mxu0  ;;  %v5195_v28 = vpop.f32.mrf.mxu1 }
 0x1b6   : > { %5717 = vst [vmem:[#allocation41_spill] sm:$0xff] %v5193_v49  ;;  %5718 = vst [vmem:[#allocation42_spill] sm:$0xff] %v5195_v28 }
 0x1b7   : > { %v5197_v22 = vpop.f32.mrf.mxu0  ;;  %v5200_v34 = vpop.f32.mrf.mxu1 }
 0x1b8   : > { %5719 = vst [vmem:[#allocation43_spill] sm:$0xff] %v5197_v22  ;;  %5720 = vst [vmem:[#allocation44_spill] sm:$0xff] %v5200_v34  ;;  %v5225_v34 = vld [vmem:[%s5211_s10] sm:$0xff]  }
 0x1b9   : > { %v5202_v1 = vpop.f32.mrf.mxu0  ;;  %v5204_v25 = vpop.f32.mrf.mxu1 }
 0x1ba   : > { %5721 = vst [vmem:[#allocation45_spill] sm:$0xff] %v5202_v1  ;;  %5722 = vst [vmem:[#allocation46_spill] sm:$0xff] %v5204_v25  ;;  %v5220_v1 = vld [vmem:[%s5211_s10 + $0x8] sm:$0xff]  }
 0x1bb   : > { %v5213_v22 = vpop.f32.mrf.mxu0  ;;  %v5215_v49 = vpop.f32.mrf.mxu1 }
 0x1bc   : > { %5723 = vst [vmem:[#allocation47_spill] sm:$0xff] %v5213_v22  ;;  %5724 = vst [vmem:[#allocation48_spill] sm:$0xff] %v5215_v49  ;;  %v5235_v22 = vld [vmem:[%s5211_s10 + $0x10] sm:$0xff]  }
 0x1bd   : > { %v5217_v21 = vpop.f32.mrf.mxu0  ;;  %v5222_v25 = vpop.f32.mrf.mxu1 }
 0x1be   : > { %5725 = vst [vmem:[#allocation49_spill] sm:$0xff] %v5217_v21  ;;  %5726 = vst [vmem:[#allocation50_spill] sm:$0xff] %v5222_v25  ;;  %v1981_v25 = vadd.f32 %v5099_v7, %v4999_v18  ;;  %v1985_v18 = vadd.f32 %v5115_v62, %v5011_v29  ;;  %v1986_v29 = vadd.f32 %v5123_v56, %v5017_v20 }
 0x1bf   : > { %v5229_v28 = vpop.f32.mrf.mxu0  ;;  %v5237_v49 = vpop.f32.mrf.mxu1  ;;  %v1991_v20 = vadd.f32 %v5127_v44, %v5020_v3  ;;  %v1989_v3 = vadd.f32 %v5131_v36, %v5023_v58 }
 0x1c0   : > { %5727 = vst [vmem:[#allocation51_spill] sm:$0xff] %v5229_v28  ;;  %5728 = vst [vmem:[#allocation52_spill] sm:$0xff] %v5237_v49  ;;  %v5255_v49 = vld [vmem:[%s5211_s10 + $0x30] sm:$0xff]   ;;  %v2194_v57 = vadd.f32 %v5091_v0, %v1981_v25  ;;  %v5733_v0 = vunpack.c.l.bf16 %v5225_v34 }
 0x1c1   : > { %v3858_v14 = vpop.f32.mrf.mxu0  ;;  %v5257_v21 = vpop.f32.mrf.mxu1 }
 0x1c2   : > { %5731 = vst [vmem:[#allocation55_spill] sm:$0xff] %v5257_v21 }
 0x1c3   : > { %v2510_v28 = vpop.f32.mrf.mxu0  ;;  %v3822_v38 = vpop.f32.mrf.mxu1 }
 0x1c4   : > { %v2419_v37 = vadd.f32 %v3822_v38, %v2196_v32  ;;  %v2197_v38 = vadd.f32 %v5097_v13, %v1984_v51  ;;  %v2195_v13 = vadd.f32 %v5101_v8, %v1982_v41  ;;  %v5732_v8 = vunpack.c.l.bf16 %v5220_v1 }
 0x1c5   : > { %v3859_v21 = vpop.f32.mrf.mxu0  ;;  %v2290_v52 = vpop.f32.mrf.mxu1 }
 0x1c6   : > { %v2639_v32 = vadd.f32 %v3858_v14, %v2419_v37  ;;  %v2417_v16 = vadd.f32 %v2290_v52, %v2194_v57  ;;  %v5310_v57 = vld [vmem:[%s5211_s10 + $0x60] sm:$0xff]  }
 0x1c7   : > { %v2513_v7 = vpop.f32.mrf.mxu0  ;;  %v3823_v25 = vpop.f32.mrf.mxu1  ;;  %v3373_v62 = vunpack.c.l.bf16 %v5310_v57 }
 0x1c8   : > { %v2678_v37 = vadd.f32 %v5291_v35, %v2639_v32  ;;  %v2637_v14 = vadd.f32 %v2510_v28, %v2417_v16  ;;  %v2420_v51 = vadd.f32 %v3823_v25, %v2197_v38  ;;  %v2200_v32 = vadd.f32 %v5105_v12, %v1987_v60 }
 0x1c9   : > { %v3862_v52 = vpop.f32.mrf.mxu0  ;;  %v2293_v17 = vpop.f32.mrf.mxu1  ;;  %v2201_v60 = vadd.f32 %v5113_v26, %v1988_v54 }
 0x1ca   : > { %v2774_v41 = vadd.f32 %v5732_v8, %v2678_v37  ;;  %v2676_v28 = vadd.f32 %v5291_v35, %v2637_v14  ;;  %v2640_v16 = vadd.f32 %v3859_v21, %v2420_v51  ;;  %v2418_v25 = vadd.f32 %v2293_v17, %v2195_v13 }
 0x1cb   : > { %v2526_v38 = vpop.f32.mrf.mxu0  ;;  %v3826_v63 = vpop.f32.mrf.mxu1  ;;  %v2198_v13 = vadd.f32 %v5109_v4, %v1985_v18  ;;  %v2199_v18 = vadd.f32 %v5117_v30, %v1986_v29  ;;  %v1992_v30 = vadd.f32 %v5135_v33, %v5026_v47 }
 0x1cc   : > { %v2806_v39 = vmax.f32 %v2774_v41, 0.0  ;;  %v2772_v37 = vadd.f32 %v5733_v0, %v2676_v28  ;;  %v2679_v14 = vadd.f32 %v5291_v35, %v2640_v16  ;;  %v2638_v21 = vadd.f32 %v2513_v7, %v2418_v25 }
 0x1cd   : > { %v3863_v51 = vpop.f32.mrf.mxu0  ;;  %v2423_v12 = vadd.f32 %v3826_v63, %v2200_v32  ;;  %v2306_v56 = vpop.f32.mrf.mxu1  ;;  %v5734_v7 = vunpack.c.h.bf16 %v5220_v1  ;;  %v5735_v16 = vunpack.c.h.bf16 %v5225_v34  ;;  %v2204_v63 = vadd.f32 %v5121_v10, %v1991_v20 }
 0x1ce   : > { %v3293_v0 = vpack.c.bf16 %v2806_v39, %v2806_v39  ;;  %v2804_v17 = vmax.f32 %v2772_v37, 0.0  ;;  %v2677_v4 = vadd.f32 %v5291_v35, %v2638_v21  ;;  %v2421_v54 = vadd.f32 %v2306_v56, %v2198_v13 }
 0x1cf   : > { %v2775_v8 = vadd.f32 %v5734_v7, %v2679_v14  ;;  %v2529_v26 = vpop.f32.mrf.mxu0  ;;  %v2643_v44 = vadd.f32 %v3862_v52, %v2423_v12  ;;  %v3827_v41 = vpop.f32.mrf.mxu1  ;;  %v2202_v13 = vadd.f32 %v5125_v6, %v1989_v3  ;;  %v1990_v10 = vadd.f32 %v5139_v9, %v5029_v40 }
 0x1d0   : > { %2967 = vst.msk [vmem:[%s5338_s17 + $0x8] sm:$0xf] %vm2964_vm3, %v3293_v0  ;;  %v3291_v28 = vpack.c.bf16 %v2804_v17, %v2804_v17  ;;  %v2773_v1 = vadd.f32 %v5735_v16, %v2677_v4  ;;  %v2424_v25 = vadd.f32 %v3827_v41, %v2201_v60  ;;  %v2641_v36 = vadd.f32 %v2526_v38, %v2421_v54 }
 0x1d1   : > { %v2807_v39 = vmax.f32 %v2775_v8, 0.0  ;;  %v3866_v32 = vpop.f32.mrf.mxu0  ;;  %v2682_v58 = vadd.f32 %v5291_v35, %v2643_v44  ;;  %v2309_v52 = vpop.f32.mrf.mxu1  ;;  %v5736_v60 = vunpack.c.l.bf16 %v5232_v15  ;;  %v2205_v6 = vadd.f32 %v5129_v55, %v1992_v30 }
 0x1d2   : > { %2965 = vst.msk [vmem:[%s5338_s17] sm:$0xf] %vm2964_vm3, %v3291_v28  ;;  %v2805_v37 = vmax.f32 %v2773_v1, 0.0  ;;  %v2644_v14 = vadd.f32 %v3863_v51, %v2424_v25  ;;  %v2422_v21 = vadd.f32 %v2309_v52, %v2199_v18  ;;  %v2680_v33 = vadd.f32 %v5291_v35, %v2641_v36 }
 0x1d3   : > { %v3294_v29 = vpack.c.bf16 %v2807_v39, %v2807_v39  ;;  %v2542_v34 = vpop.f32.mrf.mxu0  ;;  %v2778_v47 = vadd.f32 %v5736_v60, %v2682_v58  ;;  %v3830_v38 = vpop.f32.mrf.mxu1  ;;  %v1995_v17 = vadd.f32 %v5143_v5, %v5032_v23  ;;  %v5737_v9 = vunpack.c.l.bf16 %v5235_v22 }
 0x1d4   : > { %v3292_v20 = vpack.c.bf16 %v2805_v37, %v2805_v37  ;;  %v2683_v12 = vadd.f32 %v5291_v35, %v2644_v14  ;;  %v2642_v51 = vadd.f32 %v2529_v26, %v2422_v21  ;;  %v2427_v56 = vadd.f32 %v3830_v38, %v2204_v63  ;;  %v5742_v21 = vld [vmem:[#allocation22_spill] sm:$0xff] }
 0x1d5   : > { %2968 = vst.msk [vmem:[%s5338_s17 + $0xc] sm:$0xf] %vm2964_vm3, %v3294_v29  ;;  %v3867_v0 = vpop.f32.mrf.mxu0  ;;  %v2810_v40 = vmax.f32 %v2778_v47, 0.0  ;;  %v2776_v7 = vadd.f32 %v5737_v9, %v2680_v33  ;;  %v2322_v8 = vpop.f32.mrf.mxu1  ;;  %v5738_v4 = vunpack.c.h.bf16 %v5232_v15  ;;  %v2203_v55 = vadd.f32 %v5133_v46, %v1990_v10  ;;  %v5743_v47 = vld [vmem:[#allocation53_spill] sm:$0xff] }
 0x1d6   : > { %2966 = vst.msk [vmem:[%s5338_s17 + $0x4] sm:$0xf] %vm2964_vm3, %v3292_v20  ;;  %v2681_v3 = vadd.f32 %v5291_v35, %v2642_v51  ;;  %v2647_v26 = vadd.f32 %v3866_v32, %v2427_v56  ;;  %v2425_v44 = vadd.f32 %v2322_v8, %v2202_v13  ;;  %v1993_v23 = vadd.f32 %v5147_v42, %v5035_v2  ;;  %v5745_v51 = vld [vmem:[#allocation19_spill] sm:$0xff]  ;;  %v5746_v56 = vld [vmem:[#allocation2_spill] sm:$0xff] }
 0x1d7   : > { %v2779_v18 = vadd.f32 %v5738_v4, %v2683_v12  ;;  %v2545_v54 = vpop.f32.mrf.mxu0  ;;  %v3297_v5 = vpack.c.bf16 %v2810_v40, %v2810_v40  ;;  %v2808_v41 = vmax.f32 %v2776_v7, 0.0  ;;  %v3831_v28 = vpop.f32.mrf.mxu1  ;;  %v5739_v16 = vunpack.c.h.bf16 %v5235_v22 }
 0x1d8   : > { %v2686_v15 = vadd.f32 %v5291_v35, %v2647_v26  ;;  %v2645_v25 = vadd.f32 %v2542_v34, %v2425_v44  ;;  %v2208_v32 = vadd.f32 %v5137_v11, %v1995_v17  ;;  %v1996_v46 = vadd.f32 %v5151_v61, %v5038_v43  ;;  %v5741_v11 = vld [vmem:[#allocation3_spill] sm:$0xff]  ;;  %v5748_v26 = vld [vmem:[#allocation20_spill] sm:$0xff] }
 0x1d9   : > { %v2811_v39 = vmax.f32 %v2779_v18, 0.0  ;;  %v2777_v1 = vadd.f32 %v5739_v16, %v2681_v3  ;;  %v3870_v63 = vpop.f32.mrf.mxu0  ;;  %2971 = vst.msk [vmem:[%s5338_s17 + $0x18] sm:$0xf] %vm2964_vm3, %v3297_v5  ;;  %v3295_v2 = vpack.c.bf16 %v2808_v41, %v2808_v41  ;;  %v2428_v42 = vadd.f32 %v3831_v28, %v2205_v6  ;;  %v2325_v30 = vpop.f32.mrf.mxu1  ;;  %v5747_v6 = vld [vmem:[#allocation24_spill] sm:$0xff] }
 0x1da   : > { %v5740_v22 = vunpack.c.l.bf16 %v5241_v50  ;;  %v2684_v29 = vadd.f32 %v5291_v35, %v2645_v25  ;;  %v2206_v14 = vadd.f32 %v5141_v48, %v1993_v23  ;;  %v1994_v34 = vadd.f32 %v5742_v21, %v5741_v11  ;;  %v5750_v23 = vld [vmem:[#allocation26_spill] sm:$0xff] }
 0x1db   : > { %v3298_v58 = vpack.c.bf16 %v2811_v39, %v2811_v39  ;;  %v2809_v36 = vmax.f32 %v2777_v1, 0.0  ;;  %v2558_v37 = vpop.f32.mrf.mxu0  ;;  %2969 = vst.msk [vmem:[%s5338_s17 + $0x10] sm:$0xf] %vm2964_vm3, %v3295_v2  ;;  %v2648_v43 = vadd.f32 %v3867_v0, %v2428_v42  ;;  %v2426_v61 = vadd.f32 %v2325_v30, %v2203_v55  ;;  %v3834_v13 = vpop.f32.mrf.mxu1  ;;  %v5749_v55 = vld [vmem:[#allocation4_spill] sm:$0xff]  ;;  %v5753_v2 = vld [vmem:[#allocation5_spill] sm:$0xff] }
 0x1dc   : > { %v2782_v52 = vadd.f32 %v5740_v22, %v2686_v15  ;;  %v5744_v33 = vunpack.c.l.bf16 %v5743_v47  ;;  %v2431_v20 = vadd.f32 %v3834_v13, %v2208_v32  ;;  %v2209_v48 = vadd.f32 %v5745_v51, %v1996_v46  ;;  %v5752_v32 = vld [vmem:[#allocation21_spill] sm:$0xff]  ;;  %v5754_v42 = vld [vmem:[#allocation28_spill] sm:$0xff]  ;;  %v5759_v13 = vld [vmem:[#allocation6_spill] sm:$0xff] }
 0x1dd   : > { %2972 = vst.msk [vmem:[%s5338_s17 + $0x1c] sm:$0xf] %vm2964_vm3, %v3298_v58  ;;  %v3296_v10 = vpack.c.bf16 %v2809_v36, %v2809_v36  ;;  %v3871_v12 = vpop.f32.mrf.mxu0  ;;  %v1999_v17 = vadd.f32 %v5747_v6, %v5746_v56  ;;  %v2687_v40 = vadd.f32 %v5291_v35, %v2648_v43  ;;  %v2646_v0 = vadd.f32 %v2545_v54, %v2426_v61  ;;  %v2338_v9 = vpop.f32.mrf.mxu1  ;;  %v5758_v43 = vld [vmem:[#allocation23_spill] sm:$0xff] }
 0x1de   : > { %v2814_v60 = vmax.f32 %v2782_v52, 0.0  ;;  %v2780_v38 = vadd.f32 %v5744_v33, %v2684_v29  ;;  %v2651_v4 = vadd.f32 %v3870_v63, %v2431_v20  ;;  %v2429_v18 = vadd.f32 %v2338_v9, %v2206_v14  ;;  %v5756_v52 = vld [vmem:[#allocation54_spill] sm:$0xff]  ;;  %v5764_v9 = vld [vmem:[#allocation32_spill] sm:$0xff] }
 0x1df   : > { %2970 = vst.msk [vmem:[%s5338_s17 + $0x14] sm:$0xf] %vm2964_vm3, %v3296_v10  ;;  %v2561_v3 = vpop.f32.mrf.mxu0  ;;  %v2207_v44 = vadd.f32 %v5748_v26, %v1994_v34  ;;  %v1997_v5 = vadd.f32 %v5750_v23, %v5749_v55  ;;  %v5751_v41 = vunpack.c.h.bf16 %v5241_v50  ;;  %v2685_v39 = vadd.f32 %v5291_v35, %v2646_v0  ;;  %v3835_v54 = vpop.f32.mrf.mxu1  ;;  %v5760_v10 = vld [vmem:[#allocation30_spill] sm:$0xff]  ;;  %v5763_v0 = vld [vmem:[#allocation7_spill] sm:$0xff] }
 0x1e0   : > { %v3301_v7 = vpack.c.bf16 %v2814_v60, %v2814_v60  ;;  %v2812_v8 = vmax.f32 %v2780_v38, 0.0  ;;  %v2690_v1 = vadd.f32 %v5291_v35, %v2651_v4  ;;  %v2649_v15 = vadd.f32 %v2558_v37, %v2429_v18 }
 0x1e1   : > { %v2783_v28 = vadd.f32 %v5751_v41, %v2687_v40  ;;  %v2432_v25 = vadd.f32 %v3835_v54, %v2209_v48  ;;  %v3874_v63 = vpop.f32.mrf.mxu0  ;;  %v2212_v46 = vadd.f32 %v5752_v32, %v1999_v17  ;;  %v2000_v30 = vadd.f32 %v5754_v42, %v5753_v2  ;;  %v2341_v22 = vpop.f32.mrf.mxu1  ;;  %v5766_v41 = vld [vmem:[#allocation27_spill] sm:$0xff]  ;;  %v5768_v54 = vld [vmem:[#allocation34_spill] sm:$0xff] }
 0x1e2   : > { %2975 = vst.msk [vmem:[%s5338_s17 + $0x28] sm:$0xf] %vm2964_vm3, %v3301_v7  ;;  %v3299_v16 = vpack.c.bf16 %v2812_v8, %v2812_v8  ;;  %v5755_v50 = vunpack.c.h.bf16 %v5743_v47  ;;  %v5757_v29 = vunpack.c.l.bf16 %v5756_v52  ;;  %v2688_v11 = vadd.f32 %v5291_v35, %v2649_v15 }
 0x1e3   : > { %v2815_v58 = vmax.f32 %v2783_v28, 0.0  ;;  %v2652_v37 = vadd.f32 %v3871_v12, %v2432_v25  ;;  %v2430_v21 = vadd.f32 %v2341_v22, %v2207_v44  ;;  %v2574_v34 = vpop.f32.mrf.mxu0  ;;  %v2210_v61 = vadd.f32 %v5758_v43, %v1997_v5  ;;  %v3838_v38 = vpop.f32.mrf.mxu1  ;;  %v5762_v12 = vld [vmem:[#allocation25_spill] sm:$0xff] }
 0x1e4   : > { %v2781_v36 = vadd.f32 %v5755_v50, %v2685_v39  ;;  %2973 = vst.msk [vmem:[%s5338_s17 + $0x20] sm:$0xf] %vm2964_vm3, %v3299_v16  ;;  %v2786_v14 = vadd.f32 %v5757_v29, %v2690_v1  ;;  %v1998_v60 = vadd.f32 %v5760_v10, %v5759_v13  ;;  %v5761_v51 = vunpack.c.l.bf16 %v5255_v49  ;;  %v5767_v39 = vld [vmem:[#allocation8_spill] sm:$0xff]  ;;  %v5770_v50 = vld [vmem:[#allocation29_spill] sm:$0xff]  ;;  %v5773_v13 = vld [vmem:[#allocation31_spill] sm:$0xff] }
 0x1e5   : > { %v3302_v33 = vpack.c.bf16 %v2815_v58, %v2815_v58  ;;  %v2691_v56 = vadd.f32 %v5291_v35, %v2652_v37  ;;  %v2650_v6 = vadd.f32 %v2561_v3, %v2430_v21  ;;  %v3875_v17 = vpop.f32.mrf.mxu0  ;;  %v2213_v40 = vadd.f32 %v5762_v12, %v2000_v30  ;;  %v2354_v18 = vpop.f32.mrf.mxu1  ;;  %v5771_v22 = vld [vmem:[#allocation9_spill] sm:$0xff] }
 0x1e6   : > { %v2813_v47 = vmax.f32 %v2781_v36, 0.0  ;;  %v2818_v20 = vmax.f32 %v2786_v14, 0.0  ;;  %v2784_v48 = vadd.f32 %v5761_v51, %v2688_v11  ;;  %v2003_v7 = vadd.f32 %v5764_v9, %v5763_v0  ;;  %v5778_v9 = vld [vmem:[#allocation11_spill] sm:$0xff] }
 0x1e7   : > { %2976 = vst.msk [vmem:[%s5338_s17 + $0x2c] sm:$0xf] %vm2964_vm3, %v3302_v33  ;;  %v2435_v4 = vadd.f32 %v3838_v38, %v2212_v46  ;;  %v5765_v55 = vunpack.c.h.bf16 %v5756_v52  ;;  %v2689_v5 = vadd.f32 %v5291_v35, %v2650_v6  ;;  %v2577_v3 = vpop.f32.mrf.mxu0  ;;  %v2211_v28 = vadd.f32 %v5766_v41, %v1998_v60  ;;  %v3839_v25 = vpop.f32.mrf.mxu1  ;;  %v5772_v52 = vld [vmem:[#allocation36_spill] sm:$0xff]  ;;  %v5774_v60 = vld [vmem:[#allocation10_spill] sm:$0xff] }
 0x1e8   : > { %v3300_v8 = vpack.c.bf16 %v2813_v47, %v2813_v47  ;;  %v3305_v26 = vpack.c.bf16 %v2818_v20, %v2818_v20  ;;  %v2816_v44 = vmax.f32 %v2784_v48, 0.0  ;;  %v2001_v16 = vadd.f32 %v5768_v54, %v5767_v39  ;;  %v5775_v33 = vld [vmem:[#allocation38_spill] sm:$0xff]  ;;  %v5782_v39 = vld [vmem:[#allocation35_spill] sm:$0xff] }
 0x1e9   : > { %v2787_v23 = vadd.f32 %v5765_v55, %v2691_v56  ;;  %v2655_v1 = vadd.f32 %v3874_v63, %v2435_v4  ;;  %v2433_v15 = vadd.f32 %v2354_v18, %v2210_v61  ;;  %v5769_v2 = vunpack.c.h.bf16 %v5255_v49  ;;  %v3878_v58 = vpop.f32.mrf.mxu0  ;;  %v2357_v11 = vpop.f32.mrf.mxu1 }
 0x1ea   : > { %2974 = vst.msk [vmem:[%s5338_s17 + $0x24] sm:$0xf] %vm2964_vm3, %v3300_v8  ;;  %2979 = vst.msk [vmem:[%s5338_s17 + $0x38] sm:$0xf] %vm2964_vm3, %v3305_v26  ;;  %v3303_v32 = vpack.c.bf16 %v2816_v44, %v2816_v44  ;;  %v2436_v30 = vadd.f32 %v3839_v25, %v2213_v40  ;;  %v2216_v36 = vadd.f32 %v5770_v50, %v2003_v7  ;;  %v5776_v38 = vunpack.c.l.bf16 %v5269_v19  ;;  %v5777_v40 = vld [vmem:[#allocation33_spill] sm:$0xff]  ;;  %v5779_v7 = vld [vmem:[#allocation40_spill] sm:$0xff] }
 0x1eb   : > { %v2819_v46 = vmax.f32 %v2787_v23, 0.0  ;;  %v2785_v42 = vadd.f32 %v5769_v2, %v2689_v5  ;;  %v2004_v29 = vadd.f32 %v5772_v52, %v5771_v22  ;;  %v2694_v14 = vadd.f32 %v5291_v35, %v2655_v1  ;;  %v2590_v49 = vpop.f32.mrf.mxu0  ;;  %v5784_v1 = vld [vmem:[#allocation42_spill] sm:$0xff]  ;;  %v5787_v52 = vld [vmem:[#allocation13_spill] sm:$0xff] }
 0x1ec   : > { %v2653_v63 = vadd.f32 %v2574_v34, %v2433_v15  ;;  %2977 = vst.msk [vmem:[%s5338_s17 + $0x30] sm:$0xf] %vm2964_vm3, %v3303_v32  ;;  %v2656_v43 = vadd.f32 %v3875_v17, %v2436_v30  ;;  %v2434_v61 = vadd.f32 %v2357_v11, %v2211_v28  ;;  %v2214_v10 = vadd.f32 %v5773_v13, %v2001_v16  ;;  %v3842_v34 = vpop.f32.mrf.mxu1  ;;  %v5783_v16 = vld [vmem:[#allocation12_spill] sm:$0xff]  ;;  %v5789_v13 = vld [vmem:[#allocation39_spill] sm:$0xff] }
 0x1ed   : > { %v3306_v37 = vpack.c.bf16 %v2819_v46, %v2819_v46  ;;  %v2817_v21 = vmax.f32 %v2785_v42, 0.0  ;;  %v2002_v47 = vadd.f32 %v5775_v33, %v5774_v60  ;;  %v2790_v20 = vadd.f32 %v5776_v38, %v2694_v14  ;;  %v3879_v12 = vpop.f32.mrf.mxu0  ;;  %v5790_v60 = vld [vmem:[#allocation14_spill] sm:$0xff] }
 0x1ee   : > { %v2692_v51 = vadd.f32 %v5291_v35, %v2653_v63  ;;  %v2695_v56 = vadd.f32 %v5291_v35, %v2656_v43  ;;  %v2654_v6 = vadd.f32 %v2577_v3, %v2434_v61  ;;  %v2439_v17 = vadd.f32 %v3842_v34, %v2216_v36  ;;  %v2370_v44 = vpop.f32.mrf.mxu1  ;;  %v5791_v33 = vld [vmem:[#allocation46_spill] sm:$0xff] }
 0x1ef   : > { %2980 = vst.msk [vmem:[%s5338_s17 + $0x3c] sm:$0xf] %vm2964_vm3, %v3306_v37  ;;  %v3304_v48 = vpack.c.bf16 %v2817_v21, %v2817_v21  ;;  %v2217_v0 = vadd.f32 %v5777_v40, %v2004_v29  ;;  %v2007_v8 = vadd.f32 %v5779_v7, %v5778_v9  ;;  %v2822_v4 = vmax.f32 %v2790_v20, 0.0  ;;  %v2593_v28 = vpop.f32.mrf.mxu0  ;;  %v5788_v29 = vld [vmem:[#allocation44_spill] sm:$0xff]  ;;  %v5793_v40 = vld [vmem:[#allocation41_spill] sm:$0xff] }
 0x1f0   : > { %v5780_v18 = vunpack.c.l.bf16 %v5272_v31  ;;  %v5781_v55 = vunpack.c.h.bf16 %v5269_v19  ;;  %v2693_v5 = vadd.f32 %v5291_v35, %v2654_v6  ;;  %v2659_v3 = vadd.f32 %v3878_v58, %v2439_v17  ;;  %v3843_v46 = vpop.f32.mrf.mxu1  ;;  %v5786_v58 = vld [vmem:[#allocation37_spill] sm:$0xff] }
 0x1f1   : > { %2978 = vst.msk [vmem:[%s5338_s17 + $0x34] sm:$0xf] %vm2964_vm3, %v3304_v48  ;;  %v2437_v41 = vadd.f32 %v2370_v44, %v2214_v10  ;;  %v2215_v54 = vadd.f32 %v5782_v39, %v2002_v47  ;;  %v2005_v15 = vadd.f32 %v5784_v1, %v5783_v16  ;;  %v3309_v25 = vpack.c.bf16 %v2822_v4, %v2822_v4  ;;  %v3882_v36 = vpop.f32.mrf.mxu0 }
 0x1f2   : > { %v2788_v26 = vadd.f32 %v5780_v18, %v2692_v51  ;;  %v2791_v23 = vadd.f32 %v5781_v55, %v2695_v56  ;;  %v5785_v42 = vunpack.c.h.bf16 %v5272_v31  ;;  %v2698_v19 = vadd.f32 %v5291_v35, %v2659_v3  ;;  %v2373_v37 = vpop.f32.mrf.mxu1  ;;  %v5795_v3 = vld [vmem:[#allocation15_spill] sm:$0xff] }
 0x1f3   : > { %v2657_v50 = vadd.f32 %v2590_v49, %v2437_v41  ;;  %v2220_v22 = vadd.f32 %v5786_v58, %v2007_v8  ;;  %v2008_v14 = vadd.f32 %v5788_v29, %v5787_v52  ;;  %2983 = vst.msk [vmem:[%s5338_s17 + $0x48] sm:$0xf] %vm2964_vm3, %v3309_v25  ;;  %v2440_v11 = vadd.f32 %v3843_v46, %v2217_v0  ;;  %v2606_v49 = vpop.f32.mrf.mxu0  ;;  %v5796_v41 = vld [vmem:[#allocation48_spill] sm:$0xff] }
 0x1f4   : > { %v2820_v32 = vmax.f32 %v2788_v26, 0.0  ;;  %v2823_v2 = vmax.f32 %v2791_v23, 0.0  ;;  %v2789_v30 = vadd.f32 %v5785_v42, %v2693_v5  ;;  %v2794_v31 = vadd.f32 %v3369_v27, %v2698_v19  ;;  %v3846_v51 = vpop.f32.mrf.mxu1  ;;  %v5794_v23 = vld [vmem:[#allocation43_spill] sm:$0xff]  ;;  %v5798_v42 = vld [vmem:[#allocation16_spill] sm:$0xff] }
 0x1f5   : > { %v2696_v61 = vadd.f32 %v5291_v35, %v2657_v50  ;;  %v2218_v10 = vadd.f32 %v5789_v13, %v2005_v15  ;;  %v2006_v47 = vadd.f32 %v5791_v33, %v5790_v60  ;;  %v2660_v38 = vadd.f32 %v3879_v12, %v2440_v11  ;;  %v3883_v17 = vpop.f32.mrf.mxu0  ;;  %v5800_v50 = vld [vmem:[#allocation17_spill] sm:$0xff] }
 0x1f6   : > { %v3307_v63 = vpack.c.bf16 %v2820_v32, %v2820_v32  ;;  %v3310_v21 = vpack.c.bf16 %v2823_v2, %v2823_v2  ;;  %v2821_v43 = vmax.f32 %v2789_v30, 0.0  ;;  %v2438_v20 = vadd.f32 %v2373_v37, %v2215_v54  ;;  %v2386_v8 = vpop.f32.mrf.mxu1  ;;  %v5799_v30 = vld [vmem:[#allocation50_spill] sm:$0xff] }
 0x1f7   : > { %v2826_v48 = vmax.f32 %v2794_v31, 0.0  ;;  %v5792_v27 = vunpack.c.l.bf16 %v5286_v45  ;;  %v2443_v6 = vadd.f32 %v3846_v51, %v2220_v22  ;;  %v2221_v0 = vadd.f32 %v5793_v40, %v2008_v14  ;;  %v2609_v55 = vpop.f32.mrf.mxu0 }
 0x1f8   : > { %2981 = vst.msk [vmem:[%s5338_s17 + $0x40] sm:$0xf] %vm2964_vm3, %v3307_v63  ;;  %2984 = vst.msk [vmem:[%s5338_s17 + $0x4c] sm:$0xf] %vm2964_vm3, %v3310_v21  ;;  %v3308_v34 = vpack.c.bf16 %v2821_v43, %v2821_v43  ;;  %v2699_v9 = vadd.f32 %v5291_v35, %v2660_v38  ;;  %v2658_v7 = vadd.f32 %v2593_v28, %v2438_v20  ;;  %v3374_v12 = vunpack.c.h.bf16 %v5310_v57  ;;  %v3847_v1 = vpop.f32.mrf.mxu1  ;;  %v5804_v43 = vld [vmem:[#allocation45_spill] sm:$0xff] }
 0x1f9   : > { %v2792_v56 = vadd.f32 %v5792_v27, %v2696_v61  ;;  %v3313_v4 = vpack.c.bf16 %v2826_v48, %v2826_v48  ;;  %v2663_v26 = vadd.f32 %v3882_v36, %v2443_v6  ;;  %v2441_v44 = vadd.f32 %v2386_v8, %v2218_v10  ;;  %v3886_v2 = vpop.f32.mrf.mxu0  ;;  %v5801_v36 = vld [vmem:[#allocation52_spill] sm:$0xff]  ;;  %v5805_v61 = vld [vmem:[#allocation18_spill] sm:$0xff]  ;;  %v5807_v48 = vld [vmem:[#allocation47_spill] sm:$0xff] }
 0x1fa   : > { %2982 = vst.msk [vmem:[%s5338_s17 + $0x44] sm:$0xf] %vm2964_vm3, %v3308_v34  ;;  %v2219_v5 = vadd.f32 %v5794_v23, %v2006_v47  ;;  %v2011_v39 = vadd.f32 %v5796_v41, %v5795_v3  ;;  %v5797_v54 = vunpack.c.h.bf16 %v5283_v59  ;;  %v2697_v28 = vadd.f32 %v5291_v35, %v2658_v7  ;;  %v2389_v29 = vpop.f32.mrf.mxu1  ;;  %v3401_v34 = vld [vmem:[%s5211_s10 + $0x78] sm:$0xff]   ;;  %v3400_v8 = vld [vmem:[%s5211_s10 + $0x70] sm:$0xff]  }
 0x1fb   : > { %v2824_v18 = vmax.f32 %v2792_v56, 0.0  ;;  %2987 = vst.msk [vmem:[%s5338_s17 + $0x58] sm:$0xf] %vm2964_vm3, %v3313_v4  ;;  %v2702_v25 = vadd.f32 %v5291_v35, %v2663_v26  ;;  %v2661_v32 = vadd.f32 %v2606_v49, %v2441_v44  ;;  %v2444_v46 = vadd.f32 %v3847_v1, %v2221_v0  ;;  %v5806_v49 = vld [vmem:[#allocation55_spill] sm:$0xff]  ;;  %v2622_v33 = vpop.f32.mrf.mxu0  ;;  %v5808_v56 = vld [vmem:[#allocation49_spill] sm:$0xff] }
 0x1fc   : > { %v2795_v16 = vadd.f32 %v5797_v54, %v2699_v9  ;;  %v2009_v19 = vadd.f32 %v5799_v30, %v5798_v42  ;;  %v2012_v58 = vadd.f32 %v5801_v36, %v5800_v50  ;;  %v5802_v59 = vunpack.c.h.bf16 %v5286_v45  ;;  %v3850_v60 = vpop.f32.mrf.mxu1  ;;  %v5809_v4 = vld [vmem:[#allocation51_spill] sm:$0xff] }
 0x1fd   : > { %v3311_v15 = vpack.c.bf16 %v2824_v18, %v2824_v18  ;;  %v5803_v14 = vunpack.c.l.bf16 %v5300_v53  ;;  %v2700_v11 = vadd.f32 %v5291_v35, %v2661_v32  ;;  %v2664_v37 = vadd.f32 %v3883_v17, %v2444_v46 }
 0x1fe   : > { %v2827_v22 = vmax.f32 %v2795_v16, 0.0  ;;  %v2793_v52 = vadd.f32 %v5802_v59, %v2697_v28  ;;  %v2442_v21 = vadd.f32 %v2389_v29, %v2219_v5  ;;  %v2224_v31 = vadd.f32 %v5804_v43, %v2011_v39  ;;  %v2402_v0 = vpop.f32.mrf.mxu1  ;;  %v3887_v5 = vpop.f32.mrf.mxu0 }
 0x1ff   : > { %2985 = vst.msk [vmem:[%s5338_s17 + $0x50] sm:$0xf] %vm2964_vm3, %v3311_v15  ;;  %v2798_v63 = vadd.f32 %v5803_v14, %v2702_v25  ;;  %v2010_v13 = vadd.f32 %v5806_v49, %v5805_v61  ;;  %v2796_v38 = vadd.f32 %v3373_v62, %v2700_v11  ;;  %v2703_v20 = vadd.f32 %v5291_v35, %v2664_v37 }
 0x200   : > { %v3314_v10 = vpack.c.bf16 %v2827_v22, %v2827_v22  ;;  %v2825_v45 = vmax.f32 %v2793_v52, 0.0  ;;  %v2662_v51 = vadd.f32 %v2609_v55, %v2442_v21  ;;  %v2222_v27 = vadd.f32 %v5807_v48, %v2009_v19  ;;  %v3851_v23 = vpop.f32.mrf.mxu1  ;;  %v2625_v30 = vpop.f32.mrf.mxu0 }
 0x201   : > { %v2830_v47 = vmax.f32 %v2798_v63, 0.0  ;;  %v2225_v6 = vadd.f32 %v5808_v56, %v2012_v58  ;;  %v2447_v40 = vadd.f32 %v3850_v60, %v2224_v31  ;;  %v2828_v7 = vmax.f32 %v2796_v38, 0.0 }
 0x202   : > { %2988 = vst.msk [vmem:[%s5338_s17 + $0x5c] sm:$0xf] %vm2964_vm3, %v3314_v10  ;;  %v3312_v17 = vpack.c.bf16 %v2825_v45, %v2825_v45  ;;  %v2799_v57 = vadd.f32 %v3378_v24, %v2703_v20  ;;  %v2701_v62 = vadd.f32 %v5291_v35, %v2662_v51  ;;  %v2223_v18 = vadd.f32 %v5809_v4, %v2010_v13  ;;  %v2405_v1 = vpop.f32.mrf.mxu1 }
 0x203   : > { %v3317_v9 = vpack.c.bf16 %v2830_v47, %v2830_v47  ;;  %v2667_v26 = vadd.f32 %v3886_v2, %v2447_v40  ;;  %v3385_v44 = vunpack.c.l.bf16 %v3401_v34  ;;  %v2445_v55 = vadd.f32 %v2402_v0, %v2222_v27 }
 0x204   : > { %2986 = vst.msk [vmem:[%s5338_s17 + $0x54] sm:$0xf] %vm2964_vm3, %v3312_v17  ;;  %v3315_v3 = vpack.c.bf16 %v2828_v7, %v2828_v7  ;;  %v2831_v41 = vmax.f32 %v2799_v57, 0.0  ;;  %v2797_v53 = vadd.f32 %v3374_v12, %v2701_v62  ;;  %v2448_v24 = vadd.f32 %v3851_v23, %v2225_v6 }
 0x205   : > { %2991 = vst.msk [vmem:[%s5338_s17 + $0x68] sm:$0xf] %vm2964_vm3, %v3317_v9  ;;  %v2706_v39 = vadd.f32 %v5291_v35, %v2667_v26  ;;  %v2665_v54 = vadd.f32 %v2622_v33, %v2445_v55  ;;  %v3381_v16 = vunpack.c.l.bf16 %v3400_v8  ;;  %v3386_v28 = vunpack.c.h.bf16 %v3401_v34 }
 0x206   : > { %2989 = vst.msk [vmem:[%s5338_s17 + $0x60] sm:$0xf] %vm2964_vm3, %v3315_v3  ;;  %v3318_v15 = vpack.c.bf16 %v2831_v41, %v2831_v41  ;;  %v2829_v25 = vmax.f32 %v2797_v53, 0.0  ;;  %v2668_v32 = vadd.f32 %v3887_v5, %v2448_v24  ;;  %v2446_v46 = vadd.f32 %v2405_v1, %v2223_v18 }
 0x207   : > { %v2802_v2 = vadd.f32 %v3385_v44, %v2706_v39  ;;  %v2704_v42 = vadd.f32 %v5291_v35, %v2665_v54  ;;  %v3382_v36 = vunpack.c.h.bf16 %v3400_v8 }
 0x208   : > { %2992 = vst.msk [vmem:[%s5338_s17 + $0x6c] sm:$0xf] %vm2964_vm3, %v3318_v15  ;;  %v3316_v12 = vpack.c.bf16 %v2829_v25, %v2829_v25  ;;  %v2707_v19 = vadd.f32 %v5291_v35, %v2668_v32  ;;  %v2666_v50 = vadd.f32 %v2625_v30, %v2446_v46 }
 0x209   : > { %v2834_v58 = vmax.f32 %v2802_v2, 0.0  ;;  %v2800_v22 = vadd.f32 %v3381_v16, %v2704_v42 }
 0x20a   : > { %2990 = vst.msk [vmem:[%s5338_s17 + $0x64] sm:$0xf] %vm2964_vm3, %v3316_v12  ;;  %v2803_v59 = vadd.f32 %v3386_v28, %v2707_v19  ;;  %v2705_v52 = vadd.f32 %v5291_v35, %v2666_v50 }
 0x20b   : > { %v3321_v29 = vpack.c.bf16 %v2834_v58, %v2834_v58  ;;  %v2832_v14 = vmax.f32 %v2800_v22, 0.0 }
 0x20c   : > { %v2835_v63 = vmax.f32 %v2803_v59, 0.0  ;;  %v2801_v11 = vadd.f32 %v3382_v36, %v2705_v52 }
 0x20d   : > { %2995 = vst.msk [vmem:[%s5338_s17 + $0x78] sm:$0xf] %vm2964_vm3, %v3321_v29  ;;  %v3319_v37 = vpack.c.bf16 %v2832_v14, %v2832_v14 }
 0x20e   : > { %v3322_v21 = vpack.c.bf16 %v2835_v63, %v2835_v63  ;;  %v2833_v43 = vmax.f32 %v2801_v11, 0.0 }
 0x20f   : > { %2993 = vst.msk [vmem:[%s5338_s17 + $0x70] sm:$0xf] %vm2964_vm3, %v3319_v37 }
 0x210   : > { %2996 = vst.msk [vmem:[%s5338_s17 + $0x7c] sm:$0xf] %vm2964_vm3, %v3322_v21  ;;  %v3320_v31 = vpack.c.bf16 %v2833_v43, %v2833_v43 }
 0x212   : > { %2994 = vst.msk [vmem:[%s5338_s17 + $0x74] sm:$0xf] %vm2964_vm3, %v3320_v31 }
 0x213 PF: > { %s14_s15 = sadd.s32 1, %s3961_s15  }
 0x214   : > { %p11_p4 = scmp.ge.s32.totalorder %s14_s15, 4  }
 0x216   :  { %13 = sbr.rel (!%p11_p4) target bundleno = 1 (0x1), region = 69 }

// kernel: fwd.7
= control target key start
LH: loop header
LB: loop body
LE: loop exit
PB: predicated region body
PF: predicated region fallthrough
CT: control target
= control target key end

     0   :  { %s860_s12 = smov 0   ;;  %s974_s0 = inlined_call_operand.vmem [shape: bf16[128,288], index: 0, kind: input, shape index: {}]   ;;  %s975_s1 = inlined_call_operand.vmem [shape: bf16[288,64], index: 1, kind: input, shape index: {}]   ;;  %s976_s2 = inlined_call_operand.vmem [shape: f32[1,64], index: 2, kind: input, shape index: {}]   ;;  %s977_s3 = inlined_call_operand.vmem [shape: bf16[128,64], index: 3, kind: output, shape index: {}]  }
   0x1 LB: > { %s653_s13 = sadd.s32 4294967295, %s838_s12   ;;  %p657_p0 = scmp.ge.s32.totalorder %s838_s12, 1  ;;  %s838_s12 = sphi %s860_s12, %s13_s12  }
   0x2   : > { %p139_p1 = scmp.lt.s32.totalorder %s838_s12, 3 }
   0x4   : > { %p140_p2 = pnand %p657_p0, %p139_p1 }
   0x5   : > { %s658_s16 = sshll.u32 (!%p140_p2), %s653_s13, 3 }
   0x6   : > { %143 = sbr.rel (%p140_p2) target bundleno = 270 (0x10e), region = 32  ;;  %p165_p3 = scmp.lt.s32.totalorder (!%p140_p2), %s658_s16, 15 }
   0xb   : > { %v798_v0 = vld [vmem:[%s975_s1 + $0x78] sm:$0xff]   ;;  %v800_v2 = vld [vmem:[%s975_s1 + $0x70] sm:$0xff]   ;;  %v802_v4 = vld [vmem:[%s975_s1 + $0x68] sm:$0xff]   ;;  %s979_s16 = smov (!%p165_p3, %s658_s16), 15  ;;  %vm405_vm0 = vcmask 261120   ;;  %vm588_vm1 = vcmask 519168  }
   0xc   : > { %v799_v1 = vld [vmem:[%s975_s1 + $0x38] sm:$0xff]   ;;  %715 = vmatprep.subr.bf16.mxu0 %v798_v0  ;;  %773 = vmatprep.subr.bf16.mxu1 %v798_v0  ;;  %v801_v3 = vld [vmem:[%s975_s1 + $0x30] sm:$0xff]   ;;  %v803_v5 = vld [vmem:[%s975_s1 + $0x28] sm:$0xff]   ;;  %s789_s29 = smul.u32 12, %s979_s16  ;;  %s661_s5 = sshll.u32 %s979_s16, 2 }
   0xd   : > { %716 = vmatpush3.bf16.msra.mxu0 %v799_v1  ;;  %781 = vmatpush3.bf16.msra.mxu1 %v799_v1  ;;  %v804_v6 = vld [vmem:[%s975_s1 + $0x60] sm:$0xff]   ;;  %v806_v8 = vld [vmem:[%s975_s1 + $0x58] sm:$0xff]   ;;  %v808_v10 = vld [vmem:[%s975_s1 + $0x50] sm:$0xff]   ;;  %s953_s8 = scalar_lea.vmem %s977_s3, %s661_s5 }
   0xe   : > { %717 = vmatprep.subr.bf16.mxu0 %v800_v2  ;;  %774 = vmatprep.subr.bf16.mxu1 %v800_v2  ;;  %v805_v7 = vld [vmem:[%s975_s1 + $0x20] sm:$0xff]   ;;  %s901_s9 = scalar_lea.vmem %s974_s0, %s789_s29  ;;  %v807_v9 = vld [vmem:[%s975_s1 + $0x18] sm:$0xff]   ;;  %v809_v13 = vld [vmem:[%s975_s1 + $0x10] sm:$0xff]  }
   0xf   : > { %v816_v11 = vld [vmem:[%s901_s9 + $0x4] ss:$12 sps:$4 sm:$0xff]   ;;  %v819_v12 = vld [vmem:[%s901_s9 + $0x4c] ss:$12 sps:$4 sm:$0xff]   ;;  %v817_v20 = vld [vmem:[%s901_s9 + $0x48] ss:$12 sps:$4 sm:$0xff]  }
  0x10   : > { %v810_v14 = vld [vmem:[%s975_s1 + $0x48] sm:$0xff]   ;;  %450 = vmatprep.mubr.bf16.mxu0 %v816_v11  ;;  %474 = vmatprep.mubr.bf16.mxu1 %v819_v12  ;;  %v812_v16 = vld [vmem:[%s975_s1 + $0x40] sm:$0xff]   ;;  %v830_v28 = vld [vmem:[%s901_s9 + $0x30] ss:$12 sps:$4 sm:$0xff]  }
  0x11   : > { %718 = vmatpush3.bf16.msra.mxu0 %v801_v3  ;;  %782 = vmatpush3.bf16.msra.mxu1 %v801_v3  ;;  %v811_v15 = vld [vmem:[%s975_s1 + $0x8] sm:$0xff]   ;;  %v813_v17 = vld [vmem:[%s975_s1] sm:$0xff]   ;;  %v831_v29 = vld [vmem:[%s901_s9 + $0x50] ss:$12 sps:$4 sm:$0xff]  }
  0x12   : > { %719 = vmatprep.subr.bf16.mxu0 %v802_v4  ;;  %775 = vmatprep.subr.bf16.mxu1 %v802_v4  ;;  %v820_v18 = vld [vmem:[%s975_s1 + $0x88] sm:$0xff]   ;;  %v821_v22 = vld [vmem:[%s975_s1 + $0x80] sm:$0xff]  }
  0x13   : > { %v814_v19 = vld [vmem:[%s901_s9] ss:$12 sps:$4 sm:$0xff]   ;;  %v822_v21 = vld [vmem:[%s901_s9 + $0x1c] ss:$12 sps:$4 sm:$0xff]   ;;  %v825_v24 = vld [vmem:[%s901_s9 + $0x18] ss:$12 sps:$4 sm:$0xff]  }
  0x14   : > { %v824_v23 = vld [vmem:[%s901_s9 + $0x8] ss:$12 sps:$4 sm:$0xff]   ;;  %v826_v25 = vld [vmem:[%s901_s9 + $0x20] ss:$12 sps:$4 sm:$0xff]   ;;  %v829_v27 = vld [vmem:[%s901_s9 + $0x38] ss:$12 sps:$4 sm:$0xff]  }
  0x15   : > { %720 = vmatpush3.bf16.msra.mxu0 %v803_v5  ;;  %783 = vmatpush3.bf16.msra.mxu1 %v803_v5  ;;  %v827_v26 = vld [vmem:[%s901_s9 + $0x34] ss:$12 sps:$4 sm:$0xff]  }
  0x16   : > { %721 = vmatprep.subr.bf16.mxu0 %v804_v6  ;;  %776 = vmatprep.subr.bf16.mxu1 %v804_v6  ;;  %v662_v39 = vld [vmem:[%s976_s2] ss:$0 sm:$0xff] }
  0x19   : > { %722 = vmatpush3.bf16.msra.mxu0 %v805_v7  ;;  %784 = vmatpush3.bf16.msra.mxu1 %v805_v7 }
  0x1a   : > { %723 = vmatprep.subr.bf16.mxu0 %v806_v8  ;;  %777 = vmatprep.subr.bf16.mxu1 %v806_v8 }
  0x1d   : > { %724 = vmatpush3.bf16.msra.mxu0 %v807_v9  ;;  %785 = vmatpush3.bf16.msra.mxu1 %v807_v9 }
  0x1e   : > { %725 = vmatprep.subr.bf16.mxu0 %v808_v10  ;;  %778 = vmatprep.subr.bf16.mxu1 %v808_v10 }
  0x21   : > { %726 = vmatpush3.bf16.msra.mxu0 %v809_v13  ;;  %786 = vmatpush3.bf16.msra.mxu1 %v809_v13 }
  0x22   : > { %727 = vmatprep.subr.bf16.mxu0 %v810_v14  ;;  %779 = vmatprep.subr.bf16.mxu1 %v810_v14 }
  0x25   : > { %728 = vmatpush3.bf16.msra.mxu0 %v811_v15  ;;  %787 = vmatpush3.bf16.msra.mxu1 %v811_v15 }
  0x26   : > { %729 = vmatprep.subr.bf16.mxu0 %v812_v16  ;;  %780 = vmatprep.subr.bf16.mxu1 %v812_v16 }
  0x29   : > { %730 = vmatpush3.bf16.msra.mxu0 %v813_v17  ;;  %788 = vmatpush3.bf16.msra.mxu1 %v813_v17 }
  0x2a   : > { %761 = vmatprep.subr.bf16.mxu1 %v820_v18 }
  0x2c   : > { %451 = vmatmul.mubr.bf16.vlgmr.msra.gmra.mxu0 %v814_v19  ;;  %475 = vmatmul.mubr.bf16.vlgmr.msra.gmra.mxu1 %v817_v20 }
  0x2d   : > { %762 = vmatpush3.bf16.msra.mxu1 %v820_v18  ;;  %458 = vmatprep.mubr.bf16.mxu0 %v822_v21 }
  0x2e   : > { %763 = vmatprep.subr.bf16.mxu1 %v821_v22  ;;  %765 = vmatprep.mubr.msk.bf16.mxu1 %vm405_vm0, %v824_v23 }
  0x31   : > { %764 = vmatpush3.bf16.msra.mxu1 %v821_v22 }
  0x34   : > { %459 = vmatmul.mubr.bf16.gmra.mxu0 %v825_v24  ;;  %766 = vmatmul.mubr.msk.bf16.vlgmr.msra.gmra.mxu1 %vm405_vm0, %v826_v25 }
  0x35   : > { %466 = vmatprep.mubr.bf16.mxu0 %v827_v26  ;;  %769 = vmatprep.mubr.msk.bf16.mxu1 %vm405_vm0, %v829_v27 }
  0x3c   : > { %467 = vmatmul.mubr.bf16.gmra.mxu0 %v830_v28  ;;  %770 = vmatmul.mubr.msk.bf16.gmra.mxu1 %vm405_vm0, %v831_v29 }
  0xec   : > { %v731_v30 = vpop.f32.mrf.mxu0  ;;  %v749_v31 = vpop.f32.mrf.mxu1 }
  0xee   : > { %v732_v32 = vpop.f32.mrf.mxu0  ;;  %v750_v33 = vpop.f32.mrf.mxu1 }
  0xef   : > { %v733_v36 = vadd.f32 %v732_v32, %v731_v30  ;;  %v751_v44 = vadd.f32 %v750_v33, %v749_v31 }
  0xf0   : > { %v734_v34 = vpop.f32.mrf.mxu0  ;;  %v752_v35 = vpop.f32.mrf.mxu1 }
  0xf1   : > { %v453_v43 = vadd.f32 %v733_v36, %v662_v39  ;;  %v477_v57 = vadd.f32 %v751_v44, %v662_v39 }
  0xf2   : > { %v735_v37 = vpop.f32.mrf.mxu0  ;;  %v753_v38 = vpop.f32.mrf.mxu1 }
  0xf3   : > { %v736_v42 = vadd.f32 %v735_v37, %v734_v34  ;;  %v754_v54 = vadd.f32 %v753_v38, %v752_v35 }
  0xf4   : > { %v737_v40 = vpop.f32.mrf.mxu0  ;;  %v767_v41 = vpop.f32.mrf.mxu1 }
  0xf5   : > { %v456_v53 = vadd.f32 %v736_v42, %v662_v39  ;;  %v480_v6 = vadd.f32 %v754_v54, %v662_v39 }
  0xf6   : > { %v738_v45 = vpop.f32.mrf.mxu0  ;;  %v517_v46 = vpop.f32.mrf.mxu1 }
  0xf7   : > { %v739_v47 = vadd.f32 %v738_v45, %v737_v40  ;;  %v518_v48 = vadd.f32 %v517_v46, %v453_v43 }
  0xf8   : > { %v740_v49 = vpop.f32.mrf.mxu0  ;;  %v768_v50 = vpop.f32.mrf.mxu1 }
  0xf9   : > { %v461_v51 = vadd.f32 %v739_v47, %v662_v39  ;;  %v548_v52 = vmax.f32 %v518_v48, 0.0 }
  0xfa   : > { %v741_v55 = vpop.f32.mrf.mxu0  ;;  %v520_v56 = vpop.f32.mrf.mxu1 }
  0xfb   : > { %v526_v58 = vadd.f32 %v767_v41, %v461_v51  ;;  %v707_v59 = vpack.c.bf16 %v548_v52, %v548_v52  ;;  %v742_v60 = vadd.f32 %v741_v55, %v740_v49  ;;  %v521_v61 = vadd.f32 %v520_v56, %v456_v53 }
  0xfc   : > { %v743_v62 = vpop.f32.mrf.mxu0  ;;  %v771_v63 = vpop.f32.mrf.mxu1 }
  0xfd   : > { %v550_v0 = vmax.f32 %v526_v58, 0.0  ;;  %589 = vst.msk [vmem:[%s953_s8] sm:$0xf] %vm588_vm1, %v707_v59  ;;  %v464_v1 = vadd.f32 %v742_v60, %v662_v39  ;;  %v549_v2 = vmax.f32 %v521_v61, 0.0  ;;  %v542_v3 = vadd.f32 %v771_v63, %v477_v57 }
  0xfe   : > { %v744_v4 = vpop.f32.mrf.mxu0  ;;  %v533_v5 = vpop.f32.mrf.mxu1 }
  0xff   : > { %v709_v7 = vpack.c.bf16 %v550_v0, %v550_v0  ;;  %v529_v8 = vadd.f32 %v768_v50, %v464_v1  ;;  %v708_v9 = vpack.c.bf16 %v549_v2, %v549_v2  ;;  %v554_v10 = vmax.f32 %v542_v3, 0.0 }
 0x100   : > { %v745_v11 = vadd.f32 %v744_v4, %v743_v62  ;;  %v746_v12 = vpop.f32.mrf.mxu0  ;;  %v772_v13 = vpop.f32.mrf.mxu1 }
 0x101   : > { %591 = vst.msk [vmem:[%s953_s8 + $0x8] sm:$0xf] %vm588_vm1, %v709_v7  ;;  %v551_v14 = vmax.f32 %v529_v8, 0.0  ;;  %590 = vst.msk [vmem:[%s953_s8 + $0x4] sm:$0xf] %vm588_vm1, %v708_v9  ;;  %v713_v15 = vpack.c.bf16 %v554_v10, %v554_v10  ;;  %v545_v16 = vadd.f32 %v772_v13, %v480_v6 }
 0x102   : > { %v469_v17 = vadd.f32 %v745_v11, %v662_v39  ;;  %v747_v18 = vpop.f32.mrf.mxu0  ;;  %v536_v26 = vpop.f32.mrf.mxu1 }
 0x103   : > { %v710_v19 = vpack.c.bf16 %v551_v14, %v551_v14  ;;  %595 = vst.msk [vmem:[%s953_s8 + $0x18] sm:$0xf] %vm588_vm1, %v713_v15  ;;  %v555_v20 = vmax.f32 %v545_v16, 0.0  ;;  %v748_v21 = vadd.f32 %v747_v18, %v746_v12 }
 0x104   : > { %v534_v22 = vadd.f32 %v533_v5, %v469_v17 }
 0x105   : > { %592 = vst.msk [vmem:[%s953_s8 + $0xc] sm:$0xf] %vm588_vm1, %v710_v19  ;;  %v714_v23 = vpack.c.bf16 %v555_v20, %v555_v20  ;;  %v472_v24 = vadd.f32 %v748_v21, %v662_v39 }
 0x106   : > { %v552_v25 = vmax.f32 %v534_v22, 0.0 }
 0x107   : > { %596 = vst.msk [vmem:[%s953_s8 + $0x1c] sm:$0xf] %vm588_vm1, %v714_v23  ;;  %v537_v27 = vadd.f32 %v536_v26, %v472_v24 }
 0x108   : > { %v711_v28 = vpack.c.bf16 %v552_v25, %v552_v25 }
 0x109   : > { %v553_v29 = vmax.f32 %v537_v27, 0.0 }
 0x10a   : > { %593 = vst.msk [vmem:[%s953_s8 + $0x10] sm:$0xf] %vm588_vm1, %v711_v28 }
 0x10b   : > { %v712_v30 = vpack.c.bf16 %v553_v29, %v553_v29 }
 0x10d   : > { %594 = vst.msk [vmem:[%s953_s8 + $0x14] sm:$0xf] %vm588_vm1, %v712_v30 }
 0x10e PF: > { %s13_s12 = sadd.s32 1, %s838_s12  }
 0x10f   : > { %p10_p4 = scmp.ge.s32.totalorder %s13_s12, 4  }
 0x111   :  { %12 = sbr.rel (!%p10_p4) target bundleno = 1 (0x1), region = 62 }

// kernel: fwd.9
= control target key start
LH: loop header
LB: loop body
LE: loop exit
PB: predicated region body
PF: predicated region fallthrough
CT: control target
= control target key end

     0   :  { %s1956_s15 = smov 0   ;;  %s2372_s0 = inlined_call_operand.vmem [shape: bf16[2,10,10,64], index: 0, kind: input, shape index: {}]   ;;  %s2373_s1 = inlined_call_operand.vmem [shape: bf16[576,64], index: 1, kind: input, shape index: {}]   ;;  %s2374_s2 = inlined_call_operand.vmem [shape: f32[1,64], index: 2, kind: input, shape index: {}]   ;;  %s2375_s3 = inlined_call_operand.vmem [shape: bf16[2,8,8,64], index: 3, kind: input, shape index: {}]   ;;  %s2376_s4 = inlined_call_operand.vmem [shape: bf16[2,8,8,64], index: 4, kind: output, shape index: {}]  }
   0x1 LB: > { %s1530_s16 = sadd.s32 4294967295, %s1929_s15   ;;  %p1534_p0 = scmp.ge.s32.totalorder %s1929_s15, 1  ;;  %s1929_s15 = sphi %s1956_s15, %s14_s15  }
   0x2   : > { %p172_p1 = scmp.lt.s32.totalorder %s1929_s15, 3 }
   0x4   : > { %p173_p2 = pnand %p1534_p0, %p172_p1 }
   0x5   : > { %p203_p3 = scmp.lt.s32.totalorder (!%p173_p2), %s1530_s16, 1 }
   0x6   : > { %176 = sbr.rel (%p173_p2) target bundleno = 303 (0x12f), region = 36 }
   0xb   : > { %v1878_v0 = vld [vmem:[%s2373_s1 + $0x38] sm:$0xff]   ;;  %v1880_v2 = vld [vmem:[%s2373_s1 + $0x30] sm:$0xff]   ;;  %s2378_s16 = smov (!%p203_p3, %s1530_s16), 1  ;;  %v1882_v4 = vld [vmem:[%s2373_s1 + $0x28] sm:$0xff]   ;;  %vm287_vm0 = vcmask 1046528   ;;  %vm356_vm1 = vcmask 523264  }
   0xc   : > { %v1879_v1 = vld [vmem:[%s2373_s1 + $0x18] sm:$0xff]   ;;  %1717 = vmatprep.subr.bf16.mxu0 %v1878_v0  ;;  %v1881_v3 = vld [vmem:[%s2373_s1 + $0x10] sm:$0xff]   ;;  %s1869_s27 = smul.u32 80, %s2378_s16  ;;  %v1883_v5 = vld [vmem:[%s2373_s1 + $0x8] sm:$0xff]   ;;  %vm535_vm2 = vcmask 1045504   ;;  %s1624_s22 = sshll.u32 %s2378_s16, 5 }
   0xd   : > { %1733 = vmatprep.subr.bf16.mxu1 %v1879_v1  ;;  %1718 = vmatpush3.bf16.msra.mxu0 %v1878_v0  ;;  %v1884_v6 = vld [vmem:[%s2373_s1 + $0x20] sm:$0xff]   ;;  %v1888_v29 = vld [vmem:[%s2373_s1 + $0x58] sm:$0xff]   ;;  %v1890_v49 = vld [vmem:[%s2373_s1 + $0x50] sm:$0xff]   ;;  %s212_s25 = scalar_lea.vmem %s2375_s3, %s1624_s22  ;;  %vm1454_vm3 = vcmask 519168   ;;  %s2351_s30 = scalar_lea.vmem %s2376_s4, %s1624_s22 }
   0xe   : > { %1734 = vmatpush3.bf16.msra.mxu1 %v1879_v1  ;;  %1719 = vmatprep.subr.bf16.mxu0 %v1880_v2  ;;  %s1991_s8 = scalar_lea.vmem %s2372_s0, %s1869_s27  ;;  %v1885_v7 = vld [vmem:[%s2373_s1] sm:$0xff]   ;;  %v1889_v34 = vld [vmem:[%s2373_s1 + $0x78] sm:$0xff]   ;;  %v1891_v53 = vld [vmem:[%s2373_s1 + $0x70] sm:$0xff]  }
   0xf   : > { %1735 = vmatprep.subr.bf16.mxu1 %v1881_v3  ;;  %v219_v8 = vld [vmem:[%s1991_s8] sm:$0xf]  ;;  %v220_v9 = vld [vmem:[%s1991_s8 + $0x4] sm:$0x1]  ;;  %v1999_v10 = vld [vmem:[%s1991_s8 + $0x8] sm:$0xf] }
  0x10   : > { %v222_v11 = vld [vmem:[%s1991_s8 + $0xc] sm:$0x1]  ;;  %v2003_v12 = vld [vmem:[%s1991_s8 + $0x10] sm:$0xf]  ;;  %v224_v13 = vld [vmem:[%s1991_s8 + $0x14] sm:$0x1]  ;;  %v239_v14 = vunpack.c.l.bf16 %v219_v8  ;;  %v240_v15 = vunpack.c.l.bf16 %v220_v9  ;;  %v241_v16 = vunpack.c.l.bf16 %v1999_v10  ;;  %v1540_v17 = vcombine.low %v219_v8, %v1999_v10 }
  0x11   : > { %1720 = vmatpush3.bf16.msra.mxu0 %v1880_v2  ;;  %v2009_v18 = vld [vmem:[%s1991_s8 + $0x18] sm:$0xf]  ;;  %v2012_v19 = vld [vmem:[%s1991_s8 + $0x1c] sm:$0x1]  ;;  %v2015_v20 = vld [vmem:[%s1991_s8 + $0x20] sm:$0xf]  ;;  %v242_v21 = vunpack.c.l.bf16 %v222_v11  ;;  %v243_v22 = vunpack.c.l.bf16 %v2003_v12  ;;  %v244_v23 = vunpack.c.l.bf16 %v224_v13 }
  0x12   : > { %1736 = vmatpush3.bf16.msra.mxu1 %v1881_v3  ;;  %1721 = vmatprep.subr.bf16.mxu0 %v1882_v4  ;;  %v2019_v24 = vld [vmem:[%s1991_s8 + $0x24] sm:$0x1]  ;;  %v245_v25 = vunpack.c.l.bf16 %v2009_v18  ;;  %v246_v26 = vunpack.c.l.bf16 %v2012_v19  ;;  %v247_v27 = vunpack.c.l.bf16 %v2015_v20  ;;  %v288_v28 = vrot.slane %v239_v14, 1  ;;  %v2061_v54 = vld [vmem:[%s1991_s8 + $0x28] sm:$0xf] }
  0x13   : > { %1737 = vmatprep.subr.bf16.mxu1 %v1883_v5  ;;  %1741 = vmatprep.mubr.msk.bf16.mxu1 %vm356_vm1, %v1540_v17  ;;  %v248_v30 = vunpack.c.l.bf16 %v2019_v24  ;;  %v289_v31 = vrot.slane %v240_v15, 1  ;;  %v291_v32 = vrot.slane %v241_v16, 1  ;;  %v292_v33 = vrot.slane %v242_v21, 1  ;;  %v230_v58 = vld [vmem:[%s1991_s8 + $0x2c] sm:$0x1]  ;;  %v1901_v24 = vld [vmem:[%s2373_s1 + $0xb8] sm:$0xff]  }
  0x14   : > { %v294_v35 = vrot.slane %v243_v22, 1  ;;  %v295_v36 = vrot.slane %v244_v23, 1  ;;  %v297_v37 = vrot.slane %v245_v25, 1  ;;  %v298_v38 = vrot.slane %v246_v26, 1  ;;  %v2071_v59 = vld [vmem:[%s1991_s8 + $0x30] sm:$0xf] }
  0x15   : > { %1722 = vmatpush3.bf16.msra.mxu0 %v1882_v4  ;;  %v290_v39 = vsel %vm287_vm0, %v288_v28, %v289_v31  ;;  %v2036_v40 = vsel %vm287_vm0, %v291_v32, %v292_v33  ;;  %v300_v43 = vrot.slane %v247_v27, 1  ;;  %v301_v45 = vrot.slane %v248_v30, 1  ;;  %v1894_v60 = vld [vmem:[%s2373_s1 + $0x48] sm:$0xff]   ;;  %v232_v0 = vld [vmem:[%s1991_s8 + $0x34] sm:$0x1]  ;;  %v1896_v31 = vld [vmem:[%s2373_s1 + $0x40] sm:$0xff]  }
  0x16   : > { %1738 = vmatpush3.bf16.msra.mxu1 %v1883_v5  ;;  %1723 = vmatprep.subr.bf16.mxu0 %v1884_v6  ;;  %v2039_v41 = vsel %vm287_vm0, %v294_v35, %v295_v36  ;;  %v2042_v42 = vsel %vm287_vm0, %v297_v37, %v298_v38  ;;  %v320_v44 = vpack.c.bf16 %v2036_v40, %v290_v39  ;;  %v536_v47 = vrot.slane %v239_v14, 2  ;;  %v2083_v1 = vld [vmem:[%s1991_s8 + $0x38] sm:$0xf]  ;;  %v234_v2 = vld [vmem:[%s1991_s8 + $0x3c] sm:$0x1]  ;;  %v1897_v32 = vld [vmem:[%s2373_s1 + $0x60] sm:$0xff]  }
  0x17   : > { %1739 = vmatprep.subr.bf16.mxu1 %v1885_v7  ;;  %v2051_v46 = vpack.c.bf16 %v2042_v42, %v2039_v41  ;;  %v537_v48 = vrot.slane %v240_v15, 2  ;;  %v539_v50 = vrot.slane %v241_v16, 2  ;;  %v540_v51 = vrot.slane %v242_v21, 2 }
  0x18   : > { %1725 = vmatprep.mubr.msk.bf16.mxu0 %vm356_vm1, %v320_v44  ;;  %v542_v52 = vrot.slane %v243_v22, 2  ;;  %v543_v55 = vrot.slane %v244_v23, 2  ;;  %v545_v56 = vrot.slane %v245_v25, 2  ;;  %v2067_v57 = vcombine.low %v2003_v12, %v2009_v18 }
  0x19   : > { %1724 = vmatpush3.bf16.msra.mxu0 %v1884_v6  ;;  %v249_v61 = vunpack.c.l.bf16 %v2061_v54  ;;  %v250_v62 = vunpack.c.l.bf16 %v230_v58  ;;  %v2079_v63 = vcombine.low %v2015_v20, %v2061_v54  ;;  %v251_v3 = vunpack.c.l.bf16 %v2071_v59 }
  0x1a   : > { %1740 = vmatpush3.bf16.msra.mxu1 %v1885_v7  ;;  %1749 = vmatprep.subr.bf16.mxu0 %v1888_v29  ;;  %v252_v4 = vunpack.c.l.bf16 %v232_v0  ;;  %v253_v5 = vunpack.c.l.bf16 %v2083_v1  ;;  %v254_v6 = vunpack.c.l.bf16 %v234_v2  ;;  %v1895_v7 = vld [vmem:[%s2373_s1 + $0x68] sm:$0xff]   ;;  %v2094_v8 = vsel %vm287_vm0, %v300_v43, %v301_v45  ;;  %v1909_v0 = vld [vmem:[%s2373_s1 + $0xa0] sm:$0xff]  }
  0x1b   : > { %1765 = vmatprep.subr.bf16.mxu1 %v1889_v34  ;;  %v303_v9 = vrot.slane %v249_v61, 1  ;;  %v304_v11 = vrot.slane %v250_v62, 1  ;;  %v306_v13 = vrot.slane %v251_v3, 1  ;;  %v546_v17 = vrot.slane %v246_v26, 2 }
  0x1c   : > { %1726 = vmatmul.mubr.msk.bf16.vlgmr.msra.gmra.mxu0 %vm356_vm1, %v2051_v46  ;;  %v307_v14 = vrot.slane %v252_v4, 1  ;;  %v309_v15 = vrot.slane %v253_v5, 1  ;;  %v310_v16 = vrot.slane %v254_v6, 1  ;;  %v538_v22 = vsel %vm535_vm2, %v536_v47, %v537_v48 }
  0x1d   : > { %1750 = vmatpush3.bf16.msra.mxu0 %v1888_v29  ;;  %1742 = vmatmul.mubr.msk.bf16.vlgmr.msra.gmra.mxu1 %vm356_vm1, %v2067_v57  ;;  %v2101_v21 = vsel %vm287_vm0, %v303_v9, %v304_v11  ;;  %v2105_v23 = vsel %vm535_vm2, %v539_v50, %v540_v51  ;;  %v2119_v19 = vcombine.low %v2071_v59, %v2083_v1  ;;  %v548_v35 = vrot.slane %v247_v27, 2  ;;  %v1902_v50 = vld [vmem:[%s2373_s1 + $0x90] sm:$0xff]  }
  0x1e   : > { %1751 = vmatprep.subr.bf16.mxu0 %v1890_v49  ;;  %1766 = vmatpush3.bf16.msra.mxu1 %v1889_v34  ;;  %v2109_v25 = vpack.c.bf16 %v2101_v21, %v2094_v8  ;;  %v2112_v28 = vsel %vm287_vm0, %v306_v13, %v307_v14  ;;  %v2115_v29 = vsel %vm287_vm0, %v309_v15, %v310_v16  ;;  %v549_v38 = vrot.slane %v248_v30, 2  ;;  %v1903_v51 = vld [vmem:[%s2373_s1 + $0xb0] sm:$0xff]  }
  0x1f   : > { %1745 = vmatprep.mubr.msk.bf16.mxu1 %vm356_vm1, %v2079_v63  ;;  %1767 = vmatprep.subr.bf16.mxu1 %v1891_v53  ;;  %v2123_v26 = vpack.c.bf16 %v2115_v29, %v2112_v28  ;;  %v568_v33 = vpack.c.bf16 %v2105_v23, %v538_v22  ;;  %v1568_v34 = vcombine.low %v1999_v10, %v2003_v12  ;;  %v551_v39 = vrot.slane %v249_v61, 2  ;;  %v1900_v12 = vld [vmem:[%s2373_s1 + $0x98] sm:$0xff]   ;;  %v236_v61 = vld [vmem:[%s1991_s8 + $0x44] sm:$0x1]  ;;  %v1912_v9 = vld [vmem:[%s2373_s1 + $0xd0] sm:$0xff]  }
  0x20   : > { %1729 = vmatprep.mubr.msk.bf16.mxu0 %vm356_vm1, %v2109_v25  ;;  %v2139_v36 = vsel %vm535_vm2, %v542_v52, %v543_v55  ;;  %v2144_v37 = vsel %vm535_vm2, %v545_v56, %v546_v17  ;;  %v552_v10 = vrot.slane %v250_v62, 2  ;;  %v2163_v30 = vsel %vm535_vm2, %v548_v35, %v549_v38  ;;  %v2190_v55 = vld [vmem:[%s1991_s8 + $0x40] sm:$0xf]  ;;  %v1906_v56 = vld [vmem:[%s2373_s1 + $0x88] sm:$0xff]  }
  0x21   : > { %1752 = vmatpush3.bf16.msra.mxu0 %v1890_v49  ;;  %v2156_v27 = vpack.c.bf16 %v2144_v37, %v2139_v36  ;;  %v554_v44 = vrot.slane %v251_v3, 2  ;;  %v555_v45 = vrot.slane %v252_v4, 2  ;;  %v1569_v47 = vcombine.low %v2009_v18, %v2015_v20  ;;  %v1914_v17 = vld [vmem:[%s2373_s1 + $0xc8] sm:$0xff]  }
  0x22   : > { %1753 = vmatprep.subr.bf16.mxu0 %v1894_v60  ;;  %1768 = vmatpush3.bf16.msra.mxu1 %v1891_v53  ;;  %v2166_v43 = vsel %vm535_vm2, %v551_v39, %v552_v10  ;;  %v557_v48 = vrot.slane %v253_v5, 2  ;;  %v558_v49 = vrot.slane %v254_v6, 2  ;;  %v1570_v18 = vcombine.low %v2061_v54, %v2071_v59  ;;  %v1907_v54 = vld [vmem:[%s2373_s1 + $0xa8] sm:$0xff]  }
  0x23   : > { %1769 = vmatprep.subr.bf16.mxu1 %v1895_v7  ;;  %v2178_v52 = vpack.c.bf16 %v2166_v43, %v2163_v30  ;;  %v556_v20 = vsel %vm535_vm2, %v554_v44, %v555_v45  ;;  %v1571_v59 = vcombine.low %v2083_v1, %v2190_v55  ;;  %v816_v62 = vpack.c.bf16 %v2039_v41, %v2036_v40  ;;  %v1910_v40 = vld [vmem:[%s2373_s1 + $0xd8] sm:$0xff]  }
  0x24   : > { %1730 = vmatmul.mubr.msk.bf16.gmra.mxu0 %vm356_vm1, %v2123_v26  ;;  %v2187_v53 = vsel %vm535_vm2, %v557_v48, %v558_v49  ;;  %v941_v1 = vpack.c.bf16 %v2139_v36, %v2105_v23  ;;  %v255_v2 = vunpack.c.l.bf16 %v2190_v55  ;;  %v256_v3 = vunpack.c.l.bf16 %v236_v61  ;;  %v1911_v41 = vld [vmem:[%s2373_s1 + $0xf8] sm:$0xff]   ;;  %v1919_v36 = vld [vmem:[%s2373_s1 + $0x110] sm:$0xff]  }
  0x25   : > { %1746 = vmatmul.mubr.msk.bf16.gmra.mxu1 %vm356_vm1, %v2119_v19  ;;  %1754 = vmatpush3.bf16.msra.mxu0 %v1894_v60  ;;  %v2202_v58 = vpack.c.bf16 %v2187_v53, %v556_v20  ;;  %v1908_v60 = vld [vmem:[%s2373_s1 + $0x80] sm:$0xff]   ;;  %v817_v4 = vpack.c.bf16 %v2094_v8, %v2042_v42  ;;  %v942_v5 = vpack.c.bf16 %v2163_v30, %v2144_v37  ;;  %v1913_v42 = vld [vmem:[%s2373_s1 + $0xf0] sm:$0xff]  }
  0x26   : > { %1770 = vmatpush3.bf16.msra.mxu1 %v1895_v7  ;;  %1755 = vmatprep.subr.bf16.mxu0 %v1896_v31  ;;  %v812_v6 = vrot.slane %v255_v2, 1  ;;  %v813_v7 = vrot.slane %v256_v3, 1  ;;  %v937_v11 = vrot.slane %v255_v2, 2  ;;  %v938_v13 = vrot.slane %v256_v3, 2 }
  0x27   : > { %1771 = vmatprep.subr.bf16.mxu1 %v1897_v32  ;;  %1757 = vmatprep.mubr.msk.bf16.mxu0 %vm356_vm1, %v568_v33  ;;  %v818_v8 = vpack.c.bf16 %v2112_v28, %v2101_v21  ;;  %v943_v14 = vpack.c.bf16 %v556_v20, %v2166_v43  ;;  %v1915_v21 = vld [vmem:[%s2373_s1 + $0xe8] sm:$0xff]   ;;  %v1916_v28 = vld [vmem:[%s2373_s1 + $0xc0] sm:$0xff]  }
  0x28   : > { %1773 = vmatprep.mubr.msk.bf16.mxu1 %vm356_vm1, %v1568_v34  ;;  %v814_v15 = vsel %vm287_vm0, %v812_v6, %v813_v7  ;;  %v2246_v16 = vsel %vm535_vm2, %v937_v11, %v938_v13  ;;  %v238_v33 = vld [vmem:[%s1991_s8 + $0x4c] sm:$0x1] }
  0x29   : > { %1756 = vmatpush3.bf16.msra.mxu0 %v1896_v31  ;;  %v819_v22 = vpack.c.bf16 %v814_v15, %v2115_v29  ;;  %v944_v23 = vpack.c.bf16 %v2246_v16, %v2187_v53  ;;  %v1917_v31 = vld [vmem:[%s2373_s1 + $0xe0] sm:$0xff]   ;;  %v1918_v29 = vld [vmem:[%s2373_s1 + $0x118] sm:$0xff]   ;;  %v258_v35 = vunpack.c.l.bf16 %v238_v33 }
  0x2a   : > { %1772 = vmatpush3.bf16.msra.mxu1 %v1897_v32  ;;  %1781 = vmatprep.subr.bf16.mxu0 %v1900_v12  ;;  %v237_v32 = vld [vmem:[%s1991_s8 + $0x48] sm:$0xf] }
  0x2b   : > { %1797 = vmatprep.subr.bf16.mxu1 %v1901_v24  ;;  %v257_v34 = vunpack.c.l.bf16 %v237_v32  ;;  %v1174_v38 = vrot.slane %v258_v35, 1  ;;  %v1287_v10 = vrot.slane %v258_v35, 2 }
  0x2c   : > { %1758 = vmatmul.mubr.msk.bf16.vlgmr.msra.gmra.mxu0 %vm356_vm1, %v2156_v27 }
  0x2d   : > { %1774 = vmatmul.mubr.msk.bf16.vlgmr.msra.gmra.mxu1 %vm356_vm1, %v1569_v47  ;;  %1782 = vmatpush3.bf16.msra.mxu0 %v1900_v12  ;;  %v1173_v37 = vrot.slane %v257_v34, 1  ;;  %v1286_v39 = vrot.slane %v257_v34, 2  ;;  %v1922_v12 = vld [vmem:[%s2373_s1 + $0x100] sm:$0xff]  }
  0x2e   : > { %1798 = vmatpush3.bf16.msra.mxu1 %v1901_v24  ;;  %1783 = vmatprep.subr.bf16.mxu0 %v1902_v50 }
  0x2f   : > { %1799 = vmatprep.subr.bf16.mxu1 %v1903_v51  ;;  %1761 = vmatprep.mubr.msk.bf16.mxu0 %vm356_vm1, %v2178_v52 }
  0x30   : > { %1777 = vmatprep.mubr.msk.bf16.mxu1 %vm356_vm1, %v1570_v18 }
  0x31   : > { %1784 = vmatpush3.bf16.msra.mxu0 %v1902_v50 }
  0x32   : > { %1800 = vmatpush3.bf16.msra.mxu1 %v1903_v51  ;;  %1785 = vmatprep.subr.bf16.mxu0 %v1906_v56 }
  0x33   : > { %1801 = vmatprep.subr.bf16.mxu1 %v1907_v54 }
  0x34   : > { %1762 = vmatmul.mubr.msk.bf16.gmra.mxu0 %vm356_vm1, %v2202_v58 }
  0x35   : > { %1778 = vmatmul.mubr.msk.bf16.gmra.mxu1 %vm356_vm1, %v1571_v59  ;;  %1786 = vmatpush3.bf16.msra.mxu0 %v1906_v56 }
  0x36   : > { %1802 = vmatpush3.bf16.msra.mxu1 %v1907_v54  ;;  %1787 = vmatprep.subr.bf16.mxu0 %v1908_v60 }
  0x37   : > { %1803 = vmatprep.subr.bf16.mxu1 %v1909_v0  ;;  %1789 = vmatprep.mubr.msk.bf16.mxu0 %vm356_vm1, %v816_v62 }
  0x38   : > { %1805 = vmatprep.mubr.msk.bf16.mxu1 %vm356_vm1, %v941_v1 }
  0x39   : > { %1788 = vmatpush3.bf16.msra.mxu0 %v1908_v60 }
  0x3a   : > { %1804 = vmatpush3.bf16.msra.mxu1 %v1909_v0  ;;  %1813 = vmatprep.subr.bf16.mxu0 %v1910_v40 }
  0x3b   : > { %1829 = vmatprep.subr.bf16.mxu1 %v1911_v41 }
  0x3c   : > { %1790 = vmatmul.mubr.msk.bf16.vlgmr.msra.gmra.mxu0 %vm356_vm1, %v817_v4 }
  0x3d   : > { %1806 = vmatmul.mubr.msk.bf16.vlgmr.msra.gmra.mxu1 %vm356_vm1, %v942_v5  ;;  %1814 = vmatpush3.bf16.msra.mxu0 %v1910_v40 }
  0x3e   : > { %1830 = vmatpush3.bf16.msra.mxu1 %v1911_v41  ;;  %1815 = vmatprep.subr.bf16.mxu0 %v1912_v9 }
  0x3f   : > { %1831 = vmatprep.subr.bf16.mxu1 %v1913_v42  ;;  %1793 = vmatprep.mubr.msk.bf16.mxu0 %vm356_vm1, %v818_v8 }
  0x40   : > { %1809 = vmatprep.mubr.msk.bf16.mxu1 %vm356_vm1, %v943_v14 }
  0x41   : > { %1816 = vmatpush3.bf16.msra.mxu0 %v1912_v9 }
  0x42   : > { %1832 = vmatpush3.bf16.msra.mxu1 %v1913_v42  ;;  %1817 = vmatprep.subr.bf16.mxu0 %v1914_v17 }
  0x43   : > { %1833 = vmatprep.subr.bf16.mxu1 %v1915_v21 }
  0x44   : > { %1794 = vmatmul.mubr.msk.bf16.gmra.mxu0 %vm356_vm1, %v819_v22 }
  0x45   : > { %1810 = vmatmul.mubr.msk.bf16.gmra.mxu1 %vm356_vm1, %v944_v23  ;;  %1818 = vmatpush3.bf16.msra.mxu0 %v1914_v17 }
  0x46   : > { %1834 = vmatpush3.bf16.msra.mxu1 %v1915_v21  ;;  %1819 = vmatprep.subr.bf16.mxu0 %v1916_v28 }
  0x47   : > { %1835 = vmatprep.subr.bf16.mxu1 %v1917_v31  ;;  %1821 = vmatprep.mubr.msk.bf16.mxu0 %vm356_vm1, %v2067_v57  ;;  %v1921_v57 = vld [vmem:[%s2373_s1 + $0x108] sm:$0xff]  }
  0x48   : > { %1837 = vmatprep.mubr.msk.bf16.mxu1 %vm356_vm1, %v2051_v46  ;;  %v1175_v46 = vsel %vm287_vm0, %v1173_v37, %v1174_v38 }
  0x49   : > { %1820 = vmatpush3.bf16.msra.mxu0 %v1916_v28 }
  0x4a   : > { %1836 = vmatpush3.bf16.msra.mxu1 %v1917_v31  ;;  %1845 = vmatprep.subr.bf16.mxu0 %v1918_v29 }
  0x4b   : > { %1861 = vmatprep.subr.bf16.mxu1 %v1918_v29 }
  0x4c   : > { %1822 = vmatmul.mubr.msk.bf16.vlgmr.msra.gmra.mxu0 %vm356_vm1, %v2079_v63  ;;  %v1596_v63 = vcombine.low %v2190_v55, %v237_v32 }
  0x4d   : > { %1838 = vmatmul.mubr.msk.bf16.vlgmr.msra.gmra.mxu1 %vm356_vm1, %v2109_v25  ;;  %1846 = vmatpush3.bf16.msra.mxu0 %v1918_v29  ;;  %v1177_v25 = vpack.c.bf16 %v1175_v46, %v814_v15 }
  0x4e   : > { %1865 = vmatpush3.bf16.msra.mxu1 %v1918_v29  ;;  %1847 = vmatprep.subr.bf16.mxu0 %v1919_v36 }
  0x4f   : > { %1862 = vmatprep.subr.bf16.mxu1 %v1919_v36  ;;  %1825 = vmatprep.mubr.msk.bf16.mxu0 %vm356_vm1, %v2119_v19  ;;  %v1288_v19 = vsel %vm535_vm2, %v1286_v39, %v1287_v10 }
  0x50   : > { %1841 = vmatprep.mubr.msk.bf16.mxu1 %vm356_vm1, %v2123_v26  ;;  %v1290_v26 = vpack.c.bf16 %v1288_v19, %v2246_v16 }
  0x51   : > { %1848 = vmatpush3.bf16.msra.mxu0 %v1919_v36 }
  0x52   : > { %1866 = vmatpush3.bf16.msra.mxu1 %v1919_v36  ;;  %1849 = vmatprep.subr.bf16.mxu0 %v1921_v57 }
  0x53   : > { %1863 = vmatprep.subr.bf16.mxu1 %v1921_v57 }
  0x54   : > { %1826 = vmatmul.mubr.msk.bf16.gmra.mxu0 %vm356_vm1, %v1596_v63 }
  0x55   : > { %1842 = vmatmul.mubr.msk.bf16.gmra.mxu1 %vm356_vm1, %v1177_v25  ;;  %1850 = vmatpush3.bf16.msra.mxu0 %v1921_v57 }
  0x56   : > { %1867 = vmatpush3.bf16.msra.mxu1 %v1921_v57  ;;  %1851 = vmatprep.subr.bf16.mxu0 %v1922_v12 }
  0x57   : > { %1864 = vmatprep.subr.bf16.mxu1 %v1922_v12  ;;  %1853 = vmatprep.mubr.msk.bf16.mxu0 %vm356_vm1, %v2156_v27 }
  0x58   : > { %1857 = vmatprep.mubr.msk.bf16.mxu1 %vm356_vm1, %v2202_v58 }
  0x59   : > { %1852 = vmatpush3.bf16.msra.mxu0 %v1922_v12 }
  0x5a   : > { %1868 = vmatpush3.bf16.msra.mxu1 %v1922_v12 }
  0x5c   : > { %1854 = vmatmul.mubr.msk.bf16.vlgmr.msra.gmra.mxu0 %vm356_vm1, %v2178_v52 }
  0x5d   : > { %1858 = vmatmul.mubr.msk.bf16.vlgmr.msra.gmra.mxu1 %vm356_vm1, %v1290_v26 }
  0xdc   : > { %v1727_v24 = vpop.f32.mrf.mxu0 }
  0xdd   : > { %v1743_v30 = vpop.f32.mrf.mxu1 }
  0xde   : > { %v403_v43 = vpop.f32.mrf.mxu0  ;;  %v513_v28 = vadd.f32 %v1743_v30, %v1727_v24 }
  0xdf   : > { %v504_v44 = vpop.f32.mrf.mxu1 }
  0xe0   : > { %v1728_v45 = vpop.f32.mrf.mxu0  ;;  %v505_v29 = vadd.f32 %v504_v44, %v403_v43 }
  0xe1   : > { %v1744_v47 = vpop.f32.mrf.mxu1 }
  0xe2   : > { %v406_v48 = vpop.f32.mrf.mxu0  ;;  %v516_v46 = vadd.f32 %v1744_v47, %v1728_v45 }
  0xe3   : > { %v507_v27 = vpop.f32.mrf.mxu1 }
  0xe4   : > { %v1731_v49 = vpop.f32.mrf.mxu0  ;;  %v508_v12 = vadd.f32 %v507_v27, %v406_v48 }
  0xe5   : > { %v1747_v50 = vpop.f32.mrf.mxu1 }
  0xe6   : > { %v419_v51 = vpop.f32.mrf.mxu0  ;;  %v529_v32 = vadd.f32 %v1747_v50, %v1731_v49 }
  0xe7   : > { %v520_v18 = vpop.f32.mrf.mxu1 }
  0xe8   : > { %v1732_v20 = vpop.f32.mrf.mxu0  ;;  %v521_v36 = vadd.f32 %v520_v18, %v419_v51 }
  0xe9   : > { %v1748_v53 = vpop.f32.mrf.mxu1 }
  0xea   : > { %v422_v55 = vpop.f32.mrf.mxu0  ;;  %v532_v25 = vadd.f32 %v1748_v53, %v1732_v20 }
  0xeb   : > { %v523_v56 = vpop.f32.mrf.mxu1 }
  0xec   : > { %v1759_v54 = vpop.f32.mrf.mxu0  ;;  %v524_v30 = vadd.f32 %v523_v56, %v422_v55 }
  0xed   : > { %v1775_v52 = vpop.f32.mrf.mxu1  ;;  %v683_v34 = vadd.f32 %v1759_v54, %v513_v28  ;;  %v2324_v28 = vld [vmem:[%s212_s25 + $0x18] sm:$0xff]  }
  0xee   : > { %v650_v58 = vpop.f32.mrf.mxu0 }
  0xef   : > { %v771_v59 = vpop.f32.mrf.mxu1  ;;  %v681_v57 = vadd.f32 %v650_v58, %v505_v29  ;;  %v804_v19 = vadd.f32 %v1775_v52, %v683_v34 }
  0xf0   : > { %v1760_v60 = vpop.f32.mrf.mxu0 }
  0xf1   : > { %v1776_v61 = vpop.f32.mrf.mxu1  ;;  %v684_v26 = vadd.f32 %v1760_v60, %v516_v46  ;;  %v802_v50 = vadd.f32 %v771_v59, %v681_v57 }
  0xf2   : > { %v653_v62 = vpop.f32.mrf.mxu0 }
  0xf3   : > { %v774_v0 = vpop.f32.mrf.mxu1  ;;  %v682_v51 = vadd.f32 %v653_v62, %v508_v12  ;;  %v805_v53 = vadd.f32 %v1776_v61, %v684_v26  ;;  %v2322_v61 = vld [vmem:[%s212_s25 + $0x8] sm:$0xff]  }
  0xf4   : > { %v1763_v1 = vpop.f32.mrf.mxu0  ;;  %v1632_v29 = vunpack.c.l.bf16 %v2322_v61  ;;  %v1633_v12 = vunpack.c.h.bf16 %v2322_v61 }
  0xf5   : > { %v1779_v2 = vpop.f32.mrf.mxu1  ;;  %v687_v37 = vadd.f32 %v1763_v1, %v529_v32  ;;  %v803_v52 = vadd.f32 %v774_v0, %v682_v51  ;;  %v2326_v32 = vld [vmem:[%s212_s25] sm:$0xff]  }
  0xf6   : > { %v666_v3 = vpop.f32.mrf.mxu0 }
  0xf7   : > { %v787_v40 = vpop.f32.mrf.mxu1  ;;  %v685_v39 = vadd.f32 %v666_v3, %v521_v36  ;;  %v808_v43 = vadd.f32 %v1779_v2, %v687_v37  ;;  %v1640_v36 = vunpack.c.l.bf16 %v2324_v28  ;;  %v1628_v37 = vunpack.c.l.bf16 %v2326_v32 }
  0xf8   : > { %v1764_v41 = vpop.f32.mrf.mxu0 }
  0xf9   : > { %v1780_v4 = vpop.f32.mrf.mxu1  ;;  %v688_v44 = vadd.f32 %v1764_v41, %v532_v25  ;;  %v806_v45 = vadd.f32 %v787_v40, %v685_v39 }
  0xfa   : > { %v669_v5 = vpop.f32.mrf.mxu0 }
  0xfb   : > { %v790_v6 = vpop.f32.mrf.mxu1  ;;  %v686_v47 = vadd.f32 %v669_v5, %v524_v30  ;;  %v809_v27 = vadd.f32 %v1780_v4, %v688_v44 }
  0xfc   : > { %v1791_v7 = vpop.f32.mrf.mxu0 }
  0xfd   : > { %v1807_v9 = vpop.f32.mrf.mxu1  ;;  %v931_v18 = vadd.f32 %v1791_v7, %v804_v19  ;;  %v807_v2 = vadd.f32 %v790_v6, %v686_v47  ;;  %v1629_v47 = vunpack.c.h.bf16 %v2326_v32 }
  0xfe   : > { %v898_v11 = vpop.f32.mrf.mxu0 }
  0xff   : > { %v1023_v13 = vpop.f32.mrf.mxu1  ;;  %v929_v1 = vadd.f32 %v898_v11, %v802_v50  ;;  %v1056_v59 = vadd.f32 %v1807_v9, %v931_v18 }
 0x100   : > { %v1792_v42 = vpop.f32.mrf.mxu0 }
 0x101   : > { %v2306_v8 = vpop.f32.mrf.mxu1  ;;  %v932_v60 = vadd.f32 %v1792_v42, %v805_v53  ;;  %v1054_v5 = vadd.f32 %v1023_v13, %v929_v1  ;;  %v2328_v42 = vld [vmem:[%s212_s25 + $0x10] sm:$0xff]  }
 0x102   : > { %v901_v14 = vpop.f32.mrf.mxu0  ;;  %v1636_v57 = vunpack.c.l.bf16 %v2328_v42 }
 0x103   : > { %v2308_v15 = vpop.f32.mrf.mxu1  ;;  %v930_v7 = vadd.f32 %v901_v14, %v803_v52  ;;  %v1057_v6 = vadd.f32 %v2306_v8, %v932_v60 }
 0x104   : > { %v1795_v16 = vpop.f32.mrf.mxu0 }
 0x105   : > { %v1811_v17 = vpop.f32.mrf.mxu1  ;;  %v935_v58 = vadd.f32 %v1795_v16, %v808_v43 }
 0x106   : > { %v914_v21 = vpop.f32.mrf.mxu0 }
 0x107   : > { %v1039_v22 = vpop.f32.mrf.mxu1  ;;  %v933_v55 = vadd.f32 %v914_v21, %v806_v45  ;;  %v1060_v3 = vadd.f32 %v1811_v17, %v935_v58 }
 0x108   : > { %v1796_v23 = vpop.f32.mrf.mxu0 }
 0x109   : > { %v2310_v31 = vpop.f32.mrf.mxu1  ;;  %v936_v40 = vadd.f32 %v1796_v23, %v809_v27  ;;  %v1058_v4 = vadd.f32 %v1039_v22, %v933_v55  ;;  %v1055_v22 = vadd.f32 %v2308_v15, %v930_v7 }
 0x10a   : > { %v917_v33 = vpop.f32.mrf.mxu0 }
 0x10b   : > { %v2312_v35 = vpop.f32.mrf.mxu1  ;;  %v934_v21 = vadd.f32 %v917_v33, %v807_v2  ;;  %v1061_v13 = vadd.f32 %v2310_v31, %v936_v40  ;;  %v1621_v31 = vld [vmem:[%s2374_s2] ss:$0 sm:$0xff] }
 0x10c   : > { %v1823_v38 = vpop.f32.mrf.mxu0 }
 0x10d   : > { %v1839_v63 = vpop.f32.mrf.mxu1  ;;  %v1165_v11 = vadd.f32 %v1823_v38, %v1056_v59  ;;  %v1059_v8 = vadd.f32 %v2312_v35, %v934_v21 }
 0x10e   : > { %v1132_v10 = vpop.f32.mrf.mxu0 }
 0x10f   : > { %v1247_v24 = vpop.f32.mrf.mxu1  ;;  %v1163_v17 = vadd.f32 %v1132_v10, %v1054_v5  ;;  %v1280_v33 = vadd.f32 %v1839_v63, %v1165_v11  ;;  %v1641_v63 = vunpack.c.h.bf16 %v2324_v28 }
 0x110   : > { %v1824_v49 = vpop.f32.mrf.mxu0 }
 0x111   : > { %v1840_v54 = vpop.f32.mrf.mxu1  ;;  %v1166_v38 = vadd.f32 %v1824_v49, %v1057_v6  ;;  %v1278_v19 = vadd.f32 %v1247_v24, %v1163_v17 }
 0x112   : > { %v1135_v20 = vpop.f32.mrf.mxu0 }
 0x113   : > { %v2315_v48 = vpop.f32.mrf.mxu1  ;;  %v1164_v26 = vadd.f32 %v1135_v20, %v1055_v22  ;;  %v1281_v50 = vadd.f32 %v1840_v54, %v1166_v38  ;;  %v1637_v20 = vunpack.c.h.bf16 %v2328_v42 }
 0x114   : > { %v1827_v56 = vpop.f32.mrf.mxu0 }
 0x115   : > { %v1843_v62 = vpop.f32.mrf.mxu1  ;;  %v1169_v0 = vadd.f32 %v1827_v56, %v1060_v3  ;;  %v1279_v27 = vadd.f32 %v2315_v48, %v1164_v26 }
 0x116   : > { %v1148_v41 = vpop.f32.mrf.mxu0 }
 0x117   : > { %v1263_v16 = vpop.f32.mrf.mxu1  ;;  %v1167_v14 = vadd.f32 %v1148_v41, %v1058_v4  ;;  %v1284_v25 = vadd.f32 %v1843_v62, %v1169_v0 }
 0x118   : > { %v1828_v9 = vpop.f32.mrf.mxu0 }
 0x119   : > { %v1844_v23 = vpop.f32.mrf.mxu1  ;;  %v1170_v39 = vadd.f32 %v1828_v9, %v1061_v13  ;;  %v1282_v43 = vadd.f32 %v1263_v16, %v1167_v14 }
 0x11a   : > { %v1151_v34 = vpop.f32.mrf.mxu0 }
 0x11b   : > { %v1266_v46 = vpop.f32.mrf.mxu1  ;;  %v1168_v44 = vadd.f32 %v1151_v34, %v1059_v8  ;;  %v1285_v58 = vadd.f32 %v1844_v23, %v1170_v39 }
 0x11c   : > { %v1855_v10 = vpop.f32.mrf.mxu0 }
 0x11d   : > { %v1393_v30 = vadd.f32 %v1855_v10, %v1280_v33  ;;  %v1859_v15 = vpop.f32.mrf.mxu1  ;;  %v1283_v60 = vadd.f32 %v1266_v46, %v1168_v44 }
 0x11e   : > { %v1397_v49 = vadd.f32 %v1859_v15, %v1284_v25  ;;  %v1360_v35 = vpop.f32.mrf.mxu0 }
 0x11f   : > { %v1408_v51 = vadd.f32 %v1621_v31, %v1393_v30  ;;  %v1391_v18 = vadd.f32 %v1360_v35, %v1278_v19  ;;  %v1376_v45 = vpop.f32.mrf.mxu1 }
 0x120   : > { %v1412_v53 = vadd.f32 %v1621_v31, %v1397_v49  ;;  %v1395_v1 = vadd.f32 %v1376_v45, %v1282_v43  ;;  %v1856_v24 = vpop.f32.mrf.mxu0 }
 0x121   : > { %v1432_v55 = vadd.f32 %v1632_v29, %v1408_v51  ;;  %v1406_v56 = vadd.f32 %v1621_v31, %v1391_v18  ;;  %v1394_v52 = vadd.f32 %v1856_v24, %v1281_v50  ;;  %v1860_v59 = vpop.f32.mrf.mxu1 }
 0x122   : > { %v1436_v54 = vadd.f32 %v1640_v36, %v1412_v53  ;;  %v1410_v62 = vadd.f32 %v1621_v31, %v1395_v1  ;;  %v1398_v2 = vadd.f32 %v1860_v59, %v1285_v58  ;;  %v1363_v3 = vpop.f32.mrf.mxu0 }
 0x123   : > { %v1440_v40 = vmax.f32 %v1432_v55, 0.0  ;;  %v1430_v41 = vadd.f32 %v1628_v37, %v1406_v56  ;;  %v1409_v61 = vadd.f32 %v1621_v31, %v1394_v52  ;;  %v1392_v5 = vadd.f32 %v1363_v3, %v1279_v27  ;;  %v1379_v7 = vpop.f32.mrf.mxu1 }
 0x124   : > { %v1444_v48 = vmax.f32 %v1436_v54, 0.0  ;;  %v1434_v11 = vadd.f32 %v1636_v57, %v1410_v62  ;;  %v1413_v16 = vadd.f32 %v1621_v31, %v1398_v2  ;;  %v1396_v28 = vadd.f32 %v1379_v7, %v1283_v60 }
 0x125   : > { %v1448_v32 = vpack.c.bf16 %v1440_v40, %v1440_v40  ;;  %v1438_v4 = vmax.f32 %v1430_v41, 0.0  ;;  %v1433_v21 = vadd.f32 %v1633_v12, %v1409_v61  ;;  %v1407_v0 = vadd.f32 %v1621_v31, %v1392_v5 }
 0x126   : > { %v1452_v9 = vpack.c.bf16 %v1444_v48, %v1444_v48  ;;  %v1442_v42 = vmax.f32 %v1434_v11, 0.0  ;;  %v1437_v6 = vadd.f32 %v1641_v63, %v1413_v16  ;;  %v1411_v17 = vadd.f32 %v1621_v31, %v1396_v28 }
 0x127   : > { %1457 = vst.msk [vmem:[%s2351_s30 + $0x8] sm:$0xf] %vm1454_vm3, %v1448_v32  ;;  %v1446_v23 = vpack.c.bf16 %v1438_v4, %v1438_v4  ;;  %v1441_v29 = vmax.f32 %v1433_v21, 0.0  ;;  %v1431_v13 = vadd.f32 %v1629_v47, %v1407_v0 }
 0x128   : > { %1461 = vst.msk [vmem:[%s2351_s30 + $0x18] sm:$0xf] %vm1454_vm3, %v1452_v9  ;;  %v1450_v14 = vpack.c.bf16 %v1442_v42, %v1442_v42  ;;  %v1445_v34 = vmax.f32 %v1437_v6, 0.0  ;;  %v1435_v36 = vadd.f32 %v1637_v20, %v1411_v17 }
 0x129   : > { %1455 = vst.msk [vmem:[%s2351_s30] sm:$0xf] %vm1454_vm3, %v1446_v23  ;;  %v1449_v37 = vpack.c.bf16 %v1441_v29, %v1441_v29  ;;  %v1439_v22 = vmax.f32 %v1431_v13, 0.0 }
 0x12a   : > { %1459 = vst.msk [vmem:[%s2351_s30 + $0x10] sm:$0xf] %vm1454_vm3, %v1450_v14  ;;  %v1453_v33 = vpack.c.bf16 %v1445_v34, %v1445_v34  ;;  %v1443_v38 = vmax.f32 %v1435_v36, 0.0 }
 0x12b   : > { %1458 = vst.msk [vmem:[%s2351_s30 + $0xc] sm:$0xf] %vm1454_vm3, %v1449_v37  ;;  %v1447_v46 = vpack.c.bf16 %v1439_v22, %v1439_v22 }
 0x12c   : > { %1462 = vst.msk [vmem:[%s2351_s30 + $0x1c] sm:$0xf] %vm1454_vm3, %v1453_v33  ;;  %v1451_v57 = vpack.c.bf16 %v1443_v38, %v1443_v38 }
 0x12d   : > { %1456 = vst.msk [vmem:[%s2351_s30 + $0x4] sm:$0xf] %vm1454_vm3, %v1447_v46 }
 0x12e   : > { %1460 = vst.msk [vmem:[%s2351_s30 + $0x14] sm:$0xf] %vm1454_vm3, %v1451_v57 }
 0x12f PF: > { %s14_s15 = sadd.s32 1, %s1929_s15  }
 0x130   : > { %p11_p4 = scmp.ge.s32.totalorder %s14_s15, 4  }
 0x132   :  { %13 = sbr.rel (!%p11_p4) target bundleno = 1 (0x1), region = 69 }

</bundles_post_ra>
